<compile_context>
chip_gen: v5e
topology: v5e:2x2
jax: 0.10.0
libtpu: 0.0.40
codegen_flags: <defaults>
</compile_context>

<pallas_src>
import jax
import jax.numpy as jnp
from jax import lax
from jax.experimental import pallas as pl
from jax.experimental.pallas import tpu as pltpu

_H = 28        # spatial size required by the module (fc1 expects 32*4*4 = 512)
_B_MAX = 64    # max images per grid step (must stay a multiple of 8)


# ----------------------------------------------------------------------------
# Fused Pallas kernel: conv1+ReLU+pool1 -> conv2+ReLU+pool2 -> fc, all in VMEM.
# ----------------------------------------------------------------------------
def _make_cnn_kernel(B):
    """Build the kernel body for a batch tile of B images (B % 8 == 0)."""

    def kernel(xe_ref, w1_ref, b1_ref, a2_ref, b2_ref, wf_ref, bf_ref,
               out_ref, p1_ref):
        f32 = jnp.float32
        bf16 = jnp.bfloat16

        # ---- conv1: kernel rows folded into K -> 2 dots (M=24B, K=140, N=192)
        xe = xe_ref[0]                                       # (24B, 140) bf16
        t1 = [jnp.dot(xe, w1_ref[p], preferred_element_type=f32)   # (24B, 192)
              for p in range(2)]

        # ---- fused 2x2 max-pool + bias + ReLU, written to the VMEM scratch --
        b1v = b1_ref[...]                                    # (1, 192) f32
        for hp in range(12):
            r0 = (2 * hp) * B
            r1 = (2 * hp + 1) * B
            m = jnp.maximum(jnp.maximum(t1[0][r0:r0 + B], t1[0][r1:r1 + B]),
                            jnp.maximum(t1[1][r0:r0 + B], t1[1][r1:r1 + B]))
            p1_ref[hp * B:(hp + 1) * B, :] = jnp.maximum(m + b1v, 0.0)

        # ---- conv2: interleaved dot+accumulate (K=192, N=128, M=8B) ---------
        lhs = p1_ref[0:8 * B, :].astype(bf16)                # (8B, 192)
        acc0 = jnp.dot(lhs, a2_ref[0], preferred_element_type=f32)  # (8B, 128)
        acc1 = jnp.dot(lhs, a2_ref[1], preferred_element_type=f32)
        for i in range(1, 5):
            lhs = p1_ref[i * B:(i + 8) * B, :].astype(bf16)
            acc0 = acc0 + jnp.dot(lhs, a2_ref[2 * i],
                                  preferred_element_type=f32)
            acc1 = acc1 + jnp.dot(lhs, a2_ref[2 * i + 1],
                                  preferred_element_type=f32)

        # ---- fused pool2 + bias + ReLU; lane-aligned concat -> (B, 512) -----
        b2v = b2_ref[...]                                    # (1, 128) f32
        blocks = []
        for h2 in range(4):
            r0 = (2 * h2) * B
            r1 = (2 * h2 + 1) * B
            m = jnp.maximum(jnp.maximum(acc0[r0:r0 + B], acc0[r1:r1 + B]),
                            jnp.maximum(acc1[r0:r0 + B], acc1[r1:r1 + B]))
            blocks.append(jnp.maximum(m + b2v, 0.0).astype(bf16))
        feat = jnp.concatenate(blocks, axis=1)               # (B, 512) bf16

        # ---- fc: single K=512 matmul; output padded 10 -> 128 lanes ---------
        out = jnp.dot(feat, wf_ref[...], preferred_element_type=f32)
        out_ref[...] = (out + bf_ref[...]).astype(out_ref.dtype)

    return kernel


# ----------------------------------------------------------------------------
# Wrapper-side (trace-time) construction of the structured weight matrices.
# ----------------------------------------------------------------------------
def _build_conv1_mats(w1):
    """w1 (16,1,5,5) -> A1 (10,28,192); A1[i*2+p][w, wp*16+co] =
    w1[co,0,i, w-(2*wp+p)], zero outside the 5-tap window."""
    w1 = w1.reshape(16, 5, 5).astype(jnp.float32)
    w_idx = jnp.arange(28)[:, None]
    wp_idx = jnp.arange(12)[None, :]
    mats = []
    for i in range(5):
        for p in range(2):
            j = w_idx - (2 * wp_idx + p)                      # (28, 12)
            valid = (j >= 0) & (j < 5)
            vals = w1[:, i, :][:, jnp.clip(j, 0, 4)]          # (16, 28, 12)
            vals = jnp.transpose(vals, (1, 2, 0))             # (28, 12, 16)
            vals = jnp.where(valid[:, :, None], vals, 0.0)
            mats.append(vals.reshape(28, 192))
    return jnp.stack(mats, axis=0)


def _build_conv1_fold(w1):
    """(2,140,192) bf16; W1[p][i*28+w, wp*16+co] = w1[co,0,i, w-(2*wp+p)]."""
    a1 = _build_conv1_mats(w1)                                # (10, 28, 192)
    w1f = jnp.stack(
        [jnp.concatenate([a1[2 * i + p] for i in range(5)], axis=0)
         for p in range(2)], axis=0)                          # (2, 140, 192)
    return w1f.astype(jnp.bfloat16)


def _build_conv2_mats(w2):
    """w2 (32,16,5,5) -> A2 (10,192,128) bf16; A2[i*2+p][wp*16+c, wq*32+c2] =
    w2[c2,c,i, wp-(2*wq+p)], zero outside the 5-tap window."""
    w2 = w2.astype(jnp.float32)
    wp_idx = jnp.arange(12)[:, None]
    wq_idx = jnp.arange(4)[None, :]
    mats = []
    for i in range(5):
        for p in range(2):
            j = wp_idx - (2 * wq_idx + p)                     # (12, 4)
            valid = (j >= 0) & (j < 5)
            vals = w2[:, :, i, :][:, :, jnp.clip(j, 0, 4)]    # (32, 16, 12, 4)
            vals = jnp.where(valid[None, None, :, :], vals, 0.0)
            vals = jnp.transpose(vals, (2, 1, 3, 0))          # (12, 16, 4, 32)
            mats.append(vals.reshape(192, 128))
    return jnp.stack(mats, axis=0).astype(jnp.bfloat16)


def _build_fc_fold(wf):
    """wf (10,512), torch (C,H,W) flatten -> (512,128) bf16 with
    row index = h2*128 + w2*32 + c2 (matching the lane-concat of pooled2);
    output columns padded 10 -> 128."""
    m = wf.astype(jnp.float32).reshape(10, 32, 4, 4)          # (k, c2, h2, w2)
    m = jnp.transpose(m, (2, 3, 1, 0)).reshape(512, 10)       # rows = h2,w2,c2
    return jnp.pad(m, ((0, 0), (0, 128 - 10))).astype(jnp.bfloat16)


def _choose_tile(n):
    """Pick (batch_tile, grid) : tile % 8 == 0, tile <= _B_MAX, grid >= 2
    whenever the (8-padded) batch allows it (keeps both v7x TCs busy)."""
    n8 = -(-n // 8) * 8
    g = max(1, -(-n8 // _B_MAX))
    if g == 1 and n8 >= 16:
        g = 2
    per = -(-n8 // g)
    bt = -(-per // 8) * 8
    return bt, g


# ----------------------------------------------------------------------------
# Forward pass (matches torch CNNModel.forward)
# ----------------------------------------------------------------------------
def cnn_forward(x_nchw, params):
    w1, b1, w2, b2, wf, bf = params
    n, c, h, w = x_nchw.shape
    assert c == 1 and h == _H and w == _H, (n, c, h, w)

    bt, g = _choose_tile(n)
    npad = bt * g

    x = x_nchw.reshape(n, _H, _H).astype(jnp.float32)
    if npad != n:
        x = jnp.pad(x, ((0, npad - n), (0, 0), (0, 0)))

    # conv1 LHS with the 5 kernel rows folded into the contraction:
    #   xe[grp, h*bt + img, i*28 + w] = x[grp*bt + img, h + i, w]
    xe = jnp.stack([x[:, i:i + 24, :] for i in range(5)], axis=2)  # (npad,24,5,28)
    xe = xe.reshape(npad, 24, 140).reshape(g, bt, 24, 140)
    xe = xe.transpose(0, 2, 1, 3).reshape(g, 24 * bt, 140).astype(jnp.bfloat16)

    w1f = _build_conv1_fold(w1)                                  # (2, 140, 192)
    a2 = _build_conv2_mats(w2)                                   # (10, 192, 128)
    wff = _build_fc_fold(wf)                                     # (512, 128)
    b1t = jnp.tile(b1.astype(jnp.float32), 12)[None, :]          # (1, 192)
    b2t = jnp.tile(b2.astype(jnp.float32), 4)[None, :]           # (1, 128)
    bft = jnp.pad(bf.astype(jnp.float32), (0, 128 - 10))[None, :]  # (1, 128)

    out = pl.pallas_call(
        _make_cnn_kernel(bt),
        out_shape=jax.ShapeDtypeStruct((npad, 128), jnp.float32),
        grid_spec=pltpu.PrefetchScalarGridSpec(
            num_scalar_prefetch=0,
            grid=(g,),
            in_specs=[
                pl.BlockSpec((1, 24 * bt, 140), lambda i: (i, 0, 0)),
                # Weights: constant index_maps -> fetched once, VMEM-resident.
                pl.BlockSpec((2, 140, 192), lambda i: (0, 0, 0)),
                pl.BlockSpec((1, 192), lambda i: (0, 0)),
                pl.BlockSpec((10, 192, 128), lambda i: (0, 0, 0)),
                pl.BlockSpec((1, 128), lambda i: (0, 0)),
                pl.BlockSpec((512, 128), lambda i: (0, 0)),
                pl.BlockSpec((1, 128), lambda i: (0, 0)),
            ],
            out_specs=pl.BlockSpec((bt, 128), lambda i: (i, 0)),
            scratch_shapes=[pltpu.VMEM((12 * bt, 192), jnp.float32)],
        ),
        compiler_params=pltpu.CompilerParams(
            dimension_semantics=("parallel",),
            # Peak at bt=64: ~0.9 MB input buffers + ~1.5 MB weights
            # + ~0.6 MB scratch + ~3 MB f32 temporaries -> well under the
            # 32 MiB scoped limit on v5e/v6e/v7x (v7x physical = 64 MiB).
            vmem_limit_bytes=32 * 1024 * 1024,
        ),
    )(xe, w1f, b1t, a2, b2t, wff, bft)
    return out[:n, :10]


# ----------------------------------------------------------------------------
# Pure-JAX reference (correctness check only)
# ----------------------------------------------------------------------------
def reference_forward(x, params):
    w1, b1, w2, b2, wf, bf = params
    dn = ("NCHW", "OIHW", "NCHW")
    y = lax.conv_general_dilated(x, w1, (1, 1), "VALID", dimension_numbers=dn)
    y = jnp.maximum(y + b1[None, :, None, None], 0.0)
    y = lax.reduce_window(y, -jnp.inf, lax.max, (1, 1, 2, 2), (1, 1, 2, 2), "VALID")
    y = lax.conv_general_dilated(y, w2, (1, 1), "VALID", dimension_numbers=dn)
    y = jnp.maximum(y + b2[None, :, None, None], 0.0)
    y = lax.reduce_window(y, -jnp.inf, lax.max, (1, 1, 2, 2), (1, 1, 2, 2), "VALID")
    y = y.reshape(y.shape[0], -1)
    return y @ wf.T + bf


if __name__ == "__main__":
    keys = jax.random.split(jax.random.PRNGKey(0), 7)
    params = (
        jax.random.normal(keys[0], (16, 1, 5, 5), jnp.float32) * 0.10,   # cnn1.w
        jax.random.normal(keys[1], (16,), jnp.float32) * 0.10,           # cnn1.b
        jax.random.normal(keys[2], (32, 16, 5, 5), jnp.float32) * 0.05,  # cnn2.w
        jax.random.normal(keys[3], (32,), jnp.float32) * 0.05,           # cnn2.b
        jax.random.normal(keys[4], (10, 512), jnp.float32) * 0.05,       # fc1.w
        jax.random.normal(keys[5], (10,), jnp.float32) * 0.05,           # fc1.b
    )
    fwd = jax.jit(cnn_forward)

    # Small demo batch (1 channel, 28x28 required so 32*4*4 = 512 feeds fc1).
    x_small = jax.random.normal(keys[6], (2, 1, 28, 28), jnp.float32)
    out_small = jax.block_until_ready(fwd(x_small, params))
    assert out_small.shape == (2, 10), out_small.shape
    ref_small = reference_forward(x_small, params)
    err_small = float(jnp.max(jnp.abs(out_small - ref_small)))
    assert jnp.allclose(out_small, ref_small, atol=5e-2, rtol=5e-2), (
        "mismatch", err_small)

    # Larger batch: exercises the 32-image tile and the 2-step parallel grid.
    x_big = jax.random.normal(jax.random.PRNGKey(1), (64, 1, 28, 28), jnp.float32)
    out_big = jax.block_until_ready(fwd(x_big, params))
    assert out_big.shape == (64, 10), out_big.shape
    ref_big = reference_forward(x_big, params)
    err_big = float(jnp.max(jnp.abs(out_big - ref_big)))
    assert jnp.allclose(out_big, ref_big, atol=5e-2, rtol=5e-2), (
        "mismatch", err_big)

    print("KERNEL_OK")
</pallas_src>

<mosaic_0001>
module attributes {stable_mosaic.version = 11 : i64} {
  func.func @kernel(%arg0: i32, %arg1: memref<1x192x140xbf16, #tpu.memory_space<vmem>>, %arg2: memref<2x140x192xbf16, #tpu.memory_space<vmem>>, %arg3: memref<1x192xf32, #tpu.memory_space<vmem>>, %arg4: memref<10x192x128xbf16, #tpu.memory_space<vmem>>, %arg5: memref<1x128xf32, #tpu.memory_space<vmem>>, %arg6: memref<512x128xbf16, #tpu.memory_space<vmem>>, %arg7: memref<1x128xf32, #tpu.memory_space<vmem>>, %arg8: memref<8x128xf32, #tpu.memory_space<vmem>>, %arg9: memref<96x192xf32, #tpu.memory_space<vmem>>) attributes {dimension_semantics = [#tpu.dimension_semantics<parallel>], iteration_bounds = array<i64: 1>, scalar_prefetch = 0 : i64, scratch_operands = 1 : i64, tpu.core_type = #tpu.core_type<tc>, window_params = [{transform_indices = @transform_0, window_bounds = array<i64: 1, 192, 140>}, {pipeline_mode = #tpu.pipeline_mode<synchronous>, transform_indices = @transform_1, window_bounds = array<i64: 2, 140, 192>}, {pipeline_mode = #tpu.pipeline_mode<synchronous>, transform_indices = @transform_2, window_bounds = array<i64: 1, 192>}, {pipeline_mode = #tpu.pipeline_mode<synchronous>, transform_indices = @transform_3, window_bounds = array<i64: 10, 192, 128>}, {pipeline_mode = #tpu.pipeline_mode<synchronous>, transform_indices = @transform_4, window_bounds = array<i64: 1, 128>}, {pipeline_mode = #tpu.pipeline_mode<synchronous>, transform_indices = @transform_5, window_bounds = array<i64: 512, 128>}, {pipeline_mode = #tpu.pipeline_mode<synchronous>, transform_indices = @transform_6, window_bounds = array<i64: 1, 128>}, {transform_indices = @transform_7, window_bounds = array<i64: 8, 128>}]} {
    %c0 = arith.constant 0 : index
    %c0_0 = arith.constant 0 : index
    %c0_1 = arith.constant 0 : index
    %0 = vector.load %arg1[%c0, %c0_0, %c0_1] : memref<1x192x140xbf16, #tpu.memory_space<vmem>>, vector<1x192x140xbf16>
    %1 = vector.shape_cast %0 : vector<1x192x140xbf16> to vector<192x140xbf16>
    %c0_2 = arith.constant 0 : index
    %c0_3 = arith.constant 0 : index
    %c0_4 = arith.constant 0 : index
    %2 = vector.load %arg2[%c0_2, %c0_3, %c0_4] : memref<2x140x192xbf16, #tpu.memory_space<vmem>>, vector<1x140x192xbf16>
    %3 = vector.shape_cast %2 : vector<1x140x192xbf16> to vector<140x192xbf16>
    %cst = arith.constant dense<0.000000e+00> : vector<192x192xf32>
    %4 = tpu.matmul %1, %3, %cst {dimension_numbers = #tpu.dot_dimension_numbers<[1], [0], [0], [1], [0, 0, 1, 1], [], []>} : vector<192x140xbf16>, vector<140x192xbf16>, vector<192x192xf32> -> vector<192x192xf32>
    %c1 = arith.constant 1 : index
    %c0_5 = arith.constant 0 : index
    %c0_6 = arith.constant 0 : index
    %5 = vector.load %arg2[%c1, %c0_5, %c0_6] : memref<2x140x192xbf16, #tpu.memory_space<vmem>>, vector<1x140x192xbf16>
    %6 = vector.shape_cast %5 : vector<1x140x192xbf16> to vector<140x192xbf16>
    %cst_7 = arith.constant dense<0.000000e+00> : vector<192x192xf32>
    %7 = tpu.matmul %1, %6, %cst_7 {dimension_numbers = #tpu.dot_dimension_numbers<[1], [0], [0], [1], [0, 0, 1, 1], [], []>} : vector<192x140xbf16>, vector<140x192xbf16>, vector<192x192xf32> -> vector<192x192xf32>
    %c0_8 = arith.constant 0 : index
    %c0_9 = arith.constant 0 : index
    %8 = vector.load %arg3[%c0_8, %c0_9] : memref<1x192xf32, #tpu.memory_space<vmem>>, vector<1x192xf32>
    %9 = vector.extract_strided_slice %4 {offsets = [0, 0], sizes = [8, 192], strides = [1, 1]} : vector<192x192xf32> to vector<8x192xf32>
    %10 = vector.extract_strided_slice %4 {offsets = [8, 0], sizes = [8, 192], strides = [1, 1]} : vector<192x192xf32> to vector<8x192xf32>
    %11 = arith.maximumf %9, %10 : vector<8x192xf32>
    %12 = vector.extract_strided_slice %7 {offsets = [0, 0], sizes = [8, 192], strides = [1, 1]} : vector<192x192xf32> to vector<8x192xf32>
    %13 = vector.extract_strided_slice %7 {offsets = [8, 0], sizes = [8, 192], strides = [1, 1]} : vector<192x192xf32> to vector<8x192xf32>
    %14 = arith.maximumf %12, %13 : vector<8x192xf32>
    %15 = arith.maximumf %11, %14 : vector<8x192xf32>
    %16 = vector.broadcast %8 : vector<1x192xf32> to vector<8x192xf32>
    %17 = arith.addf %15, %16 : vector<8x192xf32>
    %cst_10 = arith.constant 0.000000e+00 : f32
    %18 = vector.broadcast %cst_10 : f32 to vector<8x192xf32>
    %19 = arith.maximumf %17, %18 : vector<8x192xf32>
    %c0_11 = arith.constant 0 : index
    %c0_12 = arith.constant 0 : index
    %20 = vector.load %arg9[%c0_11, %c0_12] : memref<96x192xf32, #tpu.memory_space<vmem>>, vector<8x192xf32>
    tpu.vector_store %arg9[%c0_11, %c0_12], %19 {strides = array<i32>} : memref<96x192xf32, #tpu.memory_space<vmem>>, vector<8x192xf32>,
    %21 = vector.extract_strided_slice %4 {offsets = [16, 0], sizes = [8, 192], strides = [1, 1]} : vector<192x192xf32> to vector<8x192xf32>
    %22 = vector.extract_strided_slice %4 {offsets = [24, 0], sizes = [8, 192], strides = [1, 1]} : vector<192x192xf32> to vector<8x192xf32>
    %23 = arith.maximumf %21, %22 : vector<8x192xf32>
    %24 = vector.extract_strided_slice %7 {offsets = [16, 0], sizes = [8, 192], strides = [1, 1]} : vector<192x192xf32> to vector<8x192xf32>
    %25 = vector.extract_strided_slice %7 {offsets = [24, 0], sizes = [8, 192], strides = [1, 1]} : vector<192x192xf32> to vector<8x192xf32>
    %26 = arith.maximumf %24, %25 : vector<8x192xf32>
    %27 = arith.maximumf %23, %26 : vector<8x192xf32>
    %28 = vector.broadcast %8 : vector<1x192xf32> to vector<8x192xf32>
    %29 = arith.addf %27, %28 : vector<8x192xf32>
    %cst_13 = arith.constant 0.000000e+00 : f32
    %30 = vector.broadcast %cst_13 : f32 to vector<8x192xf32>
    %31 = arith.maximumf %29, %30 : vector<8x192xf32>
    %c8 = arith.constant 8 : index
    %c0_14 = arith.constant 0 : index
    %32 = vector.load %arg9[%c8, %c0_14] : memref<96x192xf32, #tpu.memory_space<vmem>>, vector<8x192xf32>
    tpu.vector_store %arg9[%c8, %c0_14], %31 {strides = array<i32>} : memref<96x192xf32, #tpu.memory_space<vmem>>, vector<8x192xf32>,
    %33 = vector.extract_strided_slice %4 {offsets = [32, 0], sizes = [8, 192], strides = [1, 1]} : vector<192x192xf32> to vector<8x192xf32>
    %34 = vector.extract_strided_slice %4 {offsets = [40, 0], sizes = [8, 192], strides = [1, 1]} : vector<192x192xf32> to vector<8x192xf32>
    %35 = arith.maximumf %33, %34 : vector<8x192xf32>
    %36 = vector.extract_strided_slice %7 {offsets = [32, 0], sizes = [8, 192], strides = [1, 1]} : vector<192x192xf32> to vector<8x192xf32>
    %37 = vector.extract_strided_slice %7 {offsets = [40, 0], sizes = [8, 192], strides = [1, 1]} : vector<192x192xf32> to vector<8x192xf32>
    %38 = arith.maximumf %36, %37 : vector<8x192xf32>
    %39 = arith.maximumf %35, %38 : vector<8x192xf32>
    %40 = vector.broadcast %8 : vector<1x192xf32> to vector<8x192xf32>
    %41 = arith.addf %39, %40 : vector<8x192xf32>
    %cst_15 = arith.constant 0.000000e+00 : f32
    %42 = vector.broadcast %cst_15 : f32 to vector<8x192xf32>
    %43 = arith.maximumf %41, %42 : vector<8x192xf32>
    %c16 = arith.constant 16 : index
    %c0_16 = arith.constant 0 : index
    %44 = vector.load %arg9[%c16, %c0_16] : memref<96x192xf32, #tpu.memory_space<vmem>>, vector<8x192xf32>
    tpu.vector_store %arg9[%c16, %c0_16], %43 {strides = array<i32>} : memref<96x192xf32, #tpu.memory_space<vmem>>, vector<8x192xf32>,
    %45 = vector.extract_strided_slice %4 {offsets = [48, 0], sizes = [8, 192], strides = [1, 1]} : vector<192x192xf32> to vector<8x192xf32>
    %46 = vector.extract_strided_slice %4 {offsets = [56, 0], sizes = [8, 192], strides = [1, 1]} : vector<192x192xf32> to vector<8x192xf32>
    %47 = arith.maximumf %45, %46 : vector<8x192xf32>
    %48 = vector.extract_strided_slice %7 {offsets = [48, 0], sizes = [8, 192], strides = [1, 1]} : vector<192x192xf32> to vector<8x192xf32>
    %49 = vector.extract_strided_slice %7 {offsets = [56, 0], sizes = [8, 192], strides = [1, 1]} : vector<192x192xf32> to vector<8x192xf32>
    %50 = arith.maximumf %48, %49 : vector<8x192xf32>
    %51 = arith.maximumf %47, %50 : vector<8x192xf32>
    %52 = vector.broadcast %8 : vector<1x192xf32> to vector<8x192xf32>
    %53 = arith.addf %51, %52 : vector<8x192xf32>
    %cst_17 = arith.constant 0.000000e+00 : f32
    %54 = vector.broadcast %cst_17 : f32 to vector<8x192xf32>
    %55 = arith.maximumf %53, %54 : vector<8x192xf32>
    %c24 = arith.constant 24 : index
    %c0_18 = arith.constant 0 : index
    %56 = vector.load %arg9[%c24, %c0_18] : memref<96x192xf32, #tpu.memory_space<vmem>>, vector<8x192xf32>
    tpu.vector_store %arg9[%c24, %c0_18], %55 {strides = array<i32>} : memref<96x192xf32, #tpu.memory_space<vmem>>, vector<8x192xf32>,
    %57 = vector.extract_strided_slice %4 {offsets = [64, 0], sizes = [8, 192], strides = [1, 1]} : vector<192x192xf32> to vector<8x192xf32>
    %58 = vector.extract_strided_slice %4 {offsets = [72, 0], sizes = [8, 192], strides = [1, 1]} : vector<192x192xf32> to vector<8x192xf32>
    %59 = arith.maximumf %57, %58 : vector<8x192xf32>
    %60 = vector.extract_strided_slice %7 {offsets = [64, 0], sizes = [8, 192], strides = [1, 1]} : vector<192x192xf32> to vector<8x192xf32>
    %61 = vector.extract_strided_slice %7 {offsets = [72, 0], sizes = [8, 192], strides = [1, 1]} : vector<192x192xf32> to vector<8x192xf32>
    %62 = arith.maximumf %60, %61 : vector<8x192xf32>
    %63 = arith.maximumf %59, %62 : vector<8x192xf32>
    %64 = vector.broadcast %8 : vector<1x192xf32> to vector<8x192xf32>
    %65 = arith.addf %63, %64 : vector<8x192xf32>
    %cst_19 = arith.constant 0.000000e+00 : f32
    %66 = vector.broadcast %cst_19 : f32 to vector<8x192xf32>
    %67 = arith.maximumf %65, %66 : vector<8x192xf32>
    %c32 = arith.constant 32 : index
    %c0_20 = arith.constant 0 : index
    %68 = vector.load %arg9[%c32, %c0_20] : memref<96x192xf32, #tpu.memory_space<vmem>>, vector<8x192xf32>
    tpu.vector_store %arg9[%c32, %c0_20], %67 {strides = array<i32>} : memref<96x192xf32, #tpu.memory_space<vmem>>, vector<8x192xf32>,
    %69 = vector.extract_strided_slice %4 {offsets = [80, 0], sizes = [8, 192], strides = [1, 1]} : vector<192x192xf32> to vector<8x192xf32>
    %70 = vector.extract_strided_slice %4 {offsets = [88, 0], sizes = [8, 192], strides = [1, 1]} : vector<192x192xf32> to vector<8x192xf32>
    %71 = arith.maximumf %69, %70 : vector<8x192xf32>
    %72 = vector.extract_strided_slice %7 {offsets = [80, 0], sizes = [8, 192], strides = [1, 1]} : vector<192x192xf32> to vector<8x192xf32>
    %73 = vector.extract_strided_slice %7 {offsets = [88, 0], sizes = [8, 192], strides = [1, 1]} : vector<192x192xf32> to vector<8x192xf32>
    %74 = arith.maximumf %72, %73 : vector<8x192xf32>
    %75 = arith.maximumf %71, %74 : vector<8x192xf32>
    %76 = vector.broadcast %8 : vector<1x192xf32> to vector<8x192xf32>
    %77 = arith.addf %75, %76 : vector<8x192xf32>
    %cst_21 = arith.constant 0.000000e+00 : f32
    %78 = vector.broadcast %cst_21 : f32 to vector<8x192xf32>
    %79 = arith.maximumf %77, %78 : vector<8x192xf32>
    %c40 = arith.constant 40 : index
    %c0_22 = arith.constant 0 : index
    %80 = vector.load %arg9[%c40, %c0_22] : memref<96x192xf32, #tpu.memory_space<vmem>>, vector<8x192xf32>
    tpu.vector_store %arg9[%c40, %c0_22], %79 {strides = array<i32>} : memref<96x192xf32, #tpu.memory_space<vmem>>, vector<8x192xf32>,
    %81 = vector.extract_strided_slice %4 {offsets = [96, 0], sizes = [8, 192], strides = [1, 1]} : vector<192x192xf32> to vector<8x192xf32>
    %82 = vector.extract_strided_slice %4 {offsets = [104, 0], sizes = [8, 192], strides = [1, 1]} : vector<192x192xf32> to vector<8x192xf32>
    %83 = arith.maximumf %81, %82 : vector<8x192xf32>
    %84 = vector.extract_strided_slice %7 {offsets = [96, 0], sizes = [8, 192], strides = [1, 1]} : vector<192x192xf32> to vector<8x192xf32>
    %85 = vector.extract_strided_slice %7 {offsets = [104, 0], sizes = [8, 192], strides = [1, 1]} : vector<192x192xf32> to vector<8x192xf32>
    %86 = arith.maximumf %84, %85 : vector<8x192xf32>
    %87 = arith.maximumf %83, %86 : vector<8x192xf32>
    %88 = vector.broadcast %8 : vector<1x192xf32> to vector<8x192xf32>
    %89 = arith.addf %87, %88 : vector<8x192xf32>
    %cst_23 = arith.constant 0.000000e+00 : f32
    %90 = vector.broadcast %cst_23 : f32 to vector<8x192xf32>
    %91 = arith.maximumf %89, %90 : vector<8x192xf32>
    %c48 = arith.constant 48 : index
    %c0_24 = arith.constant 0 : index
    %92 = vector.load %arg9[%c48, %c0_24] : memref<96x192xf32, #tpu.memory_space<vmem>>, vector<8x192xf32>
    tpu.vector_store %arg9[%c48, %c0_24], %91 {strides = array<i32>} : memref<96x192xf32, #tpu.memory_space<vmem>>, vector<8x192xf32>,
    %93 = vector.extract_strided_slice %4 {offsets = [112, 0], sizes = [8, 192], strides = [1, 1]} : vector<192x192xf32> to vector<8x192xf32>
    %94 = vector.extract_strided_slice %4 {offsets = [120, 0], sizes = [8, 192], strides = [1, 1]} : vector<192x192xf32> to vector<8x192xf32>
    %95 = arith.maximumf %93, %94 : vector<8x192xf32>
    %96 = vector.extract_strided_slice %7 {offsets = [112, 0], sizes = [8, 192], strides = [1, 1]} : vector<192x192xf32> to vector<8x192xf32>
    %97 = vector.extract_strided_slice %7 {offsets = [120, 0], sizes = [8, 192], strides = [1, 1]} : vector<192x192xf32> to vector<8x192xf32>
    %98 = arith.maximumf %96, %97 : vector<8x192xf32>
    %99 = arith.maximumf %95, %98 : vector<8x192xf32>
    %100 = vector.broadcast %8 : vector<1x192xf32> to vector<8x192xf32>
    %101 = arith.addf %99, %100 : vector<8x192xf32>
    %cst_25 = arith.constant 0.000000e+00 : f32
    %102 = vector.broadcast %cst_25 : f32 to vector<8x192xf32>
    %103 = arith.maximumf %101, %102 : vector<8x192xf32>
    %c56 = arith.constant 56 : index
    %c0_26 = arith.constant 0 : index
    %104 = vector.load %arg9[%c56, %c0_26] : memref<96x192xf32, #tpu.memory_space<vmem>>, vector<8x192xf32>
    tpu.vector_store %arg9[%c56, %c0_26], %103 {strides = array<i32>} : memref<96x192xf32, #tpu.memory_space<vmem>>, vector<8x192xf32>,
    %105 = vector.extract_strided_slice %4 {offsets = [128, 0], sizes = [8, 192], strides = [1, 1]} : vector<192x192xf32> to vector<8x192xf32>
    %106 = vector.extract_strided_slice %4 {offsets = [136, 0], sizes = [8, 192], strides = [1, 1]} : vector<192x192xf32> to vector<8x192xf32>
    %107 = arith.maximumf %105, %106 : vector<8x192xf32>
    %108 = vector.extract_strided_slice %7 {offsets = [128, 0], sizes = [8, 192], strides = [1, 1]} : vector<192x192xf32> to vector<8x192xf32>
    %109 = vector.extract_strided_slice %7 {offsets = [136, 0], sizes = [8, 192], strides = [1, 1]} : vector<192x192xf32> to vector<8x192xf32>
    %110 = arith.maximumf %108, %109 : vector<8x192xf32>
    %111 = arith.maximumf %107, %110 : vector<8x192xf32>
    %112 = vector.broadcast %8 : vector<1x192xf32> to vector<8x192xf32>
    %113 = arith.addf %111, %112 : vector<8x192xf32>
    %cst_27 = arith.constant 0.000000e+00 : f32
    %114 = vector.broadcast %cst_27 : f32 to vector<8x192xf32>
    %115 = arith.maximumf %113, %114 : vector<8x192xf32>
    %c64 = arith.constant 64 : index
    %c0_28 = arith.constant 0 : index
    %116 = vector.load %arg9[%c64, %c0_28] : memref<96x192xf32, #tpu.memory_space<vmem>>, vector<8x192xf32>
    tpu.vector_store %arg9[%c64, %c0_28], %115 {strides = array<i32>} : memref<96x192xf32, #tpu.memory_space<vmem>>, vector<8x192xf32>,
    %117 = vector.extract_strided_slice %4 {offsets = [144, 0], sizes = [8, 192], strides = [1, 1]} : vector<192x192xf32> to vector<8x192xf32>
    %118 = vector.extract_strided_slice %4 {offsets = [152, 0], sizes = [8, 192], strides = [1, 1]} : vector<192x192xf32> to vector<8x192xf32>
    %119 = arith.maximumf %117, %118 : vector<8x192xf32>
    %120 = vector.extract_strided_slice %7 {offsets = [144, 0], sizes = [8, 192], strides = [1, 1]} : vector<192x192xf32> to vector<8x192xf32>
    %121 = vector.extract_strided_slice %7 {offsets = [152, 0], sizes = [8, 192], strides = [1, 1]} : vector<192x192xf32> to vector<8x192xf32>
    %122 = arith.maximumf %120, %121 : vector<8x192xf32>
    %123 = arith.maximumf %119, %122 : vector<8x192xf32>
    %124 = vector.broadcast %8 : vector<1x192xf32> to vector<8x192xf32>
    %125 = arith.addf %123, %124 : vector<8x192xf32>
    %cst_29 = arith.constant 0.000000e+00 : f32
    %126 = vector.broadcast %cst_29 : f32 to vector<8x192xf32>
    %127 = arith.maximumf %125, %126 : vector<8x192xf32>
    %c72 = arith.constant 72 : index
    %c0_30 = arith.constant 0 : index
    %128 = vector.load %arg9[%c72, %c0_30] : memref<96x192xf32, #tpu.memory_space<vmem>>, vector<8x192xf32>
    tpu.vector_store %arg9[%c72, %c0_30], %127 {strides = array<i32>} : memref<96x192xf32, #tpu.memory_space<vmem>>, vector<8x192xf32>,
    %129 = vector.extract_strided_slice %4 {offsets = [160, 0], sizes = [8, 192], strides = [1, 1]} : vector<192x192xf32> to vector<8x192xf32>
    %130 = vector.extract_strided_slice %4 {offsets = [168, 0], sizes = [8, 192], strides = [1, 1]} : vector<192x192xf32> to vector<8x192xf32>
    %131 = arith.maximumf %129, %130 : vector<8x192xf32>
    %132 = vector.extract_strided_slice %7 {offsets = [160, 0], sizes = [8, 192], strides = [1, 1]} : vector<192x192xf32> to vector<8x192xf32>
    %133 = vector.extract_strided_slice %7 {offsets = [168, 0], sizes = [8, 192], strides = [1, 1]} : vector<192x192xf32> to vector<8x192xf32>
    %134 = arith.maximumf %132, %133 : vector<8x192xf32>
    %135 = arith.maximumf %131, %134 : vector<8x192xf32>
    %136 = vector.broadcast %8 : vector<1x192xf32> to vector<8x192xf32>
    %137 = arith.addf %135, %136 : vector<8x192xf32>
    %cst_31 = arith.constant 0.000000e+00 : f32
    %138 = vector.broadcast %cst_31 : f32 to vector<8x192xf32>
    %139 = arith.maximumf %137, %138 : vector<8x192xf32>
    %c80 = arith.constant 80 : index
    %c0_32 = arith.constant 0 : index
    %140 = vector.load %arg9[%c80, %c0_32] : memref<96x192xf32, #tpu.memory_space<vmem>>, vector<8x192xf32>
    tpu.vector_store %arg9[%c80, %c0_32], %139 {strides = array<i32>} : memref<96x192xf32, #tpu.memory_space<vmem>>, vector<8x192xf32>,
    %141 = vector.extract_strided_slice %4 {offsets = [176, 0], sizes = [8, 192], strides = [1, 1]} : vector<192x192xf32> to vector<8x192xf32>
    %142 = vector.extract_strided_slice %4 {offsets = [184, 0], sizes = [8, 192], strides = [1, 1]} : vector<192x192xf32> to vector<8x192xf32>
    %143 = arith.maximumf %141, %142 : vector<8x192xf32>
    %144 = vector.extract_strided_slice %7 {offsets = [176, 0], sizes = [8, 192], strides = [1, 1]} : vector<192x192xf32> to vector<8x192xf32>
    %145 = vector.extract_strided_slice %7 {offsets = [184, 0], sizes = [8, 192], strides = [1, 1]} : vector<192x192xf32> to vector<8x192xf32>
    %146 = arith.maximumf %144, %145 : vector<8x192xf32>
    %147 = arith.maximumf %143, %146 : vector<8x192xf32>
    %148 = vector.broadcast %8 : vector<1x192xf32> to vector<8x192xf32>
    %149 = arith.addf %147, %148 : vector<8x192xf32>
    %cst_33 = arith.constant 0.000000e+00 : f32
    %150 = vector.broadcast %cst_33 : f32 to vector<8x192xf32>
    %151 = arith.maximumf %149, %150 : vector<8x192xf32>
    %c88 = arith.constant 88 : index
    %c0_34 = arith.constant 0 : index
    %152 = vector.load %arg9[%c88, %c0_34] : memref<96x192xf32, #tpu.memory_space<vmem>>, vector<8x192xf32>
    tpu.vector_store %arg9[%c88, %c0_34], %151 {strides = array<i32>} : memref<96x192xf32, #tpu.memory_space<vmem>>, vector<8x192xf32>,
    %c0_35 = arith.constant 0 : index
    %c0_36 = arith.constant 0 : index
    %153 = vector.load %arg9[%c0_35, %c0_36] : memref<96x192xf32, #tpu.memory_space<vmem>>, vector<64x192xf32>
    %154 = arith.truncf %153 : vector<64x192xf32> to vector<64x192xbf16>
    %c0_37 = arith.constant 0 : index
    %c0_38 = arith.constant 0 : index
    %c0_39 = arith.constant 0 : index
    %155 = vector.load %arg4[%c0_37, %c0_38, %c0_39] : memref<10x192x128xbf16, #tpu.memory_space<vmem>>, vector<1x192x128xbf16>
    %156 = vector.shape_cast %155 : vector<1x192x128xbf16> to vector<192x128xbf16>
    %cst_40 = arith.constant dense<0.000000e+00> : vector<64x128xf32>
    %157 = tpu.matmul %154, %156, %cst_40 {dimension_numbers = #tpu.dot_dimension_numbers<[1], [0], [0], [1], [0, 0, 1, 1], [], []>} : vector<64x192xbf16>, vector<192x128xbf16>, vector<64x128xf32> -> vector<64x128xf32>
    %c1_41 = arith.constant 1 : index
    %c0_42 = arith.constant 0 : index
    %c0_43 = arith.constant 0 : index
    %158 = vector.load %arg4[%c1_41, %c0_42, %c0_43] : memref<10x192x128xbf16, #tpu.memory_space<vmem>>, vector<1x192x128xbf16>
    %159 = vector.shape_cast %158 : vector<1x192x128xbf16> to vector<192x128xbf16>
    %cst_44 = arith.constant dense<0.000000e+00> : vector<64x128xf32>
    %160 = tpu.matmul %154, %159, %cst_44 {dimension_numbers = #tpu.dot_dimension_numbers<[1], [0], [0], [1], [0, 0, 1, 1], [], []>} : vector<64x192xbf16>, vector<192x128xbf16>, vector<64x128xf32> -> vector<64x128xf32>
    %c8_45 = arith.constant 8 : index
    %c0_46 = arith.constant 0 : index
    %161 = vector.load %arg9[%c8_45, %c0_46] : memref<96x192xf32, #tpu.memory_space<vmem>>, vector<64x192xf32>
    %162 = arith.truncf %161 : vector<64x192xf32> to vector<64x192xbf16>
    %c2 = arith.constant 2 : index
    %c0_47 = arith.constant 0 : index
    %c0_48 = arith.constant 0 : index
    %163 = vector.load %arg4[%c2, %c0_47, %c0_48] : memref<10x192x128xbf16, #tpu.memory_space<vmem>>, vector<1x192x128xbf16>
    %164 = vector.shape_cast %163 : vector<1x192x128xbf16> to vector<192x128xbf16>
    %cst_49 = arith.constant dense<0.000000e+00> : vector<64x128xf32>
    %165 = tpu.matmul %162, %164, %cst_49 {dimension_numbers = #tpu.dot_dimension_numbers<[1], [0], [0], [1], [0, 0, 1, 1], [], []>} : vector<64x192xbf16>, vector<192x128xbf16>, vector<64x128xf32> -> vector<64x128xf32>
    %166 = arith.addf %157, %165 : vector<64x128xf32>
    %c3 = arith.constant 3 : index
    %c0_50 = arith.constant 0 : index
    %c0_51 = arith.constant 0 : index
    %167 = vector.load %arg4[%c3, %c0_50, %c0_51] : memref<10x192x128xbf16, #tpu.memory_space<vmem>>, vector<1x192x128xbf16>
    %168 = vector.shape_cast %167 : vector<1x192x128xbf16> to vector<192x128xbf16>
    %cst_52 = arith.constant dense<0.000000e+00> : vector<64x128xf32>
    %169 = tpu.matmul %162, %168, %cst_52 {dimension_numbers = #tpu.dot_dimension_numbers<[1], [0], [0], [1], [0, 0, 1, 1], [], []>} : vector<64x192xbf16>, vector<192x128xbf16>, vector<64x128xf32> -> vector<64x128xf32>
    %170 = arith.addf %160, %169 : vector<64x128xf32>
    %c16_53 = arith.constant 16 : index
    %c0_54 = arith.constant 0 : index
    %171 = vector.load %arg9[%c16_53, %c0_54] : memref<96x192xf32, #tpu.memory_space<vmem>>, vector<64x192xf32>
    %172 = arith.truncf %171 : vector<64x192xf32> to vector<64x192xbf16>
    %c4 = arith.constant 4 : index
    %c0_55 = arith.constant 0 : index
    %c0_56 = arith.constant 0 : index
    %173 = vector.load %arg4[%c4, %c0_55, %c0_56] : memref<10x192x128xbf16, #tpu.memory_space<vmem>>, vector<1x192x128xbf16>
    %174 = vector.shape_cast %173 : vector<1x192x128xbf16> to vector<192x128xbf16>
    %cst_57 = arith.constant dense<0.000000e+00> : vector<64x128xf32>
    %175 = tpu.matmul %172, %174, %cst_57 {dimension_numbers = #tpu.dot_dimension_numbers<[1], [0], [0], [1], [0, 0, 1, 1], [], []>} : vector<64x192xbf16>, vector<192x128xbf16>, vector<64x128xf32> -> vector<64x128xf32>
    %176 = arith.addf %166, %175 : vector<64x128xf32>
    %c5 = arith.constant 5 : index
    %c0_58 = arith.constant 0 : index
    %c0_59 = arith.constant 0 : index
    %177 = vector.load %arg4[%c5, %c0_58, %c0_59] : memref<10x192x128xbf16, #tpu.memory_space<vmem>>, vector<1x192x128xbf16>
    %178 = vector.shape_cast %177 : vector<1x192x128xbf16> to vector<192x128xbf16>
    %cst_60 = arith.constant dense<0.000000e+00> : vector<64x128xf32>
    %179 = tpu.matmul %172, %178, %cst_60 {dimension_numbers = #tpu.dot_dimension_numbers<[1], [0], [0], [1], [0, 0, 1, 1], [], []>} : vector<64x192xbf16>, vector<192x128xbf16>, vector<64x128xf32> -> vector<64x128xf32>
    %180 = arith.addf %170, %179 : vector<64x128xf32>
    %c24_61 = arith.constant 24 : index
    %c0_62 = arith.constant 0 : index
    %181 = vector.load %arg9[%c24_61, %c0_62] : memref<96x192xf32, #tpu.memory_space<vmem>>, vector<64x192xf32>
    %182 = arith.truncf %181 : vector<64x192xf32> to vector<64x192xbf16>
    %c6 = arith.constant 6 : index
    %c0_63 = arith.constant 0 : index
    %c0_64 = arith.constant 0 : index
    %183 = vector.load %arg4[%c6, %c0_63, %c0_64] : memref<10x192x128xbf16, #tpu.memory_space<vmem>>, vector<1x192x128xbf16>
    %184 = vector.shape_cast %183 : vector<1x192x128xbf16> to vector<192x128xbf16>
    %cst_65 = arith.constant dense<0.000000e+00> : vector<64x128xf32>
    %185 = tpu.matmul %182, %184, %cst_65 {dimension_numbers = #tpu.dot_dimension_numbers<[1], [0], [0], [1], [0, 0, 1, 1], [], []>} : vector<64x192xbf16>, vector<192x128xbf16>, vector<64x128xf32> -> vector<64x128xf32>
    %186 = arith.addf %176, %185 : vector<64x128xf32>
    %c7 = arith.constant 7 : index
    %c0_66 = arith.constant 0 : index
    %c0_67 = arith.constant 0 : index
    %187 = vector.load %arg4[%c7, %c0_66, %c0_67] : memref<10x192x128xbf16, #tpu.memory_space<vmem>>, vector<1x192x128xbf16>
    %188 = vector.shape_cast %187 : vector<1x192x128xbf16> to vector<192x128xbf16>
    %cst_68 = arith.constant dense<0.000000e+00> : vector<64x128xf32>
    %189 = tpu.matmul %182, %188, %cst_68 {dimension_numbers = #tpu.dot_dimension_numbers<[1], [0], [0], [1], [0, 0, 1, 1], [], []>} : vector<64x192xbf16>, vector<192x128xbf16>, vector<64x128xf32> -> vector<64x128xf32>
    %190 = arith.addf %180, %189 : vector<64x128xf32>
    %c32_69 = arith.constant 32 : index
    %c0_70 = arith.constant 0 : index
    %191 = vector.load %arg9[%c32_69, %c0_70] : memref<96x192xf32, #tpu.memory_space<vmem>>, vector<64x192xf32>
    %192 = arith.truncf %191 : vector<64x192xf32> to vector<64x192xbf16>
    %c8_71 = arith.constant 8 : index
    %c0_72 = arith.constant 0 : index
    %c0_73 = arith.constant 0 : index
    %193 = vector.load %arg4[%c8_71, %c0_72, %c0_73] : memref<10x192x128xbf16, #tpu.memory_space<vmem>>, vector<1x192x128xbf16>
    %194 = vector.shape_cast %193 : vector<1x192x128xbf16> to vector<192x128xbf16>
    %cst_74 = arith.constant dense<0.000000e+00> : vector<64x128xf32>
    %195 = tpu.matmul %192, %194, %cst_74 {dimension_numbers = #tpu.dot_dimension_numbers<[1], [0], [0], [1], [0, 0, 1, 1], [], []>} : vector<64x192xbf16>, vector<192x128xbf16>, vector<64x128xf32> -> vector<64x128xf32>
    %196 = arith.addf %186, %195 : vector<64x128xf32>
    %c9 = arith.constant 9 : index
    %c0_75 = arith.constant 0 : index
    %c0_76 = arith.constant 0 : index
    %197 = vector.load %arg4[%c9, %c0_75, %c0_76] : memref<10x192x128xbf16, #tpu.memory_space<vmem>>, vector<1x192x128xbf16>
    %198 = vector.shape_cast %197 : vector<1x192x128xbf16> to vector<192x128xbf16>
    %cst_77 = arith.constant dense<0.000000e+00> : vector<64x128xf32>
    %199 = tpu.matmul %192, %198, %cst_77 {dimension_numbers = #tpu.dot_dimension_numbers<[1], [0], [0], [1], [0, 0, 1, 1], [], []>} : vector<64x192xbf16>, vector<192x128xbf16>, vector<64x128xf32> -> vector<64x128xf32>
    %200 = arith.addf %190, %199 : vector<64x128xf32>
    %c0_78 = arith.constant 0 : index
    %c0_79 = arith.constant 0 : index
    %201 = vector.load %arg5[%c0_78, %c0_79] : memref<1x128xf32, #tpu.memory_space<vmem>>, vector<1x128xf32>
    %202 = vector.extract_strided_slice %196 {offsets = [0, 0], sizes = [8, 128], strides = [1, 1]} : vector<64x128xf32> to vector<8x128xf32>
    %203 = vector.extract_strided_slice %196 {offsets = [8, 0], sizes = [8, 128], strides = [1, 1]} : vector<64x128xf32> to vector<8x128xf32>
    %204 = arith.maximumf %202, %203 : vector<8x128xf32>
    %205 = vector.extract_strided_slice %200 {offsets = [0, 0], sizes = [8, 128], strides = [1, 1]} : vector<64x128xf32> to vector<8x128xf32>
    %206 = vector.extract_strided_slice %200 {offsets = [8, 0], sizes = [8, 128], strides = [1, 1]} : vector<64x128xf32> to vector<8x128xf32>
    %207 = arith.maximumf %205, %206 : vector<8x128xf32>
    %208 = arith.maximumf %204, %207 : vector<8x128xf32>
    %209 = vector.broadcast %201 : vector<1x128xf32> to vector<8x128xf32>
    %210 = arith.addf %208, %209 : vector<8x128xf32>
    %cst_80 = arith.constant 0.000000e+00 : f32
    %211 = vector.broadcast %cst_80 : f32 to vector<8x128xf32>
    %212 = arith.maximumf %210, %211 : vector<8x128xf32>
    %213 = arith.truncf %212 : vector<8x128xf32> to vector<8x128xbf16>
    %214 = vector.extract_strided_slice %196 {offsets = [16, 0], sizes = [8, 128], strides = [1, 1]} : vector<64x128xf32> to vector<8x128xf32>
    %215 = vector.extract_strided_slice %196 {offsets = [24, 0], sizes = [8, 128], strides = [1, 1]} : vector<64x128xf32> to vector<8x128xf32>
    %216 = arith.maximumf %214, %215 : vector<8x128xf32>
    %217 = vector.extract_strided_slice %200 {offsets = [16, 0], sizes = [8, 128], strides = [1, 1]} : vector<64x128xf32> to vector<8x128xf32>
    %218 = vector.extract_strided_slice %200 {offsets = [24, 0], sizes = [8, 128], strides = [1, 1]} : vector<64x128xf32> to vector<8x128xf32>
    %219 = arith.maximumf %217, %218 : vector<8x128xf32>
    %220 = arith.maximumf %216, %219 : vector<8x128xf32>
    %221 = vector.broadcast %201 : vector<1x128xf32> to vector<8x128xf32>
    %222 = arith.addf %220, %221 : vector<8x128xf32>
    %cst_81 = arith.constant 0.000000e+00 : f32
    %223 = vector.broadcast %cst_81 : f32 to vector<8x128xf32>
    %224 = arith.maximumf %222, %223 : vector<8x128xf32>
    %225 = arith.truncf %224 : vector<8x128xf32> to vector<8x128xbf16>
    %226 = vector.extract_strided_slice %196 {offsets = [32, 0], sizes = [8, 128], strides = [1, 1]} : vector<64x128xf32> to vector<8x128xf32>
    %227 = vector.extract_strided_slice %196 {offsets = [40, 0], sizes = [8, 128], strides = [1, 1]} : vector<64x128xf32> to vector<8x128xf32>
    %228 = arith.maximumf %226, %227 : vector<8x128xf32>
    %229 = vector.extract_strided_slice %200 {offsets = [32, 0], sizes = [8, 128], strides = [1, 1]} : vector<64x128xf32> to vector<8x128xf32>
    %230 = vector.extract_strided_slice %200 {offsets = [40, 0], sizes = [8, 128], strides = [1, 1]} : vector<64x128xf32> to vector<8x128xf32>
    %231 = arith.maximumf %229, %230 : vector<8x128xf32>
    %232 = arith.maximumf %228, %231 : vector<8x128xf32>
    %233 = vector.broadcast %201 : vector<1x128xf32> to vector<8x128xf32>
    %234 = arith.addf %232, %233 : vector<8x128xf32>
    %cst_82 = arith.constant 0.000000e+00 : f32
    %235 = vector.broadcast %cst_82 : f32 to vector<8x128xf32>
    %236 = arith.maximumf %234, %235 : vector<8x128xf32>
    %237 = arith.truncf %236 : vector<8x128xf32> to vector<8x128xbf16>
    %238 = vector.extract_strided_slice %196 {offsets = [48, 0], sizes = [8, 128], strides = [1, 1]} : vector<64x128xf32> to vector<8x128xf32>
    %239 = vector.extract_strided_slice %196 {offsets = [56, 0], sizes = [8, 128], strides = [1, 1]} : vector<64x128xf32> to vector<8x128xf32>
    %240 = arith.maximumf %238, %239 : vector<8x128xf32>
    %241 = vector.extract_strided_slice %200 {offsets = [48, 0], sizes = [8, 128], strides = [1, 1]} : vector<64x128xf32> to vector<8x128xf32>
    %242 = vector.extract_strided_slice %200 {offsets = [56, 0], sizes = [8, 128], strides = [1, 1]} : vector<64x128xf32> to vector<8x128xf32>
    %243 = arith.maximumf %241, %242 : vector<8x128xf32>
    %244 = arith.maximumf %240, %243 : vector<8x128xf32>
    %245 = vector.broadcast %201 : vector<1x128xf32> to vector<8x128xf32>
    %246 = arith.addf %244, %245 : vector<8x128xf32>
    %cst_83 = arith.constant 0.000000e+00 : f32
    %247 = vector.broadcast %cst_83 : f32 to vector<8x128xf32>
    %248 = arith.maximumf %246, %247 : vector<8x128xf32>
    %249 = arith.truncf %248 : vector<8x128xf32> to vector<8x128xbf16>
    %250 = tpu.concatenate %213, %225, %237, %249 in 1 : vector<8x128xbf16>, vector<8x128xbf16>, vector<8x128xbf16>, vector<8x128xbf16> -> vector<8x512xbf16>
    %c0_84 = arith.constant 0 : index
    %c0_85 = arith.constant 0 : index
    %251 = vector.load %arg6[%c0_84, %c0_85] : memref<512x128xbf16, #tpu.memory_space<vmem>>, vector<512x128xbf16>
    %cst_86 = arith.constant dense<0.000000e+00> : vector<8x128xf32>
    %252 = tpu.matmul %250, %251, %cst_86 {dimension_numbers = #tpu.dot_dimension_numbers<[1], [0], [0], [1], [0, 0, 1, 1], [], []>} : vector<8x512xbf16>, vector<512x128xbf16>, vector<8x128xf32> -> vector<8x128xf32>
    %c0_87 = arith.constant 0 : index
    %c0_88 = arith.constant 0 : index
    %253 = vector.load %arg7[%c0_87, %c0_88] : memref<1x128xf32, #tpu.memory_space<vmem>>, vector<1x128xf32>
    %254 = vector.broadcast %253 : vector<1x128xf32> to vector<8x128xf32>
    %255 = arith.addf %252, %254 : vector<8x128xf32>
    %c0_89 = arith.constant 0 : index
    %c0_90 = arith.constant 0 : index
    %256 = vector.load %arg8[%c0_89, %c0_90] : memref<8x128xf32, #tpu.memory_space<vmem>>, vector<8x128xf32>
    tpu.vector_store %arg8[%c0_89, %c0_90], %255 {strides = array<i32>} : memref<8x128xf32, #tpu.memory_space<vmem>>, vector<8x128xf32>,
    return
  }
  func.func @transform_0(%arg0: i32) -> (i32, i32, i32) {
    %c0_i32 = arith.constant 0 : i32
    %c0_i32_0 = arith.constant 0 : i32
    %c0_i32_1 = arith.constant 0 : i32
    return %arg0, %c0_i32, %c0_i32_0 : i32, i32, i32
  }
  func.func @transform_1(%arg0: i32) -> (i32, i32, i32) {
    %c0_i32 = arith.constant 0 : i32
    %c0_i32_0 = arith.constant 0 : i32
    %c0_i32_1 = arith.constant 0 : i32
    %c0_i32_2 = arith.constant 0 : i32
    return %c0_i32, %c0_i32_0, %c0_i32_1 : i32, i32, i32
  }
  func.func @transform_2(%arg0: i32) -> (i32, i32) {
    %c0_i32 = arith.constant 0 : i32
    %c0_i32_0 = arith.constant 0 : i32
    %c0_i32_1 = arith.constant 0 : i32
    return %c0_i32, %c0_i32_0 : i32, i32
  }
  func.func @transform_3(%arg0: i32) -> (i32, i32, i32) {
    %c0_i32 = arith.constant 0 : i32
    %c0_i32_0 = arith.constant 0 : i32
    %c0_i32_1 = arith.constant 0 : i32
    %c0_i32_2 = arith.constant 0 : i32
    return %c0_i32, %c0_i32_0, %c0_i32_1 : i32, i32, i32
  }
  func.func @transform_4(%arg0: i32) -> (i32, i32) {
    %c0_i32 = arith.constant 0 : i32
    %c0_i32_0 = arith.constant 0 : i32
    %c0_i32_1 = arith.constant 0 : i32
    return %c0_i32, %c0_i32_0 : i32, i32
  }
  func.func @transform_5(%arg0: i32) -> (i32, i32) {
    %c0_i32 = arith.constant 0 : i32
    %c0_i32_0 = arith.constant 0 : i32
    %c0_i32_1 = arith.constant 0 : i32
    return %c0_i32, %c0_i32_0 : i32, i32
  }
  func.func @transform_6(%arg0: i32) -> (i32, i32) {
    %c0_i32 = arith.constant 0 : i32
    %c0_i32_0 = arith.constant 0 : i32
    %c0_i32_1 = arith.constant 0 : i32
    return %c0_i32, %c0_i32_0 : i32, i32
  }
  func.func @transform_7(%arg0: i32) -> (i32, i32) {
    %c0_i32 = arith.constant 0 : i32
    %c0_i32_0 = arith.constant 0 : i32
    return %arg0, %c0_i32 : i32, i32
  }
}

</mosaic_0001>

<bundles_post_ra>
// kernel: tile.18
= control target key start
LH: loop header
LB: loop body
LE: loop exit
PB: predicated region body
PF: predicated region fallthrough
CT: control target
= control target key end

     0   :  { %2 = vsyncpa [#allocation1], 0  ;;  %s48_s8 = smov [#allocation0]   ;;  %s65_s0 = inlined_call_operand.hbm [shape: f32[32], index: 0, kind: input, shape index: {}]   ;;  %s66_s1 = inlined_call_operand.vmem [shape: f32[4,32], index: 1, kind: output, shape index: {}]  }
   0x1   :  { %s8_s0 = sshll.u32 %s65_s0, 4  ;;  %s10_s9 = sshll.u32 %s48_s8, 4  ;;  %s9_s0 = int_to_ptr.hbm [resolvable:$true] %s8_s0  ;;  %s11_s9 = int_to_ptr.vmem [resolvable:$true] %s10_s9 }
   0x2   :  { %13 = dma.hbm_to_vmem [thread:$0]  %s9_s0, 16, %s11_s9, [#allocation1]  }
   0x3   :  { %46 = dma.done.wait [#allocation1], 16  }
   0x4   :  { %47 = vsyncadd [#allocation1], 4294967280  ;;  %v18_v0 = vld [vmem:[#allocation0] ss:$0 sm:$0xff] }
   0x5   :  { %19 = vst [vmem:[%s66_s1] sm:$0xf] %v18_v0 }
   0x6   :  { %20 = vsyncpa [#allocation1], 1 }

// kernel: tile.19
= control target key start
LH: loop header
LB: loop body
LE: loop exit
PB: predicated region body
PF: predicated region fallthrough
CT: control target
= control target key end

     0   :  { %s37_s8 = smov 32   ;;  %s38_s9 = smov 64   ;;  %vm7_vm0 = vcmask 261120   ;;  %vm13_vm1 = vcmask 1048320   ;;  %vm19_vm2 = vcmask 785920   ;;  %vm25_vm3 = vcmask 523520   ;;  %s55_s0 = inlined_call_operand.vmem [shape: f32[4,32], index: 0, kind: input, shape index: {}]   ;;  %s56_s1 = inlined_call_operand.vmem [shape: f32[1,128], index: 1, kind: output, shape index: {}]  }
   0x1   :  { %v4_v0 = vld [vmem:[%s55_s0] sm:$0xf]  ;;  %s36_s0 = smov 96  }
   0x2   :  { %5 = vst [vmem:[#allocation1] sm:$0xf] %v4_v0 }
   0x9   :  { %v10_v1 = vld [vmem:[#allocation1 + $0x3] sm:$0x1]   ;;  %v22_v2 = vld [vmem:[#allocation1 + $0x1] sm:$0x1]   ;;  %v16_v3 = vld [vmem:[#allocation1 + $0x2] sm:$0x1]  }
   0xa   :  { %11 = vrot.lane.b32.xlu0 %v10_v1, %s36_s0  ;;  %23 = vrot.lane.b32.xlu1 %v22_v2, %s37_s8  ;;  %v6_v4 = vld [vmem:[#allocation1] sm:$0x1]  }
   0xb   :  { %8 = vst.msk [vmem:[#allocation0] sm:$0x1] %vm7_vm0, %v6_v4  }
  0x12   :  { %17 = vrot.lane.b32.xlu0 %v16_v3, %s38_s9 }
  0x7c   :  { %v12_v5 = vpop.permute.xlu0 %11   ;;  %v24_v6 = vpop.permute.xlu1 %23  }
  0x7d   :  { %14 = vst.msk [vmem:[#allocation0] sm:$0x1] %vm13_vm1, %v12_v5  }
  0x84   :  { %v18_v7 = vpop.permute.xlu0 %17  }
  0x85   :  { %20 = vst.msk [vmem:[#allocation0] sm:$0x1] %vm19_vm2, %v18_v7  }
  0x86   :  { %26 = vst.msk [vmem:[#allocation0] sm:$0x1] %vm25_vm3, %v24_v6  }
  0x8d   :  { %v29_v8 = vld [vmem:[#allocation0] sm:$0x1] }
  0x8e   :  { %32 = vst [vmem:[%s56_s1] sm:$0x1] %v29_v8 }

// kernel: tile.13
= control target key start
LH: loop header
LB: loop body
LE: loop exit
PB: predicated region body
PF: predicated region fallthrough
CT: control target
= control target key end

     0   :  { %2 = vsyncpa [#allocation1], 0  ;;  %s51_s8 = smov [#allocation0]   ;;  %s71_s0 = inlined_call_operand.hbm [shape: f32[16], index: 0, kind: input, shape index: {}]   ;;  %s72_s1 = inlined_call_operand.vmem [shape: f32[12,16], index: 1, kind: output, shape index: {}]  }
   0x1   :  { %s8_s0 = sshll.u32 %s71_s0, 4  ;;  %s10_s9 = sshll.u32 %s51_s8, 4  ;;  %s9_s0 = int_to_ptr.hbm [resolvable:$true] %s8_s0  ;;  %s11_s9 = int_to_ptr.vmem [resolvable:$true] %s10_s9 }
   0x2   :  { %13 = dma.hbm_to_vmem [thread:$0]  %s9_s0, 16, %s11_s9, [#allocation1]  }
   0x3   :  { %49 = dma.done.wait [#allocation1], 16  }
   0x4   :  { %50 = vsyncadd [#allocation1], 4294967280  ;;  %v18_v0 = vld [vmem:[#allocation0] ss:$0 sm:$0xff] }
   0x5   :  { %19 = vst [vmem:[%s72_s1] sm:$0xff] %v18_v0 }
   0x6   :  { %23 = vst [vmem:[%s72_s1 + $0x8] sm:$0xff] %v18_v0 }
   0x7   :  { %22 = vsyncpa [#allocation1], 1 }

// kernel: tile.14
= control target key start
LH: loop header
LB: loop body
LE: loop exit
PB: predicated region body
PF: predicated region fallthrough
CT: control target
= control target key end

     0   :  { %s78_s10 = smov 112   ;;  %s79_s11 = smov 80   ;;  %vm4_vm0 = vcmask 130048   ;;  %vm10_vm1 = vcmask 1048448   ;;  %vm16_vm2 = vcmask 917248   ;;  %vm22_vm3 = vcmask 786048   ;;  %s125_s0 = inlined_call_operand.vmem [shape: f32[12,16], index: 0, kind: input, shape index: {}]   ;;  %s126_s1 = inlined_call_operand.vmem [shape: f32[1,192], index: 1, kind: output, shape index: {}]  }
   0x1   :  { %v63_v0 = vld [vmem:[%s125_s0 + $0x7] sm:$0x1]   ;;  %v65_v1 = vld [vmem:[%s125_s0 + $0x5] sm:$0x1]   ;;  %s31_s12 = smov 3  ;;  %s80_s15 = smov 48  }
   0x2   :  { %8 = vrot.lane.b32.xlu0 %v63_v0, %s78_s10  ;;  %20 = vrot.lane.b32.xlu1 %v65_v1, %s79_s11  ;;  %v67_v2 = vld [vmem:[%s125_s0 + $0x3] ss:$8 sm:%s31_s12]   ;;  %s38_s20 = smov 3  ;;  %s81_s21 = smov 96   ;;  %vm28_vm4 = vcmask 654848   ;;  %vm35_vm5 = vcmask 523648  }
   0x3   :  { %33 = vrot.lane.b32.xlu2 %v67_v2, %s80_s15  ;;  %v64_v3 = vld [vmem:[%s125_s0 + $0x6] sm:$0x1]   ;;  %v66_v4 = vld [vmem:[%s125_s0 + $0x4] sm:$0x1]   ;;  %s82_s22 = smov 64   ;;  %s45_s25 = smov 3 }
   0x4   :  { %v68_v5 = vld [vmem:[%s125_s0 + $0x2] ss:$8 sm:%s38_s20]   ;;  %s83_s26 = smov 32   ;;  %v69_v6 = vld [vmem:[%s125_s0 + $0x1] ss:$8 sm:%s45_s25]   ;;  %s84_s29 = smov 16  }
   0x5   :  { %s2_s30 = smov 3  ;;  %vm42_vm6 = vcmask 392448   ;;  %vm49_vm7 = vcmask 261248  }
   0x6   :  { %v3_v7 = vld [vmem:[%s125_s0] ss:$8 sm:%s2_s30]  }
   0x7   :  { %5 = vst.msk [vmem:[#allocation0] ss:$8 sm:$0x3] %vm4_vm0, %v3_v7  }
   0xa   :  { %14 = vrot.lane.b32.xlu0 %v64_v3, %s81_s21  ;;  %26 = vrot.lane.b32.xlu1 %v66_v4, %s82_s22 }
   0xb   :  { %40 = vrot.lane.b32.xlu2 %v68_v5, %s83_s26 }
  0x12   :  { %47 = vrot.lane.b32.xlu0 %v69_v6, %s84_s29 }
  0x5d   :  { %v34_v8 = vpop.permute.xlu2 %33  }
  0x65   :  { %v41_v9 = vpop.permute.xlu2 %40  }
  0x74   :  { %v9_v10 = vpop.permute.xlu0 %8   ;;  %v21_v11 = vpop.permute.xlu1 %20  }
  0x75   :  { %11 = vst.msk [vmem:[#allocation0] sm:$0x1] %vm10_vm1, %v9_v10  }
  0x7c   :  { %v15_v12 = vpop.permute.xlu0 %14   ;;  %v27_v13 = vpop.permute.xlu1 %26  }
  0x7d   :  { %17 = vst.msk [vmem:[#allocation0] sm:$0x1] %vm16_vm2, %v15_v12  }
  0x7e   :  { %23 = vst.msk [vmem:[#allocation0] sm:$0x1] %vm22_vm3, %v21_v11  }
  0x7f   :  { %29 = vst.msk [vmem:[#allocation0] sm:$0x1] %vm28_vm4, %v27_v13  }
  0x80   :  { %36 = vst.msk [vmem:[#allocation0] ss:$8 sm:$0x3] %vm35_vm5, %v34_v8  }
  0x81   :  { %43 = vst.msk [vmem:[#allocation0] ss:$8 sm:$0x3] %vm42_vm6, %v41_v9  }
  0x84   :  { %v48_v14 = vpop.permute.xlu0 %47  }
  0x85   :  { %50 = vst.msk [vmem:[#allocation0] ss:$8 sm:$0x3] %vm49_vm7, %v48_v14  }
  0x8c   :  { %v53_v15 = vld [vmem:[#allocation0] sm:$0x1]  ;;  %v58_v16 = vld [vmem:[#allocation0 + $0x8] sm:$0x1] }
  0x8d   :  { %56 = vst [vmem:[%s126_s1] sm:$0x1] %v53_v15 }
  0x8e   :  { %70 = vst [vmem:[%s126_s1 + $0x1] sm:$0x1] %v58_v16 }

// kernel: cnn_forward.1
= control target key start
LH: loop header
LB: loop body
LE: loop exit
PB: predicated region body
PF: predicated region fallthrough
CT: control target
= control target key end

     0   :  { %vm302_vm0 = vcmask 1045504   ;;  %vm265_vm1 = vcmask 97280   ;;  %vm991_vm2 = vcmask 523264   ;;  %s6324_s1 = inlined_call_operand.vmem [shape: bf16[2,140,192], index: 1, kind: input, shape index: {}]   ;;  %s6325_s0 = inlined_call_operand.vmem [shape: bf16[1,192,140], index: 0, kind: input, shape index: {}]   ;;  %s6326_s3 = inlined_call_operand.vmem [shape: bf16[10,192,128], index: 3, kind: input, shape index: {}]   ;;  %s6327_s2 = inlined_call_operand.vmem [shape: f32[1,192], index: 2, kind: input, shape index: {}]   ;;  %s6328_s4 = inlined_call_operand.vmem [shape: f32[1,128], index: 4, kind: input, shape index: {}]   ;;  %s6329_s6 = inlined_call_operand.vmem [shape: f32[1,128], index: 6, kind: input, shape index: {}]   ;;  %s6330_s5 = inlined_call_operand.vmem [shape: bf16[512,128], index: 5, kind: input, shape index: {}]   ;;  %s6331_s7 = inlined_call_operand.vmem [shape: f32[8,128], index: 7, kind: output, shape index: {}]  }
   0x1   :  { %v3387_v0 = vld [vmem:[%s6324_s1 + $0x70] sm:$0xf]  ;;  %v4442_v1 = vld [vmem:[%s6324_s1 + $0x74] sm:$0xf0]  ;;  %v4441_v2 = vld [vmem:[%s6324_s1 + $0x74] sm:$0xf] }
   0x2   :  { %v3388_v3 = vor.u32 %v4442_v1, %v3387_v0  ;;  %v3389_v4 = vld [vmem:[%s6324_s1 + $0x78] sm:$0xf0]  ;;  %v3395_v5 = vld [vmem:[%s6324_s1 + $0x80] sm:$0xf]  ;;  %v4444_v6 = vld [vmem:[%s6324_s1 + $0x84] sm:$0x30] }
   0x3   :  { %v3392_v7 = vor.u32 %v4441_v2, %v3389_v4  ;;  %v3396_v8 = vor.u32 %v4444_v6, %v3395_v5  ;;  %v4443_v9 = vld [vmem:[%s6324_s1 + $0x84] sm:$0xf]  ;;  %v3397_v10 = vld [vmem:[%s6324_s1 + $0x88] sm:$0x30]  ;;  %v3379_v11 = vld [vmem:[%s6324_s1 + $0x60] sm:$0xf] }
   0x4   :  { %309 = vmatpush.bf16.msra.mxu0 %v3388_v3  ;;  %v3400_v12 = vor.u32 %v4443_v9, %v3397_v10  ;;  %v4440_v13 = vld [vmem:[%s6324_s1 + $0x64] sm:$0xf0]  ;;  %v4403_v14 = vld [vmem:[%s6325_s0 + $0x4] sm:$0xf]  ;;  %v3237_v15 = vld [vmem:[%s6325_s0 + $0x8] sm:$0xf0] }
   0x5   :  { %447 = vmatpush.bf16.msra.mxu2 %v3392_v7  ;;  %v304_v16 = vsel %vm302_vm0, %v3396_v8, 0  ;;  %v3380_v17 = vor.u32 %v4440_v13, %v3379_v11  ;;  %v4694_v18 = vor.u32 %v4403_v14, %v3237_v15  ;;  %v4439_v19 = vld [vmem:[%s6324_s1 + $0x64] sm:$0xf]  ;;  %v3381_v20 = vld [vmem:[%s6324_s1 + $0x68] sm:$0xf0] }
   0x6   :  { %385 = vmatpush.bf16.msra.mxu1 %v304_v16  ;;  %v307_v21 = vsel %vm302_vm0, %v3400_v12, 0  ;;  %v3384_v22 = vor.u32 %v4439_v19, %v3381_v20  ;;  %v3371_v23 = vld [vmem:[%s6324_s1 + $0x50] sm:$0xf]  ;;  %v4438_v24 = vld [vmem:[%s6324_s1 + $0x54] sm:$0xf0] }
   0x7   :  { %523 = vmatpush.bf16.msra.mxu3 %v307_v21  ;;  %v4437_v25 = vld [vmem:[%s6324_s1 + $0x54] sm:$0xf]  ;;  %v3373_v26 = vld [vmem:[%s6324_s1 + $0x58] sm:$0xf0]  ;;  %v3372_v27 = vor.u32 %v4438_v24, %v3371_v23  ;;  %v3363_v29 = vld [vmem:[%s6324_s1 + $0x40] sm:$0xf] }
   0x8   :  { %310 = vmatpush.bf16.msra.mxu0 %v3380_v17  ;;  %v3376_v28 = vor.u32 %v4437_v25, %v3373_v26  ;;  %v4436_v30 = vld [vmem:[%s6324_s1 + $0x44] sm:$0xf0]  ;;  %v4435_v31 = vld [vmem:[%s6324_s1 + $0x44] sm:$0xf]  ;;  %v3365_v32 = vld [vmem:[%s6324_s1 + $0x48] sm:$0xf0] }
   0x9   :  { %3401 = vmatmul.msk.bf16.vlgmr.msra.gmra.mxu1 %vm265_vm1, %v4694_v18  ;;  %448 = vmatpush.bf16.msra.mxu2 %v3384_v22  ;;  %v3364_v33 = vor.u32 %v4436_v30, %v3363_v29  ;;  %v3368_v34 = vor.u32 %v4435_v31, %v3365_v32  ;;  %v3355_v35 = vld [vmem:[%s6324_s1 + $0x30] sm:$0xf]  ;;  %v4434_v36 = vld [vmem:[%s6324_s1 + $0x34] sm:$0xf0]  ;;  %v4433_v37 = vld [vmem:[%s6324_s1 + $0x34] sm:$0xf] }
   0xa   :  { %3413 = vmatmul.msk.bf16.vlgmr.msra.gmra.mxu3 %vm265_vm1, %v4694_v18  ;;  %v3357_v38 = vld [vmem:[%s6324_s1 + $0x38] sm:$0xf0]  ;;  %v3347_v39 = vld [vmem:[%s6324_s1 + $0x20] sm:$0xf]  ;;  %v3356_v40 = vor.u32 %v4434_v36, %v3355_v35  ;;  %v4432_v41 = vld [vmem:[%s6324_s1 + $0x24] sm:$0xf0] }
   0xb   :  { %v4405_v42 = vld [vmem:[%s6325_s0 + $0x14] sm:$0xf]  ;;  %v3245_v43 = vld [vmem:[%s6325_s0 + $0x18] sm:$0xf0]  ;;  %v3360_v44 = vor.u32 %v4433_v37, %v3357_v38  ;;  %v4431_v45 = vld [vmem:[%s6324_s1 + $0x24] sm:$0xf]  ;;  %v3348_v53 = vor.u32 %v4432_v41, %v3347_v39 }
   0xc   :  { %311 = vmatpush.bf16.msra.mxu0 %v3372_v27  ;;  %v3509_v46 = vld [vmem:[%s6324_s1 + $0x110] sm:$0xf]  ;;  %v4462_v47 = vld [vmem:[%s6324_s1 + $0x114] sm:$0x30]  ;;  %v3349_v48 = vld [vmem:[%s6324_s1 + $0x28] sm:$0xf0]  ;;  %v4774_v55 = vor.u32 %v4405_v42, %v3245_v43 }
   0xd   :  { %449 = vmatpush.bf16.msra.mxu2 %v3376_v28  ;;  %v3510_v49 = vor.u32 %v4462_v47, %v3509_v46  ;;  %v3501_v50 = vld [vmem:[%s6324_s1 + $0x100] sm:$0xf]  ;;  %v4460_v51 = vld [vmem:[%s6324_s1 + $0x104] sm:$0xf0]  ;;  %v3352_v56 = vor.u32 %v4431_v45, %v3349_v48  ;;  %v3339_v57 = vld [vmem:[%s6324_s1 + $0x10] sm:$0xf] }
   0xe   :  { %v3502_v52 = vor.u32 %v4460_v51, %v3501_v50  ;;  %v4430_v58 = vld [vmem:[%s6324_s1 + $0x14] sm:$0xf0]  ;;  %v4429_v59 = vld [vmem:[%s6324_s1 + $0x14] sm:$0xf]  ;;  %v3341_v60 = vld [vmem:[%s6324_s1 + $0x18] sm:$0xf0] }
   0xf   :  { %v693_v54 = vsel %vm302_vm0, %v3510_v49, 0  ;;  %v3340_v61 = vor.u32 %v4430_v58, %v3339_v57  ;;  %v4461_v62 = vld [vmem:[%s6324_s1 + $0x114] sm:$0xf]  ;;  %v3511_v63 = vld [vmem:[%s6324_s1 + $0x118] sm:$0x30]  ;;  %v3344_v0 = vor.u32 %v4429_v59, %v3341_v60 }
  0x10   :  { %312 = vmatpush.bf16.msra.mxu0 %v3364_v33  ;;  %774 = vmatpush.bf16.msrb.mxu3 %v693_v54  ;;  %v3331_v1 = vld [vmem:[%s6324_s1] sm:$0xf]  ;;  %v4428_v2 = vld [vmem:[%s6324_s1 + $0x4] sm:$0xf0]  ;;  %v4427_v3 = vld [vmem:[%s6324_s1 + $0x4] sm:$0xf]  ;;  %v3514_v7 = vor.u32 %v4461_v62, %v3511_v63 }
  0x11   :  { %450 = vmatpush.bf16.msra.mxu2 %v3368_v34  ;;  %698 = vmatpush.bf16.msrb.mxu1 %v3502_v52  ;;  %v3333_v4 = vld [vmem:[%s6324_s1 + $0x8] sm:$0xf0]  ;;  %v4459_v5 = vld [vmem:[%s6324_s1 + $0x104] sm:$0xf]  ;;  %v3332_v8 = vor.u32 %v4428_v2, %v3331_v1  ;;  %v3235_v9 = vld [vmem:[%s6325_s0] sm:$0xf] }
  0x12   :  { %v3503_v6 = vld [vmem:[%s6324_s1 + $0x108] sm:$0xf0]  ;;  %v4404_v10 = vld [vmem:[%s6325_s0 + $0x4] sm:$0xf0]  ;;  %v3336_v11 = vor.u32 %v4427_v3, %v3333_v4  ;;  %v4457_v13 = vld [vmem:[%s6324_s1 + $0xf4] sm:$0xf] }
  0x13   :  { %v3506_v12 = vor.u32 %v4459_v5, %v3503_v6  ;;  %v3495_v14 = vld [vmem:[%s6324_s1 + $0xf8] sm:$0xf0]  ;;  %v4828_v15 = vor.u32 %v4404_v10, %v3235_v9  ;;  %v696_v16 = vsel %vm302_vm0, %v3514_v7, 0  ;;  %v4407_v19 = vld [vmem:[%s6325_s0 + $0x24] sm:$0xf] }
  0x14   :  { %313 = vmatpush.bf16.msra.mxu0 %v3356_v40  ;;  %v3498_v17 = vor.u32 %v4457_v13, %v3495_v14  ;;  %v3253_v20 = vld [vmem:[%s6325_s0 + $0x28] sm:$0xf0]  ;;  %v3493_v21 = vld [vmem:[%s6324_s1 + $0xf0] sm:$0xf]  ;;  %v4458_v22 = vld [vmem:[%s6324_s1 + $0xf4] sm:$0xf0] }
  0x15   :  { %451 = vmatpush.bf16.msra.mxu2 %v3360_v44  ;;  %v4845_v23 = vor.u32 %v4407_v19, %v3253_v20  ;;  %v3494_v24 = vor.u32 %v4458_v22, %v3493_v21  ;;  %v3243_v25 = vld [vmem:[%s6325_s0 + $0x10] sm:$0xf]  ;;  %v4406_v26 = vld [vmem:[%s6325_s0 + $0x14] sm:$0xf0]  ;;  %v4409_v28 = vld [vmem:[%s6325_s0 + $0x34] sm:$0xf] }
  0x16   :  { %v4857_v27 = vor.u32 %v4406_v26, %v3243_v25  ;;  %v3261_v29 = vld [vmem:[%s6325_s0 + $0x38] sm:$0xf0]  ;;  %v4455_v31 = vld [vmem:[%s6324_s1 + $0xe4] sm:$0xf]  ;;  %v3487_v32 = vld [vmem:[%s6324_s1 + $0xe8] sm:$0xf0] }
  0x17   :  { %699 = vmatpush.bf16.msrb.mxu1 %v3494_v24  ;;  %v4867_v30 = vor.u32 %v4409_v28, %v3261_v29  ;;  %v3485_v33 = vld [vmem:[%s6324_s1 + $0xe0] sm:$0xf]  ;;  %v3490_v34 = vor.u32 %v4455_v31, %v3487_v32  ;;  %v4456_v35 = vld [vmem:[%s6324_s1 + $0xe4] sm:$0xf0]  ;;  %v4411_v40 = vld [vmem:[%s6325_s0 + $0x44] sm:$0xf] }
  0x18   :  { %314 = vmatpush.bf16.msra.mxu0 %v3348_v53  ;;  %v3251_v36 = vld [vmem:[%s6325_s0 + $0x20] sm:$0xf]  ;;  %v4408_v37 = vld [vmem:[%s6325_s0 + $0x24] sm:$0xf0]  ;;  %v3486_v38 = vor.u32 %v4456_v35, %v3485_v33  ;;  %v3269_v41 = vld [vmem:[%s6325_s0 + $0x48] sm:$0xf0] }
  0x19   :  { %3402 = vmatmul.msk.bf16.gmra.mxu1 %vm265_vm1, %v4774_v55  ;;  %452 = vmatpush.bf16.msra.mxu2 %v3352_v56  ;;  %v4891_v39 = vor.u32 %v4408_v37, %v3251_v36  ;;  %v4901_v42 = vor.u32 %v4411_v40, %v3269_v41  ;;  %v4453_v43 = vld [vmem:[%s6324_s1 + $0xd4] sm:$0xf]  ;;  %v3479_v44 = vld [vmem:[%s6324_s1 + $0xd8] sm:$0xf0]  ;;  %v3259_v46 = vld [vmem:[%s6325_s0 + $0x30] sm:$0xf] }
  0x1a   :  { %3414 = vmatmul.msk.bf16.gmra.mxu3 %vm265_vm1, %v4774_v55  ;;  %v3482_v45 = vor.u32 %v4453_v43, %v3479_v44  ;;  %v4410_v47 = vld [vmem:[%s6325_s0 + $0x34] sm:$0xf0]  ;;  %v4413_v49 = vld [vmem:[%s6325_s0 + $0x54] sm:$0xf]  ;;  %v3277_v50 = vld [vmem:[%s6325_s0 + $0x58] sm:$0xf0] }
  0x1b   :  { %700 = vmatpush.bf16.msrb.mxu1 %v3486_v38  ;;  %v4919_v48 = vor.u32 %v4410_v47, %v3259_v46  ;;  %v3477_v51 = vld [vmem:[%s6324_s1 + $0xd0] sm:$0xf]  ;;  %v4454_v52 = vld [vmem:[%s6324_s1 + $0xd4] sm:$0xf0]  ;;  %v4935_v53 = vor.u32 %v4413_v49, %v3277_v50  ;;  %v3267_v56 = vld [vmem:[%s6325_s0 + $0x40] sm:$0xf] }
  0x1c   :  { %315 = vmatpush.bf16.msra.mxu0 %v3340_v61  ;;  %v3478_v54 = vor.u32 %v4454_v52, %v3477_v51  ;;  %v4412_v57 = vld [vmem:[%s6325_s0 + $0x44] sm:$0xf0]  ;;  %v4415_v59 = vld [vmem:[%s6325_s0 + $0x64] sm:$0xf]  ;;  %v3285_v60 = vld [vmem:[%s6325_s0 + $0x68] sm:$0xf0] }
  0x1d   :  { %453 = vmatpush.bf16.msra.mxu2 %v3344_v0  ;;  %v4947_v58 = vor.u32 %v4412_v57, %v3267_v56  ;;  %v4957_v61 = vor.u32 %v4415_v59, %v3285_v60  ;;  %v4451_v62 = vld [vmem:[%s6324_s1 + $0xc4] sm:$0xf]  ;;  %v3471_v63 = vld [vmem:[%s6324_s1 + $0xc8] sm:$0xf0]  ;;  %v3275_v1 = vld [vmem:[%s6325_s0 + $0x50] sm:$0xf] }
  0x1e   :  { %v3474_v0 = vor.u32 %v4451_v62, %v3471_v63  ;;  %v4414_v2 = vld [vmem:[%s6325_s0 + $0x54] sm:$0xf0]  ;;  %v3469_v3 = vld [vmem:[%s6324_s1 + $0xc0] sm:$0xf]  ;;  %v4452_v4 = vld [vmem:[%s6324_s1 + $0xc4] sm:$0xf0] }
  0x1f   :  { %701 = vmatpush.bf16.msrb.mxu1 %v3478_v54  ;;  %v4981_v5 = vor.u32 %v4414_v2, %v3275_v1  ;;  %v3470_v6 = vor.u32 %v4452_v4, %v3469_v3  ;;  %v4417_v7 = vld [vmem:[%s6325_s0 + $0x74] sm:$0xf]  ;;  %v3283_v10 = vld [vmem:[%s6325_s0 + $0x60] sm:$0xf]  ;;  %v3463_v14 = vld [vmem:[%s6324_s1 + $0xb8] sm:$0xf0] }
  0x20   :  { %316 = vmatpush.bf16.msra.mxu0 %v3332_v8  ;;  %v3293_v8 = vld [vmem:[%s6325_s0 + $0x78] sm:$0xf0]  ;;  %v4449_v13 = vld [vmem:[%s6324_s1 + $0xb4] sm:$0xf]  ;;  %v3461_v22 = vld [vmem:[%s6324_s1 + $0xb0] sm:$0xf] }
  0x21   :  { %454 = vmatpush.bf16.msra.mxu2 %v3336_v11  ;;  %v4991_v9 = vor.u32 %v4417_v7, %v3293_v8  ;;  %v4416_v11 = vld [vmem:[%s6325_s0 + $0x64] sm:$0xf0]  ;;  %v3466_v19 = vor.u32 %v4449_v13, %v3463_v14  ;;  %v4450_v24 = vld [vmem:[%s6324_s1 + $0xb4] sm:$0xf0]  ;;  %v3291_v26 = vld [vmem:[%s6325_s0 + $0x70] sm:$0xf] }
  0x22   :  { %v3462_v25 = vor.u32 %v4450_v24, %v3461_v22  ;;  %v4418_v28 = vld [vmem:[%s6325_s0 + $0x74] sm:$0xf0]  ;;  %v4421_v33 = vld [vmem:[%s6325_s0 + $0x94] sm:$0xf]  ;;  %v4447_v38 = vld [vmem:[%s6324_s1 + $0xa4] sm:$0xf] }
  0x23   :  { %317 = vmatmul.bf16.vlgmr.msra.gmra.mxu0 %v4828_v15  ;;  %702 = vmatpush.bf16.msrb.mxu1 %v3470_v6  ;;  %v5037_v32 = vor.u32 %v4418_v28, %v3291_v26  ;;  %v3455_v40 = vld [vmem:[%s6324_s1 + $0xa8] sm:$0xf0]  ;;  %v3299_v41 = vld [vmem:[%s6325_s0 + $0x80] sm:$0xf]  ;;  %v4420_v43 = vld [vmem:[%s6325_s0 + $0x84] sm:$0xf0] }
  0x24   :  { %836 = vmatpush.bf16.msrb.mxu0 %v3506_v12  ;;  %455 = vmatmul.bf16.vlgmr.msra.gmra.mxu2 %v4828_v15  ;;  %v5003_v12 = vor.u32 %v4416_v11, %v3283_v10  ;;  %v3458_v44 = vor.u32 %v4447_v38, %v3455_v40  ;;  %v5065_v47 = vor.u32 %v4420_v43, %v3299_v41  ;;  %v3453_v50 = vld [vmem:[%s6324_s1 + $0xa0] sm:$0xf]  ;;  %v4448_v51 = vld [vmem:[%s6324_s1 + $0xa4] sm:$0xf0]  ;;  %v4423_v56 = vld [vmem:[%s6325_s0 + $0xa4] sm:$0xf] }
  0x25   :  { %912 = vmatpush.bf16.msrb.mxu2 %v696_v16  ;;  %v4419_v16 = vld [vmem:[%s6325_s0 + $0x84] sm:$0xf]  ;;  %v3454_v54 = vor.u32 %v4448_v51, %v3453_v50  ;;  %v3317_v57 = vld [vmem:[%s6325_s0 + $0xa8] sm:$0xf0]  ;;  %v3445_v59 = vld [vmem:[%s6324_s1 + $0x90] sm:$0xf] }
  0x26   :  { %v4446_v60 = vld [vmem:[%s6324_s1 + $0x94] sm:$0xf0]  ;;  %v5089_v63 = vor.u32 %v4423_v56, %v3317_v57  ;;  %v3307_v8 = vld [vmem:[%s6325_s0 + $0x90] sm:$0xf]  ;;  %v4425_v22 = vld [vmem:[%s6325_s0 + $0xb4] sm:$0xf] }
  0x27   :  { %703 = vmatpush.bf16.msrb.mxu1 %v3462_v25  ;;  %v4422_v10 = vld [vmem:[%s6325_s0 + $0x94] sm:$0xf0]  ;;  %v3325_v25 = vld [vmem:[%s6325_s0 + $0xb8] sm:$0xf0]  ;;  %v4445_v26 = vld [vmem:[%s6324_s1 + $0x94] sm:$0xf] }
  0x28   :  { %837 = vmatpush.bf16.msrb.mxu0 %v3498_v17  ;;  %v3301_v17 = vld [vmem:[%s6325_s0 + $0x88] sm:$0xf0]  ;;  %v3447_v28 = vld [vmem:[%s6324_s1 + $0x98] sm:$0xf0]  ;;  %v3315_v43 = vld [vmem:[%s6325_s0 + $0xa0] sm:$0xf] }
  0x29   :  { %3403 = vmatmul.msk.bf16.gmra.mxu1 %vm265_vm1, %v4845_v23  ;;  %v5019_v20 = vor.u32 %v4419_v16, %v3301_v17  ;;  %v5107_v16 = vor.u32 %v4422_v10, %v3307_v8  ;;  %v4426_v10 = vld [vmem:[%s6325_s0 + $0xb4] sm:$0xf0] }
  0x2a   :  { %3415 = vmatmul.msk.bf16.gmra.mxu3 %vm265_vm1, %v4845_v23 }
  0x2b   :  { %704 = vmatpush.bf16.msrb.mxu1 %v3454_v54 }
  0x2c   :  { %838 = vmatpush.bf16.msrb.mxu0 %v3490_v34  ;;  %v3309_v34 = vld [vmem:[%s6325_s0 + $0x98] sm:$0xf0] }
  0x2d   :  { %v5047_v36 = vor.u32 %v4421_v33, %v3309_v34  ;;  %v5129_v33 = vor.u32 %v4425_v22, %v3325_v25 }
  0x30   :  { %839 = vmatpush.bf16.msrb.mxu0 %v3482_v45 }
  0x33   :  { %322 = vmatmul.bf16.gmra.mxu0 %v4857_v27 }
  0x34   :  { %460 = vmatmul.bf16.gmra.mxu2 %v4857_v27  ;;  %840 = vmatpush.bf16.msrb.mxu0 %v3474_v0  ;;  %v3446_v0 = vor.u32 %v4446_v60, %v3445_v59 }
  0x36   :  { %705 = vmatpush.bf16.msrb.mxu1 %v3446_v0 }
  0x38   :  { %841 = vmatpush.bf16.msrb.mxu0 %v3466_v19 }
  0x39   :  { %3404 = vmatmul.msk.bf16.gmra.mxu1 %vm265_vm1, %v4867_v30 }
  0x3a   :  { %3416 = vmatmul.msk.bf16.gmra.mxu3 %vm265_vm1, %v4867_v30 }
  0x3c   :  { %842 = vmatpush.bf16.msrb.mxu0 %v3458_v44  ;;  %v4424_v44 = vld [vmem:[%s6325_s0 + $0xa4] sm:$0xf0] }
  0x3d   :  { %v5147_v50 = vor.u32 %v4424_v44, %v3315_v43 }
  0x43   :  { %327 = vmatmul.bf16.gmra.mxu0 %v4891_v39 }
  0x44   :  { %465 = vmatmul.bf16.gmra.mxu2 %v4891_v39 }
  0x49   :  { %3405 = vmatmul.msk.bf16.gmra.mxu1 %vm265_vm1, %v4901_v42 }
  0x4a   :  { %3417 = vmatmul.msk.bf16.gmra.mxu3 %vm265_vm1, %v4901_v42 }
  0x53   :  { %332 = vmatmul.bf16.gmra.mxu0 %v4919_v48 }
  0x54   :  { %470 = vmatmul.bf16.gmra.mxu2 %v4919_v48 }
  0x59   :  { %3406 = vmatmul.msk.bf16.gmra.mxu1 %vm265_vm1, %v4935_v53 }
  0x5a   :  { %3418 = vmatmul.msk.bf16.gmra.mxu3 %vm265_vm1, %v4935_v53 }
  0x63   :  { %337 = vmatmul.bf16.gmra.mxu0 %v4947_v58 }
  0x64   :  { %475 = vmatmul.bf16.gmra.mxu2 %v4947_v58 }
  0x69   :  { %3407 = vmatmul.msk.bf16.gmra.mxu1 %vm265_vm1, %v4957_v61 }
  0x6a   :  { %3419 = vmatmul.msk.bf16.gmra.mxu3 %vm265_vm1, %v4957_v61 }
  0x73   :  { %342 = vmatmul.bf16.gmra.mxu0 %v4981_v5 }
  0x74   :  { %480 = vmatmul.bf16.gmra.mxu2 %v4981_v5 }
  0x79   :  { %3408 = vmatmul.msk.bf16.gmra.mxu1 %vm265_vm1, %v4991_v9 }
  0x7a   :  { %3420 = vmatmul.msk.bf16.gmra.mxu3 %vm265_vm1, %v4991_v9 }
  0x83   :  { %347 = vmatmul.bf16.gmra.mxu0 %v5003_v12 }
  0x84   :  { %485 = vmatmul.bf16.gmra.mxu2 %v5003_v12 }
  0x86   :  { %v387_v21 = vpop.f32.mrf.mxu1 }
  0x89   :  { %3409 = vmatmul.msk.bf16.gmra.mxu1 %vm265_vm1, %v5019_v20 }
  0x8a   :  { %3421 = vmatmul.msk.bf16.gmra.mxu3 %vm265_vm1, %v5019_v20 }
  0x8d   :  { %v525_v29 = vpop.f32.mrf.mxu3 }
  0x8e   :  { %v389_v31 = vpop.f32.mrf.mxu1 }
  0x93   :  { %352 = vmatmul.bf16.gmra.mxu0 %v5037_v32 }
  0x94   :  { %490 = vmatmul.bf16.gmra.mxu2 %v5037_v32 }
  0x95   :  { %v527_v35 = vpop.f32.mrf.mxu3 }
  0x96   :  { %v392_v37 = vpop.f32.mrf.mxu1 }
  0x99   :  { %3410 = vmatmul.msk.bf16.gmra.mxu1 %vm265_vm1, %v5047_v36 }
  0x9a   :  { %3422 = vmatmul.msk.bf16.gmra.mxu3 %vm265_vm1, %v5047_v36 }
  0x9d   :  { %v530_v45 = vpop.f32.mrf.mxu3 }
  0x9e   :  { %v394_v46 = vpop.f32.mrf.mxu1 }
  0xa0   :  { %v318_v49 = vpop.f32.mrf.mxu0 }
  0xa1   :  { %v5073_v52 = vadd.f32 %v387_v21, %v318_v49 }
  0xa3   :  { %357 = vmatmul.bf16.gmra.mxu0 %v5065_v47 }
  0xa4   :  { %495 = vmatmul.bf16.gmra.mxu2 %v5065_v47 }
  0xa5   :  { %v532_v62 = vpop.f32.mrf.mxu3 }
  0xa6   :  { %v397_v1 = vpop.f32.mrf.mxu1 }
  0xa7   :  { %v456_v2 = vpop.f32.mrf.mxu2 }
  0xa8   :  { %v5091_v3 = vadd.f32 %v525_v29, %v456_v2  ;;  %v320_v4 = vpop.f32.mrf.mxu0  ;;  %v3450_v29 = vor.u32 %v4445_v26, %v3447_v28 }
  0xa9   :  { %v5093_v6 = vadd.f32 %v389_v31, %v320_v4  ;;  %3411 = vmatmul.msk.bf16.gmra.mxu1 %vm265_vm1, %v5089_v63 }
  0xaa   :  { %3423 = vmatmul.msk.bf16.gmra.mxu3 %vm265_vm1, %v5089_v63  ;;  %843 = vmatpush.bf16.msrb.mxu0 %v3450_v29 }
  0xad   :  { %v535_v11 = vpop.f32.mrf.mxu3 }
  0xae   :  { %v399_v13 = vpop.f32.mrf.mxu1 }
  0xaf   :  { %v458_v14 = vpop.f32.mrf.mxu2 }
  0xb0   :  { %v5109_v17 = vadd.f32 %v527_v35, %v458_v14  ;;  %v323_v19 = vpop.f32.mrf.mxu0 }
  0xb1   :  { %v5111_v21 = vadd.f32 %v392_v37, %v323_v19 }
  0xb3   :  { %362 = vmatmul.bf16.gmra.mxu0 %v5107_v16 }
  0xb4   :  { %500 = vmatmul.bf16.gmra.mxu2 %v5107_v16 }
  0xb5   :  { %v537_v31 = vpop.f32.mrf.mxu3 }
  0xb6   :  { %v402_v34 = vpop.f32.mrf.mxu1 }
  0xb7   :  { %v461_v35 = vpop.f32.mrf.mxu2 }
  0xb8   :  { %v5131_v37 = vadd.f32 %v530_v45, %v461_v35  ;;  %v325_v38 = vpop.f32.mrf.mxu0 }
  0xb9   :  { %v5133_v40 = vadd.f32 %v394_v46, %v325_v38  ;;  %3412 = vmatmul.msk.bf16.gmra.mxu1 %vm265_vm1, %v5129_v33 }
  0xba   :  { %3424 = vmatmul.msk.bf16.gmra.mxu3 %vm265_vm1, %v5129_v33 }
  0xbd   :  { %v540_v45 = vpop.f32.mrf.mxu3 }
  0xbe   :  { %v404_v46 = vpop.f32.mrf.mxu1 }
  0xbf   :  { %v463_v49 = vpop.f32.mrf.mxu2 }
  0xc0   :  { %v5149_v51 = vadd.f32 %v532_v62, %v463_v49  ;;  %v328_v54 = vpop.f32.mrf.mxu0 }
  0xc1   :  { %v5151_v56 = vadd.f32 %v397_v1, %v328_v54  ;;  %v3323_v1 = vld [vmem:[%s6325_s0 + $0xb0] sm:$0xf] }
  0xc2   :  { %v5172_v19 = vor.u32 %v4426_v10, %v3323_v1 }
  0xc3   :  { %367 = vmatmul.bf16.gmra.mxu0 %v5147_v50 }
  0xc4   :  { %505 = vmatmul.bf16.gmra.mxu2 %v5147_v50 }
  0xc5   :  { %v542_v59 = vpop.f32.mrf.mxu3 }
  0xc6   :  { %v407_v60 = vpop.f32.mrf.mxu1 }
  0xc7   :  { %v466_v0 = vpop.f32.mrf.mxu2 }
  0xc8   :  { %v5157_v2 = vadd.f32 %v535_v11, %v466_v0  ;;  %v330_v4 = vpop.f32.mrf.mxu0 }
  0xc9   :  { %v5159_v8 = vadd.f32 %v399_v13, %v330_v4  ;;  %706 = vmatmul.bf16.vlgmr.msrb.gmra.mxu1 %v4828_v15 }
  0xca   :  { %3515 = vmatmul.msk.bf16.vlgmr.msrb.gmra.mxu3 %vm265_vm1, %v4694_v18 }
  0xcd   :  { %v545_v11 = vpop.f32.mrf.mxu3 }
  0xce   :  { %v409_v14 = vpop.f32.mrf.mxu1 }
  0xcf   :  { %v468_v13 = vpop.f32.mrf.mxu2 }
  0xd0   :  { %v5174_v22 = vadd.f32 %v537_v31, %v468_v13  ;;  %v333_v25 = vpop.f32.mrf.mxu0 }
  0xd1   :  { %v5176_v26 = vadd.f32 %v402_v34, %v333_v25 }
  0xd3   :  { %372 = vmatmul.bf16.gmra.mxu0 %v5172_v19 }
  0xd4   :  { %510 = vmatmul.bf16.gmra.mxu2 %v5172_v19 }
  0xd5   :  { %v547_v29 = vpop.f32.mrf.mxu3 }
  0xd6   :  { %v412_v35 = vpop.f32.mrf.mxu1 }
  0xd7   :  { %v471_v38 = vpop.f32.mrf.mxu2 }
  0xd8   :  { %v5182_v43 = vadd.f32 %v540_v45, %v471_v38  ;;  %v335_v44 = vpop.f32.mrf.mxu0 }
  0xd9   :  { %v5184_v49 = vadd.f32 %v404_v46, %v335_v44  ;;  %711 = vmatmul.bf16.gmra.mxu1 %v4857_v27 }
  0xda   :  { %3516 = vmatmul.msk.bf16.gmra.mxu3 %vm265_vm1, %v4774_v55 }
  0xdd   :  { %v550_v34 = vpop.f32.mrf.mxu3 }
  0xde   :  { %v414_v54 = vpop.f32.mrf.mxu1 }
  0xdf   :  { %v473_v0 = vpop.f32.mrf.mxu2 }
  0xe0   :  { %v5191_v4 = vadd.f32 %v542_v59, %v473_v0  ;;  %v338_v1 = vpop.f32.mrf.mxu0 }
  0xe1   :  { %v5193_v10 = vadd.f32 %v407_v60, %v338_v1 }
  0xe3   :  { %844 = vmatmul.bf16.vlgmr.msrb.gmra.mxu0 %v4828_v15 }
  0xe4   :  { %3527 = vmatmul.msk.bf16.vlgmr.msrb.gmra.mxu2 %vm265_vm1, %v4694_v18 }
  0xe5   :  { %v552_v46 = vpop.f32.mrf.mxu3 }
  0xe6   :  { %v417_v13 = vpop.f32.mrf.mxu1 }
  0xe7   :  { %v476_v25 = vpop.f32.mrf.mxu2 }
  0xe8   :  { %v5200_v38 = vadd.f32 %v545_v11, %v476_v25  ;;  %v340_v44 = vpop.f32.mrf.mxu0  ;;  %v4498_v25 = vld [vmem:[%s6326_s3 + $0x118] sm:$0xff] }
  0xe9   :  { %v5202_v28 = vadd.f32 %v409_v14, %v340_v44  ;;  %716 = vmatmul.bf16.gmra.mxu1 %v4891_v39  ;;  %1350 = vmatpush.bf16.msra.mxu3 %v4498_v25  ;;  %v4494_v11 = vld [vmem:[%s6326_s3 + $0xf8] sm:$0xff] }
  0xea   :  { %3517 = vmatmul.msk.bf16.gmra.mxu3 %vm265_vm1, %v4845_v23  ;;  %1317 = vmatpush.bf16.msra.mxu1 %v4494_v11 }
  0xed   :  { %v555_v15 = vpop.f32.mrf.mxu3 }
  0xee   :  { %v419_v60 = vpop.f32.mrf.mxu1 }
  0xef   :  { %v478_v0 = vpop.f32.mrf.mxu2 }
  0xf0   :  { %v5209_v18 = vadd.f32 %v547_v29, %v478_v0  ;;  %v343_v1 = vpop.f32.mrf.mxu0  ;;  %v4474_v29 = vld [vmem:[%s6326_s3 + $0x58] sm:$0xff] }
  0xf1   :  { %v5211_v45 = vadd.f32 %v412_v35, %v343_v1  ;;  %1492 = vmatpush.bf16.msra.mxu2 %v4474_v29 }
  0xf3   :  { %849 = vmatmul.bf16.gmra.mxu0 %v4857_v27 }
  0xf4   :  { %3528 = vmatmul.msk.bf16.gmra.mxu2 %vm265_vm1, %v4774_v55 }
  0xf5   :  { %v557_v14 = vpop.f32.mrf.mxu3 }
  0xf6   :  { %v422_v44 = vpop.f32.mrf.mxu1 }
  0xf7   :  { %v481_v35 = vpop.f32.mrf.mxu2 }
  0xf8   :  { %v5224_v0 = vadd.f32 %v550_v34, %v481_v35  ;;  %v345_v1 = vpop.f32.mrf.mxu0  ;;  %v4470_v34 = vld [vmem:[%s6326_s3 + $0x38] sm:$0xff] }
  0xf9   :  { %v5226_v27 = vadd.f32 %v414_v54, %v345_v1  ;;  %721 = vmatmul.bf16.gmra.mxu1 %v4919_v48  ;;  %1459 = vmatpush.bf16.msra.mxu0 %v4470_v34 }
  0xfa   :  { %3518 = vmatmul.msk.bf16.gmra.mxu3 %vm265_vm1, %v4867_v30 }
  0xfd   :  { %v560_v25 = vpop.f32.mrf.mxu3 }
  0xfe   :  { %v424_v54 = vpop.f32.mrf.mxu1 }
  0xff   :  { %v483_v29 = vpop.f32.mrf.mxu2 }
 0x100   :  { %v5239_v35 = vadd.f32 %v552_v46, %v483_v29  ;;  %v348_v1 = vpop.f32.mrf.mxu0 }
 0x101   :  { %v5241_v59 = vadd.f32 %v417_v13, %v348_v1 }
 0x103   :  { %854 = vmatmul.bf16.gmra.mxu0 %v4891_v39 }
 0x104   :  { %3529 = vmatmul.msk.bf16.gmra.mxu2 %vm265_vm1, %v4845_v23 }
 0x105   :  { %v562_v31 = vpop.f32.mrf.mxu3 }
 0x106   :  { %v427_v57 = vpop.f32.mrf.mxu1 }
 0x107   :  { %v486_v62 = vpop.f32.mrf.mxu2 }
 0x108   :  { %v5248_v11 = vadd.f32 %v555_v15, %v486_v62  ;;  %v350_v34 = vpop.f32.mrf.mxu0  ;;  %v4493_v15 = vld [vmem:[%s6326_s3 + $0xf0] sm:$0xff] }
 0x109   :  { %v5250_v24 = vadd.f32 %v419_v60, %v350_v34  ;;  %726 = vmatmul.bf16.gmra.mxu1 %v4947_v58  ;;  %v4469_v60 = vld [vmem:[%s6326_s3 + $0x30] sm:$0xff] }
 0x10a   :  { %3519 = vmatmul.msk.bf16.gmra.mxu3 %vm265_vm1, %v4901_v42  ;;  %1318 = vmatpush.bf16.msra.mxu1 %v4493_v15 }
 0x10b   :  { %1460 = vmatpush.bf16.msra.mxu0 %v4469_v60 }
 0x10d   :  { %v565_v39 = vpop.f32.mrf.mxu3 }
 0x10e   :  { %v429_v13 = vpop.f32.mrf.mxu1 }
 0x10f   :  { %v488_v29 = vpop.f32.mrf.mxu2 }
 0x110   :  { %v5257_v23 = vadd.f32 %v557_v14, %v488_v29  ;;  %v353_v1 = vpop.f32.mrf.mxu0 }
 0x111   :  { %v5259_v55 = vadd.f32 %v422_v44, %v353_v1 }
 0x113   :  { %859 = vmatmul.bf16.gmra.mxu0 %v4919_v48 }
 0x114   :  { %3530 = vmatmul.msk.bf16.gmra.mxu2 %vm265_vm1, %v4867_v30 }
 0x115   :  { %v567_v14 = vpop.f32.mrf.mxu3 }
 0x116   :  { %v432_v44 = vpop.f32.mrf.mxu1 }
 0x117   :  { %v491_v34 = vpop.f32.mrf.mxu2 }
 0x118   :  { %v5272_v29 = vadd.f32 %v560_v25, %v491_v34  ;;  %v355_v1 = vpop.f32.mrf.mxu0  ;;  %v4497_v34 = vld [vmem:[%s6326_s3 + $0x110] sm:$0xff]  ;;  %v4492_v25 = vld [vmem:[%s6326_s3 + $0xe8] sm:$0xff] }
 0x119   :  { %v5274_v62 = vadd.f32 %v424_v54, %v355_v1  ;;  %731 = vmatmul.bf16.gmra.mxu1 %v4981_v5  ;;  %1351 = vmatpush.bf16.msra.mxu3 %v4497_v34 }
 0x11a   :  { %6341 = vst [vmem:[#allocation3_spill] sm:$0xff] %v5272_v29  ;;  %3520 = vmatmul.msk.bf16.gmra.mxu3 %vm265_vm1, %v4935_v53  ;;  %1319 = vmatpush.bf16.msra.mxu1 %v4492_v25 }
 0x11d   :  { %v570_v46 = vpop.f32.mrf.mxu3 }
 0x11e   :  { %v434_v30 = vpop.f32.mrf.mxu1 }
 0x11f   :  { %v493_v15 = vpop.f32.mrf.mxu2 }
 0x120   :  { %v5281_v41 = vadd.f32 %v562_v31, %v493_v15  ;;  %v358_v60 = vpop.f32.mrf.mxu0  ;;  %v4473_v31 = vld [vmem:[%s6326_s3 + $0x50] sm:$0xff] }
 0x121   :  { %v5283_v7 = vadd.f32 %v427_v57, %v358_v60  ;;  %1493 = vmatpush.bf16.msra.mxu2 %v4473_v31 }
 0x122   :  { %6342 = vst [vmem:[#allocation4_spill] sm:$0xff] %v5281_v41 }
 0x123   :  { %6343 = vst [vmem:[#allocation5_spill] sm:$0xff] %v5283_v7  ;;  %864 = vmatmul.bf16.gmra.mxu0 %v4947_v58 }
 0x124   :  { %3531 = vmatmul.msk.bf16.gmra.mxu2 %vm265_vm1, %v4901_v42 }
 0x125   :  { %v572_v54 = vpop.f32.mrf.mxu3 }
 0x126   :  { %v437_v1 = vpop.f32.mrf.mxu1 }
 0x127   :  { %v496_v57 = vpop.f32.mrf.mxu2 }
 0x128   :  { %v5296_v15 = vadd.f32 %v565_v39, %v496_v57  ;;  %v360_v60 = vpop.f32.mrf.mxu0  ;;  %v4468_v39 = vld [vmem:[%s6326_s3 + $0x28] sm:$0xff] }
 0x129   :  { %v5298_v58 = vadd.f32 %v429_v13, %v360_v60  ;;  %736 = vmatmul.bf16.gmra.mxu1 %v5003_v12  ;;  %1461 = vmatpush.bf16.msra.mxu0 %v4468_v39 }
 0x12a   :  { %3521 = vmatmul.msk.bf16.gmra.mxu3 %vm265_vm1, %v4957_v61 }
 0x12b   :  { %6344 = vst [vmem:[#allocation6_spill] sm:$0xff] %v5298_v58 }
 0x12d   :  { %v575_v34 = vpop.f32.mrf.mxu3 }
 0x12e   :  { %v439_v13 = vpop.f32.mrf.mxu1 }
 0x12f   :  { %v498_v31 = vpop.f32.mrf.mxu2 }
 0x130   :  { %v5311_v57 = vadd.f32 %v567_v14, %v498_v31  ;;  %v363_v60 = vpop.f32.mrf.mxu0 }
 0x131   :  { %v5313_v48 = vadd.f32 %v432_v44, %v363_v60 }
 0x133   :  { %869 = vmatmul.bf16.gmra.mxu0 %v4981_v5 }
 0x134   :  { %3532 = vmatmul.msk.bf16.gmra.mxu2 %vm265_vm1, %v4935_v53 }
 0x135   :  { %v577_v41 = vpop.f32.mrf.mxu3 }
 0x136   :  { %v442_v29 = vpop.f32.mrf.mxu1 }
 0x137   :  { %v501_v58 = vpop.f32.mrf.mxu2 }
 0x138   :  { %v5320_v25 = vadd.f32 %v570_v46, %v501_v58  ;;  %v365_v39 = vpop.f32.mrf.mxu0  ;;  %v4467_v58 = vld [vmem:[%s6326_s3 + $0x20] sm:$0xff] }
 0x139   :  { %v5322_v7 = vadd.f32 %v434_v30, %v365_v39  ;;  %741 = vmatmul.bf16.gmra.mxu1 %v5037_v32  ;;  %v4491_v30 = vld [vmem:[%s6326_s3 + $0xe0] sm:$0xff]  ;;  %1462 = vmatpush.bf16.msra.mxu0 %v4467_v58 }
 0x13a   :  { %6345 = vst [vmem:[#allocation7_spill] sm:$0xff] %v5320_v25  ;;  %3522 = vmatmul.msk.bf16.gmra.mxu3 %vm265_vm1, %v4991_v9  ;;  %1320 = vmatpush.bf16.msra.mxu1 %v4491_v30 }
 0x13d   :  { %v580_v5 = vpop.f32.mrf.mxu3 }
 0x13e   :  { %v444_v44 = vpop.f32.mrf.mxu1 }
 0x13f   :  { %v503_v31 = vpop.f32.mrf.mxu2 }
 0x140   :  { %v5329_v53 = vadd.f32 %v572_v54, %v503_v31  ;;  %v368_v60 = vpop.f32.mrf.mxu0 }
 0x141   :  { %v5331_v42 = vadd.f32 %v437_v1, %v368_v60 }
 0x142   :  { %6346 = vst [vmem:[#allocation8_spill] sm:$0xff] %v5329_v53 }
 0x143   :  { %874 = vmatmul.bf16.gmra.mxu0 %v5003_v12 }
 0x144   :  { %3533 = vmatmul.msk.bf16.gmra.mxu2 %vm265_vm1, %v4957_v61 }
 0x145   :  { %v582_v54 = vpop.f32.mrf.mxu3 }
 0x146   :  { %v707_v1 = vpop.f32.mrf.mxu1 }
 0x147   :  { %v506_v39 = vpop.f32.mrf.mxu2 }
 0x148   :  { %v5344_v31 = vadd.f32 %v575_v34, %v506_v39  ;;  %v370_v60 = vpop.f32.mrf.mxu0 }
 0x149   :  { %v5346_v46 = vadd.f32 %v439_v13, %v370_v60  ;;  %746 = vmatmul.bf16.gmra.mxu1 %v5065_v47  ;;  %v974_v60 = vld [vmem:[%s6327_s2] sm:$0x3] }
 0x14a   :  { %3523 = vmatmul.msk.bf16.gmra.mxu3 %vm265_vm1, %v5019_v20 }
 0x14b   :  { %6347 = vst [vmem:[#allocation9_spill] sm:$0xff] %v5346_v46 }
 0x14d   :  { %v776_v14 = vpop.f32.mrf.mxu3 }
 0x14e   :  { %v709_v61 = vpop.f32.mrf.mxu1  ;;  %v777_v13 = vadd.f32 %v776_v14, %v707_v1 }
 0x14f   :  { %v508_v30 = vpop.f32.mrf.mxu2 }
 0x150   :  { %v5353_v53 = vadd.f32 %v577_v41, %v508_v30  ;;  %v373_v58 = vpop.f32.mrf.mxu0 }
 0x151   :  { %v5355_v25 = vadd.f32 %v442_v29, %v373_v58  ;;  %v5365_v29 = vperm.slane %v974_v60, 0 }
 0x152   :  { %6348 = vst [vmem:[#allocation10_spill] sm:$0xff] %v5353_v53 }
 0x153   :  { %879 = vmatmul.bf16.gmra.mxu0 %v5037_v32  ;;  %v6349_v32 = vmax.f32 %v5073_v52, %v5093_v6 }
 0x154   :  { %3534 = vmatmul.msk.bf16.gmra.mxu2 %vm265_vm1, %v4991_v9  ;;  %v4490_v9 = vld [vmem:[%s6326_s3 + $0xd8] sm:$0xff] }
 0x155   :  { %v778_v39 = vpop.f32.mrf.mxu3  ;;  %1321 = vmatpush.bf16.msra.mxu1 %v4490_v9  ;;  %v4488_v9 = vld [vmem:[%s6326_s3 + $0xc8] sm:$0xff] }
 0x156   :  { %v779_v12 = vadd.f32 %v778_v39, %v709_v61  ;;  %v712_v41 = vpop.f32.mrf.mxu1  ;;  %v4472_v39 = vld [vmem:[%s6326_s3 + $0x48] sm:$0xff] }
 0x157   :  { %v511_v30 = vpop.f32.mrf.mxu2  ;;  %1494 = vmatpush.bf16.msra.mxu2 %v4472_v39 }
 0x158   :  { %v977_v46 = vmax.f32 %v777_v13, %v779_v12  ;;  %v5367_v58 = vadd.f32 %v580_v5, %v511_v30  ;;  %v375_v34 = vpop.f32.mrf.mxu0  ;;  %v4489_v12 = vld [vmem:[%s6326_s3 + $0xd0] sm:$0xff]  ;;  %v4466_v30 = vld [vmem:[%s6326_s3 + $0x18] sm:$0xff] }
 0x159   :  { %v5369_v53 = vadd.f32 %v444_v44, %v375_v34  ;;  %751 = vmatmul.bf16.gmra.mxu1 %v5107_v16  ;;  %1463 = vmatpush.bf16.msra.mxu0 %v4466_v30 }
 0x15a   :  { %v979_v14 = vmax.f32 %v6349_v32, %v977_v46  ;;  %3524 = vmatmul.msk.bf16.gmra.mxu3 %vm265_vm1, %v5047_v36  ;;  %1322 = vmatpush.bf16.msra.mxu1 %v4489_v12  ;;  %v4496_v46 = vld [vmem:[%s6326_s3 + $0x108] sm:$0xff] }
 0x15b   :  { %1352 = vmatpush.bf16.msra.mxu3 %v4496_v46 }
 0x15c   :  { %v986_v44 = vadd.f32 %v5365_v29, %v979_v14 }
 0x15d   :  { %v781_v1 = vpop.f32.mrf.mxu3 }
 0x15e   :  { %v988_v61 = vmax.f32 %v986_v44, 0.0  ;;  %v714_v34 = vpop.f32.mrf.mxu1  ;;  %1323 = vmatpush.bf16.msra.mxu1 %v4488_v9  ;;  %v782_v32 = vadd.f32 %v781_v1, %v712_v41  ;;  %v4487_v44 = vld [vmem:[%s6326_s3 + $0xc0] sm:$0xff] }
 0x15f   :  { %v513_v13 = vpop.f32.mrf.mxu2 }
 0x160   :  { %v5386_v52 = vadd.f32 %v582_v54, %v513_v13  ;;  %v845_v6 = vpop.f32.mrf.mxu0 }
 0x162   :  { %6350 = vst [vmem:[#allocation11_spill] sm:$0xff] %v5386_v52  ;;  %1324 = vmatpush.bf16.msra.mxu1 %v4487_v44  ;;  %v5417_v52 = vperm.slane %v974_v60, 1 }
 0x163   :  { %884 = vmatmul.bf16.gmra.mxu0 %v5065_v47  ;;  %v6351_v47 = vmax.f32 %v5111_v21, %v5133_v40  ;;  %v6352_v40 = vmax.f32 %v5091_v3, %v5109_v17 }
 0x164   :  { %3535 = vmatmul.msk.bf16.gmra.mxu2 %vm265_vm1, %v5019_v20 }
 0x165   :  { %v783_v14 = vpop.f32.mrf.mxu3 }
 0x166   :  { %v784_v12 = vadd.f32 %v783_v14, %v714_v34  ;;  %v717_v13 = vpop.f32.mrf.mxu1 }
 0x167   :  { %v914_v5 = vpop.f32.mrf.mxu2 }
 0x168   :  { %v995_v54 = vmax.f32 %v782_v32, %v784_v12  ;;  %v847_v46 = vpop.f32.mrf.mxu0  ;;  %v915_v9 = vadd.f32 %v914_v5, %v845_v6 }
 0x169   :  { %756 = vmatmul.bf16.gmra.mxu1 %v5147_v50 }
 0x16a   :  { %v997_v41 = vmax.f32 %v6351_v47, %v995_v54  ;;  %3525 = vmatmul.msk.bf16.gmra.mxu3 %vm265_vm1, %v5089_v63 }
 0x16c   :  { %v999_v20 = vadd.f32 %v997_v41, %v5365_v29 }
 0x16d   :  { %v786_v1 = vpop.f32.mrf.mxu3 }
 0x16e   :  { %v1001_v39 = vmax.f32 %v999_v20, 0.0  ;;  %v719_v30 = vpop.f32.mrf.mxu1  ;;  %v787_v21 = vadd.f32 %v786_v1, %v717_v13  ;;  %v4464_v13 = vld [vmem:[%s6326_s3 + $0x8] sm:$0xff] }
 0x16f   :  { %v916_v34 = vpop.f32.mrf.mxu2 }
 0x170   :  { %v917_v14 = vadd.f32 %v916_v34, %v847_v46  ;;  %v850_v44 = vpop.f32.mrf.mxu0  ;;  %v5415_v32 = vpack.c.bf16 %v1001_v39, %v988_v61 }
 0x172   :  { %v978_v12 = vmax.f32 %v915_v9, %v917_v14 }
 0x173   :  { %889 = vmatmul.bf16.gmra.mxu0 %v5107_v16  ;;  %v4465_v16 = vld [vmem:[%s6326_s3 + $0x10] sm:$0xff] }
 0x174   :  { %v980_v54 = vmax.f32 %v6352_v40, %v978_v12  ;;  %3536 = vmatmul.msk.bf16.gmra.mxu2 %vm265_vm1, %v5047_v36  ;;  %v6353_v36 = vmax.f32 %v5151_v56, %v5159_v8  ;;  %1464 = vmatpush.bf16.msra.mxu0 %v4465_v16  ;;  %v4495_v8 = vld [vmem:[%s6326_s3 + $0x100] sm:$0xff] }
 0x175   :  { %v788_v47 = vpop.f32.mrf.mxu3  ;;  %v4463_v40 = vld [vmem:[%s6326_s3] sm:$0xff]  ;;  %1353 = vmatpush.bf16.msra.mxu3 %v4495_v8 }
 0x176   :  { %v987_v5 = vadd.f32 %v5417_v52, %v980_v54  ;;  %v789_v6 = vadd.f32 %v788_v47, %v719_v30  ;;  %v722_v46 = vpop.f32.mrf.mxu1  ;;  %v4471_v54 = vld [vmem:[%s6326_s3 + $0x40] sm:$0xff] }
 0x177   :  { %v919_v61 = vpop.f32.mrf.mxu2  ;;  %1495 = vmatpush.bf16.msra.mxu2 %v4471_v54 }
 0x178   :  { %v989_v41 = vmax.f32 %v987_v5, 0.0  ;;  %v1007_v60 = vmax.f32 %v787_v21, %v789_v6  ;;  %v852_v20 = vpop.f32.mrf.mxu0  ;;  %1465 = vmatpush.bf16.msra.mxu0 %v4464_v13  ;;  %v920_v14 = vadd.f32 %v919_v61, %v850_v44  ;;  %v6354_v44 = vmax.f32 %v5131_v37, %v5149_v51 }
 0x179   :  { %761 = vmatmul.bf16.gmra.mxu1 %v5172_v19  ;;  %v6355_v37 = vmax.f32 %v5176_v26, %v5184_v49  ;;  %v6356_v26 = vmax.f32 %v5157_v2, %v5174_v22 }
 0x17a   :  { %992 = vst.msk [vmem:[#allocation2 + $0x8] sm:$0xff] %vm991_vm2, %v989_v41  ;;  %v1009_v3 = vmax.f32 %v6353_v36, %v1007_v60  ;;  %3526 = vmatmul.msk.bf16.gmra.mxu3 %vm265_vm1, %v5129_v33 }
 0x17c   :  { %v1011_v17 = vadd.f32 %v1009_v3, %v5365_v29  ;;  %1466 = vmatpush.bf16.msra.mxu0 %v4463_v40 }
 0x17d   :  { %v791_v1 = vpop.f32.mrf.mxu3 }
 0x17e   :  { %v1013_v30 = vmax.f32 %v1011_v17, 0.0  ;;  %v724_v34 = vpop.f32.mrf.mxu1 }
 0x17f   :  { %v921_v9 = vpop.f32.mrf.mxu2 }
 0x180   :  { %v922_v12 = vadd.f32 %v921_v9, %v852_v20  ;;  %v855_v21 = vpop.f32.mrf.mxu0  ;;  %v5440_v56 = vpack.c.bf16 %v1013_v30, %v1001_v39  ;;  %v792_v39 = vadd.f32 %v791_v1, %v722_v46 }
 0x182   :  { %v996_v47 = vmax.f32 %v920_v14, %v922_v12 }
 0x183   :  { %894 = vmatmul.bf16.gmra.mxu0 %v5147_v50 }
 0x184   :  { %v998_v5 = vmax.f32 %v6354_v44, %v996_v47  ;;  %3537 = vmatmul.msk.bf16.gmra.mxu2 %vm265_vm1, %v5089_v63 }
 0x185   :  { %v793_v6 = vpop.f32.mrf.mxu3 }
 0x186   :  { %v1000_v61 = vadd.f32 %v998_v5, %v5417_v52  ;;  %v794_v41 = vadd.f32 %v793_v6, %v724_v34  ;;  %v727_v60 = vpop.f32.mrf.mxu1 }
 0x187   :  { %v924_v20 = vpop.f32.mrf.mxu2 }
 0x188   :  { %v1002_v16 = vmax.f32 %v1000_v61, 0.0  ;;  %v1019_v36 = vmax.f32 %v792_v39, %v794_v41  ;;  %v857_v3 = vpop.f32.mrf.mxu0  ;;  %v925_v1 = vadd.f32 %v924_v20, %v855_v21 }
 0x189   :  { %1325 = vmatmul.bf16.vlgmr.msra.gmra.mxu1 %v5440_v56 }
 0x18a   :  { %1004 = vst.msk [vmem:[#allocation2 + $0x18] sm:$0xff] %vm991_vm2, %v1002_v16  ;;  %v1021_v50 = vmax.f32 %v6355_v37, %v1019_v36 }
 0x18c   :  { %v1023_v51 = vadd.f32 %v1021_v50, %v5365_v29  ;;  %v1126_v50 = vld [vmem:[#allocation2 + $0x8] sm:$0xff] }
 0x18d   :  { %v796_v63 = vpop.f32.mrf.mxu3 }
 0x18e   :  { %v1025_v46 = vmax.f32 %v1023_v51, 0.0  ;;  %v729_v17 = vpop.f32.mrf.mxu1  ;;  %v797_v8 = vadd.f32 %v796_v63, %v727_v60 }
 0x18f   :  { %v926_v13 = vpop.f32.mrf.mxu2 }
 0x190   :  { %1027 = vst [vmem:[#allocation2 + $0x30] sm:$0xff] %v1025_v46  ;;  %v927_v34 = vadd.f32 %v926_v13, %v857_v3  ;;  %v860_v9 = vpop.f32.mrf.mxu0  ;;  %v5464_v14 = vpack.c.bf16 %v1025_v46, %v1013_v30 }
 0x191   :  { %v1128_v60 = vld [vmem:[#allocation2 + $0x18] sm:$0xff] }
 0x192   :  { %v1008_v12 = vmax.f32 %v925_v1, %v927_v34 }
 0x193   :  { %899 = vmatmul.bf16.gmra.mxu0 %v5172_v19  ;;  %v6357_v19 = vmax.f32 %v5193_v10, %v5202_v28  ;;  %v5482_v28 = vpack.c.bf16 %v1128_v60, %v1126_v50 }
 0x194   :  { %v1010_v49 = vmax.f32 %v6356_v26, %v1008_v12  ;;  %3538 = vmatmul.msk.bf16.gmra.mxu2 %vm265_vm1, %v5129_v33 }
 0x195   :  { %v798_v40 = vpop.f32.mrf.mxu3 }
 0x196   :  { %v1012_v54 = vadd.f32 %v1010_v49, %v5417_v52  ;;  %v799_v47 = vadd.f32 %v798_v40, %v729_v17  ;;  %v732_v21 = vpop.f32.mrf.mxu1  ;;  %v6358_v17 = vmax.f32 %v5182_v43, %v5191_v4  ;;  %v4481_v49 = vld [vmem:[%s6326_s3 + $0x90] sm:$0xff]  ;;  %v6359_v40 = vmax.f32 %v5211_v45, %v5226_v27  ;;  %v4479_v45 = vld [vmem:[%s6326_s3 + $0x80] sm:$0xff] }
 0x197   :  { %v929_v39 = vpop.f32.mrf.mxu2 }
 0x198   :  { %v1014_v44 = vmax.f32 %v1012_v54, 0.0  ;;  %v1031_v30 = vmax.f32 %v797_v8, %v799_v47  ;;  %v862_v5 = vpop.f32.mrf.mxu0  ;;  %v930_v20 = vadd.f32 %v929_v39, %v860_v9 }
 0x19a   :  { %1016 = vst.msk [vmem:[#allocation2 + $0x28] sm:$0xff] %vm991_vm2, %v1014_v44  ;;  %v1033_v6 = vmax.f32 %v6357_v19, %v1031_v30 }
 0x19c   :  { %v1035_v2 = vadd.f32 %v1033_v6, %v5365_v29 }
 0x19d   :  { %v801_v22 = vpop.f32.mrf.mxu3 }
 0x19e   :  { %v1037_v61 = vmax.f32 %v1035_v2, 0.0  ;;  %v734_v33 = vpop.f32.mrf.mxu1  ;;  %v802_v10 = vadd.f32 %v801_v22, %v732_v21  ;;  %v4480_v21 = vld [vmem:[%s6326_s3 + $0x88] sm:$0xff] }
 0x19f   :  { %v931_v41 = vpop.f32.mrf.mxu2 }
 0x1a0   :  { %1039 = vst [vmem:[#allocation2 + $0x40] sm:$0xff] %v1037_v61  ;;  %v932_v16 = vadd.f32 %v931_v41, %v862_v5  ;;  %v865_v36 = vpop.f32.mrf.mxu0  ;;  %v5478_v3 = vpack.c.bf16 %v1037_v61, %v1025_v46  ;;  %v4482_v46 = vld [vmem:[%s6326_s3 + $0x98] sm:$0xff] }
 0x1a1   :  { %v1130_v37 = vld [vmem:[#allocation2 + $0x28] sm:$0xff]  ;;  %1744 = vmatpush.bf16.msrb.mxu0 %v4482_v46 }
 0x1a2   :  { %v1020_v51 = vmax.f32 %v930_v20, %v932_v16  ;;  %v5480_v63 = vpack.c.bf16 %v1130_v37, %v1128_v60  ;;  %1330 = vmatmul.bf16.gmra.mxu1 %v5478_v3 }
 0x1a3   :  { %1467 = vmatmul.bf16.vlgmr.msra.gmra.mxu0 %v5415_v32 }
 0x1a4   :  { %v1022_v13 = vmax.f32 %v6358_v17, %v1020_v51  ;;  %3635 = vmatmul.msk.bf16.vlgmr.msra.gmra.mxu3 %vm991_vm2, %v5480_v63  ;;  %3687 = vmatmul.msk.bf16.vlgmr.msra.gmra.mxu2 %vm991_vm2, %v5482_v28 }
 0x1a5   :  { %v803_v1 = vpop.f32.mrf.mxu3  ;;  %1745 = vmatpush.bf16.msrb.mxu0 %v4481_v49 }
 0x1a6   :  { %v1024_v34 = vadd.f32 %v1022_v13, %v5417_v52  ;;  %v804_v9 = vadd.f32 %v803_v1, %v734_v33  ;;  %v737_v12 = vpop.f32.mrf.mxu1  ;;  %v4506_v33 = vld [vmem:[%s6326_s3 + $0x158] sm:$0xff]  ;;  %v4477_v1 = vld [vmem:[%s6326_s3 + $0x70] sm:$0xff] }
 0x1a7   :  { %v934_v8 = vpop.f32.mrf.mxu2  ;;  %1614 = vmatpush.bf16.msrb.mxu1 %v4506_v33  ;;  %v6362_v33 = vmax.f32 %v5224_v0, %v5239_v35  ;;  %v4500_v0 = vld [vmem:[%s6326_s3 + $0x128] sm:$0xff]  ;;  %v6363_v35 = vmax.f32 %v5259_v55, %v5274_v62  ;;  %v4509_v55 = vld [vmem:[%s6326_s3 + $0x170] sm:$0xff] }
 0x1a8   :  { %v1026_v26 = vmax.f32 %v1024_v34, 0.0  ;;  %v1043_v43 = vmax.f32 %v802_v10, %v804_v9  ;;  %v867_v4 = vpop.f32.mrf.mxu0  ;;  %v935_v19 = vadd.f32 %v934_v8, %v865_v36  ;;  %v4478_v36 = vld [vmem:[%s6326_s3 + $0x78] sm:$0xff]  ;;  %v4504_v34 = vld [vmem:[%s6326_s3 + $0x148] sm:$0xff]  ;;  %v6361_v9 = vmax.f32 %v5241_v59, %v5250_v24  ;;  %v4485_v62 = vld [vmem:[%s6326_s3 + $0xb0] sm:$0xff] }
 0x1a9   :  { %1746 = vmatpush.bf16.msrb.mxu0 %v4480_v21 }
 0x1aa   :  { %1028 = vst.msk [vmem:[#allocation2 + $0x38] sm:$0xff] %vm991_vm2, %v1026_v26  ;;  %v1045_v54 = vmax.f32 %v6359_v40, %v1043_v43  ;;  %v4476_v26 = vld [vmem:[%s6326_s3 + $0x68] sm:$0xff] }
 0x1ac   :  { %v1047_v47 = vadd.f32 %v1045_v54, %v5365_v29 }
 0x1ad   :  { %v806_v39 = vpop.f32.mrf.mxu3  ;;  %1747 = vmatpush.bf16.msrb.mxu0 %v4479_v45 }
 0x1ae   :  { %v1049_v44 = vmax.f32 %v1047_v47, 0.0  ;;  %v739_v30 = vpop.f32.mrf.mxu1  ;;  %v807_v20 = vadd.f32 %v806_v39, %v737_v12  ;;  %v4510_v39 = vld [vmem:[%s6326_s3 + $0x178] sm:$0xff] }
 0x1af   :  { %v936_v5 = vpop.f32.mrf.mxu2  ;;  %1647 = vmatpush.bf16.msrb.mxu3 %v4510_v39 }
 0x1b0   :  { %1051 = vst [vmem:[#allocation2 + $0x50] sm:$0xff] %v1049_v44  ;;  %v937_v6 = vadd.f32 %v936_v5, %v867_v4  ;;  %v870_v2 = vpop.f32.mrf.mxu0  ;;  %v5508_v22 = vpack.c.bf16 %v1049_v44, %v1037_v61  ;;  %v6360_v61 = vmax.f32 %v5200_v38, %v5209_v18  ;;  %v4503_v4 = vld [vmem:[%s6326_s3 + $0x140] sm:$0xff] }
 0x1b1   :  { %v1132_v27 = vld [vmem:[#allocation2 + $0x38] sm:$0xff]  ;;  %1748 = vmatpush.bf16.msrb.mxu0 %v4478_v36  ;;  %v4475_v5 = vld [vmem:[%s6326_s3 + $0x60] sm:$0xff] }
 0x1b2   :  { %v1032_v41 = vmax.f32 %v935_v19, %v937_v6  ;;  %v5516_v60 = vpack.c.bf16 %v1132_v27, %v1130_v37  ;;  %v4505_v37 = vld [vmem:[%s6326_s3 + $0x150] sm:$0xff]  ;;  %v4502_v6 = vld [vmem:[%s6326_s3 + $0x138] sm:$0xff] }
 0x1b3   :  { %1472 = vmatmul.bf16.gmra.mxu0 %v5464_v14  ;;  %1615 = vmatpush.bf16.msrb.mxu1 %v4505_v37 }
 0x1b4   :  { %v1034_v16 = vmax.f32 %v6360_v61, %v1032_v41  ;;  %3688 = vmatmul.msk.bf16.gmra.mxu2 %vm991_vm2, %v5516_v60  ;;  %1648 = vmatpush.bf16.msrb.mxu3 %v4509_v55 }
 0x1b5   :  { %v808_v50 = vpop.f32.mrf.mxu3  ;;  %1749 = vmatpush.bf16.msrb.mxu0 %v4477_v1 }
 0x1b6   :  { %v1036_v51 = vadd.f32 %v1034_v16, %v5417_v52  ;;  %v809_v10 = vadd.f32 %v808_v50, %v739_v30  ;;  %v742_v17 = vpop.f32.mrf.mxu1  ;;  %v4486_v30 = vld [vmem:[%s6326_s3 + $0xb8] sm:$0xff] }
 0x1b7   :  { %v939_v13 = vpop.f32.mrf.mxu2  ;;  %1616 = vmatpush.bf16.msrb.mxu1 %v4504_v34  ;;  %1777 = vmatpush.bf16.msrb.mxu2 %v4486_v30 }
 0x1b8   :  { %v1038_v38 = vmax.f32 %v1036_v51, 0.0  ;;  %v1055_v18 = vmax.f32 %v807_v20, %v809_v10  ;;  %v872_v46 = vpop.f32.mrf.mxu0  ;;  %v940_v24 = vadd.f32 %v939_v13, %v870_v2 }
 0x1b9   :  { %1750 = vmatpush.bf16.msrb.mxu0 %v4476_v26 }
 0x1ba   :  { %1040 = vst.msk [vmem:[#allocation2 + $0x48] sm:$0xff] %vm991_vm2, %v1038_v38  ;;  %v1057_v12 = vmax.f32 %v6361_v9, %v1055_v18  ;;  %v4499_v18 = vld [vmem:[%s6326_s3 + $0x120] sm:$0xff] }
 0x1bb   :  { %1617 = vmatpush.bf16.msrb.mxu1 %v4503_v4  ;;  %1778 = vmatpush.bf16.msrb.mxu2 %v4485_v62 }
 0x1bc   :  { %v1059_v8 = vadd.f32 %v1057_v12, %v5365_v29 }
 0x1bd   :  { %v811_v43 = vpop.f32.mrf.mxu3  ;;  %1751 = vmatpush.bf16.msrb.mxu0 %v4475_v5 }
 0x1be   :  { %v1061_v49 = vmax.f32 %v1059_v8, 0.0  ;;  %v744_v40 = vpop.f32.mrf.mxu1  ;;  %v812_v45 = vadd.f32 %v811_v43, %v742_v17 }
 0x1bf   :  { %v941_v54 = vpop.f32.mrf.mxu2  ;;  %1618 = vmatpush.bf16.msrb.mxu1 %v4502_v6 }
 0x1c0   :  { %1063 = vst [vmem:[#allocation2 + $0x60] sm:$0xff] %v1061_v49  ;;  %v942_v59 = vadd.f32 %v941_v54, %v872_v46  ;;  %v875_v47 = vpop.f32.mrf.mxu0  ;;  %v5548_v21 = vpack.c.bf16 %v1061_v49, %v1049_v44 }
 0x1c1   :  { %v1134_v19 = vld [vmem:[#allocation2 + $0x48] sm:$0xff] }
 0x1c2   :  { %v1044_v2 = vmax.f32 %v940_v24, %v942_v59  ;;  %v5562_v44 = vpack.c.bf16 %v1134_v19, %v1132_v27  ;;  %1335 = vmatmul.bf16.gmra.mxu1 %v5548_v21  ;;  %v4501_v27 = vld [vmem:[%s6326_s3 + $0x130] sm:$0xff] }
 0x1c3   :  { %1477 = vmatmul.bf16.gmra.mxu0 %v5508_v22  ;;  %1619 = vmatpush.bf16.msrb.mxu1 %v4501_v27 }
 0x1c4   :  { %v1046_v41 = vmax.f32 %v6362_v33, %v1044_v2  ;;  %3636 = vmatmul.msk.bf16.gmra.mxu3 %vm991_vm2, %v5562_v44  ;;  %v6366_v33 = vld [vmem:[#allocation6_spill] sm:$0xff] }
 0x1c5   :  { %v813_v20 = vpop.f32.mrf.mxu3 }
 0x1c6   :  { %v1048_v61 = vadd.f32 %v1046_v41, %v5417_v52  ;;  %v814_v16 = vadd.f32 %v813_v20, %v744_v40  ;;  %v747_v36 = vpop.f32.mrf.mxu1 }
 0x1c7   :  { %v944_v50 = vpop.f32.mrf.mxu2  ;;  %1620 = vmatpush.bf16.msrb.mxu1 %v4500_v0  ;;  %v4508_v0 = vld [vmem:[%s6326_s3 + $0x168] sm:$0xff] }
 0x1c8   :  { %v1050_v37 = vmax.f32 %v1048_v61, 0.0  ;;  %v1067_v51 = vmax.f32 %v812_v45, %v814_v16  ;;  %v877_v10 = vpop.f32.mrf.mxu0  ;;  %v945_v9 = vadd.f32 %v944_v50, %v875_v47  ;;  %v6365_v45 = vld [vmem:[#allocation5_spill] sm:$0xff]  ;;  %1649 = vmatpush.bf16.msrb.mxu3 %v4508_v0 }
 0x1c9   :  { %v6367_v41 = vmax.f32 %v6365_v45, %v6366_v33 }
 0x1ca   :  { %1052 = vst.msk [vmem:[#allocation2 + $0x58] sm:$0xff] %vm991_vm2, %v1050_v37  ;;  %v1069_v17 = vmax.f32 %v6363_v35, %v1067_v51  ;;  %v4483_v35 = vld [vmem:[%s6326_s3 + $0xa0] sm:$0xff] }
 0x1cb   :  { %1621 = vmatpush.bf16.msrb.mxu1 %v4499_v18 }
 0x1cc   :  { %v1071_v13 = vadd.f32 %v1069_v17, %v5365_v29 }
 0x1cd   :  { %v816_v38 = vpop.f32.mrf.mxu3 }
 0x1ce   :  { %v1073_v46 = vmax.f32 %v1071_v13, 0.0  ;;  %v749_v1 = vpop.f32.mrf.mxu1  ;;  %v817_v54 = vadd.f32 %v816_v38, %v747_v36 }
 0x1cf   :  { %v946_v34 = vpop.f32.mrf.mxu2 }
 0x1d0   :  { %1075 = vst [vmem:[#allocation2 + $0x70] sm:$0xff] %v1073_v46  ;;  %v947_v12 = vadd.f32 %v946_v34, %v877_v10  ;;  %v880_v8 = vpop.f32.mrf.mxu0  ;;  %v5586_v26 = vpack.c.bf16 %v1073_v46, %v1061_v49  ;;  %v6364_v49 = vmax.f32 %v5248_v11, %v5257_v23  ;;  %v4484_v23 = vld [vmem:[%s6326_s3 + $0xa8] sm:$0xff] }
 0x1d1   :  { %v1136_v43 = vld [vmem:[#allocation2 + $0x58] sm:$0xff]  ;;  %1779 = vmatpush.bf16.msrb.mxu2 %v4484_v23 }
 0x1d2   :  { %v1056_v4 = vmax.f32 %v945_v9, %v947_v12  ;;  %v5594_v40 = vpack.c.bf16 %v1136_v43, %v1134_v19  ;;  %v4530_v12 = vld [vmem:[%s6326_s3 + $0x218] sm:$0xff] }
 0x1d3   :  { %1482 = vmatmul.bf16.gmra.mxu0 %v5586_v26  ;;  %v4518_v23 = vld [vmem:[%s6326_s3 + $0x1b8] sm:$0xff] }
 0x1d4   :  { %v1058_v24 = vmax.f32 %v6364_v49, %v1056_v4  ;;  %3689 = vmatmul.msk.bf16.gmra.mxu2 %vm991_vm2, %v5594_v40  ;;  %2098 = vmatpush.bf16.msra.mxu0 %v4530_v12 }
 0x1d5   :  { %v818_v59 = vpop.f32.mrf.mxu3  ;;  %1780 = vmatpush.bf16.msrb.mxu2 %v4483_v35  ;;  %1935 = vmatpush.bf16.msra.mxu1 %v4518_v23 }
 0x1d6   :  { %v1060_v47 = vadd.f32 %v1058_v24, %v5417_v52  ;;  %v819_v39 = vadd.f32 %v818_v59, %v749_v1  ;;  %v752_v30 = vpop.f32.mrf.mxu1  ;;  %v6369_v1 = vld [vmem:[#allocation4_spill] sm:$0xff]  ;;  %v4529_v24 = vld [vmem:[%s6326_s3 + $0x210] sm:$0xff]  ;;  %v6371_v59 = vmax.f32 %v5313_v48, %v5322_v7  ;;  %v4507_v7 = vld [vmem:[%s6326_s3 + $0x160] sm:$0xff] }
 0x1d7   :  { %v949_v5 = vpop.f32.mrf.mxu2  ;;  %v4527_v48 = vld [vmem:[%s6326_s3 + $0x200] sm:$0xff]  ;;  %1650 = vmatpush.bf16.msrb.mxu3 %v4507_v7 }
 0x1d8   :  { %v1062_v19 = vmax.f32 %v1060_v47, 0.0  ;;  %v1079_v6 = vmax.f32 %v817_v54, %v819_v39  ;;  %v882_v2 = vpop.f32.mrf.mxu0  ;;  %v950_v50 = vadd.f32 %v949_v5, %v880_v8  ;;  %2099 = vmatpush.bf16.msra.mxu0 %v4529_v24  ;;  %v6375_v7 = vld [vmem:[#allocation7_spill] sm:$0xff] }
 0x1da   :  { %1064 = vst.msk [vmem:[#allocation2 + $0x68] sm:$0xff] %vm991_vm2, %v1062_v19  ;;  %v1081_v20 = vmax.f32 %v6367_v41, %v1079_v6 }
 0x1dc   :  { %v1083_v11 = vadd.f32 %v1081_v20, %v5365_v29 }
 0x1dd   :  { %v821_v27 = vpop.f32.mrf.mxu3 }
 0x1de   :  { %v5611_v61 = vmax.f32 %v1083_v11, 0.0  ;;  %v754_v16 = vpop.f32.mrf.mxu1  ;;  %v822_v18 = vadd.f32 %v821_v27, %v752_v30  ;;  %v4528_v30 = vld [vmem:[%s6326_s3 + $0x208] sm:$0xff] }
 0x1df   :  { %v951_v36 = vpop.f32.mrf.mxu2  ;;  %2100 = vmatpush.bf16.msra.mxu0 %v4528_v30 }
 0x1e0   :  { %1087 = vst [vmem:[#allocation2 + $0x80] sm:$0xff] %v5611_v61  ;;  %v952_v37 = vadd.f32 %v951_v36, %v882_v2  ;;  %v885_v51 = vpop.f32.mrf.mxu0  ;;  %v5615_v10 = vpack.c.bf16 %v5611_v61, %v1073_v46  ;;  %v6368_v46 = vld [vmem:[#allocation3_spill] sm:$0xff] }
 0x1e1   :  { %v5623_v17 = vld [vmem:[#allocation2 + $0x68] sm:$0xff]  ;;  %v6370_v34 = vmax.f32 %v6368_v46, %v6369_v1  ;;  %v4525_v1 = vld [vmem:[%s6326_s3 + $0x1f0] sm:$0xff] }
 0x1e2   :  { %v1068_v13 = vmax.f32 %v950_v50, %v952_v37  ;;  %v5626_v38 = vpack.c.bf16 %v5623_v17, %v1136_v43  ;;  %1340 = vmatmul.bf16.gmra.mxu1 %v5615_v10  ;;  %v6372_v50 = vmax.f32 %v5296_v15, %v5311_v57 }
 0x1e3   :  { %1752 = vmatmul.bf16.vlgmr.msrb.gmra.mxu0 %v5415_v32 }
 0x1e4   :  { %v1070_v9 = vmax.f32 %v6370_v34, %v1068_v13  ;;  %3637 = vmatmul.msk.bf16.gmra.mxu3 %vm991_vm2, %v5626_v38  ;;  %2101 = vmatpush.bf16.msra.mxu0 %v4527_v48  ;;  %v4516_v34 = vld [vmem:[%s6326_s3 + $0x1a8] sm:$0xff] }
 0x1e5   :  { %v823_v8 = vpop.f32.mrf.mxu3  ;;  %v6376_v48 = vld [vmem:[#allocation8_spill] sm:$0xff] }
 0x1e6   :  { %v1072_v55 = vadd.f32 %v1070_v9, %v5417_v52  ;;  %v824_v62 = vadd.f32 %v823_v8, %v754_v16  ;;  %v757_v43 = vpop.f32.mrf.mxu1  ;;  %v6373_v9 = vld [vmem:[#allocation9_spill] sm:$0xff] }
 0x1e7   :  { %v954_v32 = vpop.f32.mrf.mxu2  ;;  %v6374_v12 = vmax.f32 %v5331_v42, %v6373_v9  ;;  %v4524_v42 = vld [vmem:[%s6326_s3 + $0x1e8] sm:$0xff] }
 0x1e8   :  { %v1074_v4 = vmax.f32 %v1072_v55, 0.0  ;;  %v1091_v54 = vmax.f32 %v822_v18, %v824_v62  ;;  %v887_v49 = vpop.f32.mrf.mxu0  ;;  %v955_v2 = vadd.f32 %v954_v32, %v885_v51  ;;  %v4526_v51 = vld [vmem:[%s6326_s3 + $0x1f8] sm:$0xff] }
 0x1e9   :  { %2102 = vmatpush.bf16.msra.mxu0 %v4526_v51  ;;  %v4522_v55 = vld [vmem:[%s6326_s3 + $0x1d8] sm:$0xff] }
 0x1ea   :  { %1076 = vst.msk [vmem:[#allocation2 + $0x78] sm:$0xff] %vm991_vm2, %v1074_v4  ;;  %v1093_v47 = vmax.f32 %v6371_v59, %v1091_v54  ;;  %v4534_v62 = vld [vmem:[%s6326_s3 + $0x238] sm:$0xff]  ;;  %1968 = vmatpush.bf16.msra.mxu3 %v4522_v55  ;;  %v4515_v54 = vld [vmem:[%s6326_s3 + $0x1a0] sm:$0xff] }
 0x1eb   :  { %2131 = vmatpush.bf16.msra.mxu2 %v4534_v62  ;;  %v4520_v62 = vld [vmem:[%s6326_s3 + $0x1c8] sm:$0xff] }
 0x1ec   :  { %v1095_v39 = vadd.f32 %v1093_v47, %v5365_v29 }
 0x1ed   :  { %v826_v5 = vpop.f32.mrf.mxu3  ;;  %2103 = vmatpush.bf16.msra.mxu0 %v4525_v1 }
 0x1ee   :  { %v1097_v19 = vmax.f32 %v1095_v39, 0.0  ;;  %v759_v20 = vpop.f32.mrf.mxu1  ;;  %v827_v36 = vadd.f32 %v826_v5, %v757_v43 }
 0x1ef   :  { %v956_v6 = vpop.f32.mrf.mxu2 }
 0x1f0   :  { %1099 = vst [vmem:[#allocation2 + $0x90] sm:$0xff] %v1097_v19  ;;  %v957_v45 = vadd.f32 %v956_v6, %v887_v49  ;;  %v890_v33 = vpop.f32.mrf.mxu0  ;;  %v5657_v41 = vpack.c.bf16 %v1097_v19, %v5611_v61  ;;  %v4523_v6 = vld [vmem:[%s6326_s3 + $0x1e0] sm:$0xff] }
 0x1f1   :  { %v1140_v11 = vld [vmem:[#allocation2 + $0x78] sm:$0xff]  ;;  %2104 = vmatpush.bf16.msra.mxu0 %v4524_v42 }
 0x1f2   :  { %v1080_v27 = vmax.f32 %v955_v2, %v957_v45  ;;  %v5663_v16 = vpack.c.bf16 %v1140_v11, %v5623_v17  ;;  %1622 = vmatmul.bf16.vlgmr.msrb.gmra.mxu1 %v5440_v56  ;;  %v4517_v56 = vld [vmem:[%s6326_s3 + $0x1b0] sm:$0xff]  ;;  %v4514_v2 = vld [vmem:[%s6326_s3 + $0x198] sm:$0xff] }
 0x1f3   :  { %1757 = vmatmul.bf16.gmra.mxu0 %v5464_v14  ;;  %1936 = vmatpush.bf16.msra.mxu1 %v4517_v56 }
 0x1f4   :  { %v1082_v37 = vmax.f32 %v6372_v50, %v1080_v27  ;;  %3690 = vmatmul.msk.bf16.gmra.mxu2 %vm991_vm2, %v5663_v16  ;;  %v4513_v50 = vld [vmem:[%s6326_s3 + $0x190] sm:$0xff] }
 0x1f5   :  { %v828_v0 = vpop.f32.mrf.mxu3  ;;  %2105 = vmatpush.bf16.msra.mxu0 %v4523_v6 }
 0x1f6   :  { %v1084_v35 = vadd.f32 %v1082_v37, %v5417_v52  ;;  %v829_v13 = vadd.f32 %v828_v0, %v759_v20  ;;  %v762_v43 = vpop.f32.mrf.mxu1  ;;  %v6377_v20 = vmax.f32 %v6375_v7, %v6376_v48 }
 0x1f7   :  { %v959_v18 = vpop.f32.mrf.mxu2  ;;  %1937 = vmatpush.bf16.msra.mxu1 %v4516_v34 }
 0x1f8   :  { %v1086_v15 = vmax.f32 %v1084_v35, 0.0  ;;  %v1103_v57 = vmax.f32 %v827_v36, %v829_v13  ;;  %v892_v46 = vpop.f32.mrf.mxu0  ;;  %v960_v24 = vadd.f32 %v959_v18, %v890_v33  ;;  %v4521_v13 = vld [vmem:[%s6326_s3 + $0x1d0] sm:$0xff] }
 0x1f9   :  { %v4533_v18 = vld [vmem:[%s6326_s3 + $0x230] sm:$0xff]  ;;  %1969 = vmatpush.bf16.msra.mxu3 %v4521_v13 }
 0x1fa   :  { %1088 = vst.msk [vmem:[#allocation2 + $0x88] sm:$0xff] %vm991_vm2, %v1086_v15  ;;  %v1105_v8 = vmax.f32 %v6374_v12, %v1103_v57  ;;  %v4512_v15 = vld [vmem:[%s6326_s3 + $0x188] sm:$0xff]  ;;  %2132 = vmatpush.bf16.msra.mxu2 %v4533_v18 }
 0x1fb   :  { %1938 = vmatpush.bf16.msra.mxu1 %v4515_v54  ;;  %v4548_v18 = vld [vmem:[%s6326_s3 + $0x2a8] sm:$0xff] }
 0x1fc   :  { %v1107_v32 = vadd.f32 %v1105_v8, %v5365_v29 }
 0x1fd   :  { %v831_v4 = vpop.f32.mrf.mxu3  ;;  %1970 = vmatpush.bf16.msra.mxu3 %v4520_v62 }
 0x1fe   :  { %v1109_v49 = vmax.f32 %v1107_v32, 0.0  ;;  %v764_v27 = vpop.f32.mrf.mxu1 }
 0x1ff   :  { %v961_v59 = vpop.f32.mrf.mxu2  ;;  %1939 = vmatpush.bf16.msra.mxu1 %v4514_v2  ;;  %v4519_v2 = vld [vmem:[%s6326_s3 + $0x1c0] sm:$0xff] }
 0x200   :  { %1111 = vst [vmem:[#allocation2 + $0xa0] sm:$0xff] %v1109_v49  ;;  %v962_v47 = vadd.f32 %v961_v59, %v892_v46  ;;  %v895_v39 = vpop.f32.mrf.mxu0  ;;  %v5702_v30 = vpack.c.bf16 %v1109_v49, %v1097_v19  ;;  %v832_v19 = vadd.f32 %v831_v4, %v762_v43 }
 0x201   :  { %v5704_v5 = vld [vmem:[#allocation2 + $0x88] sm:$0xff]  ;;  %1971 = vmatpush.bf16.msra.mxu3 %v4519_v2  ;;  %v5883_v2 = vld [vmem:[#allocation2 + $0x40] sm:$0xff] }
 0x202   :  { %v1092_v45 = vmax.f32 %v960_v24, %v962_v47  ;;  %v5713_v33 = vpack.c.bf16 %v5704_v5, %v1140_v11  ;;  %1627 = vmatmul.bf16.gmra.mxu1 %v5478_v3  ;;  %v4531_v24 = vld [vmem:[%s6326_s3 + $0x220] sm:$0xff] }
 0x203   :  { %1762 = vmatmul.bf16.gmra.mxu0 %v5508_v22  ;;  %1940 = vmatpush.bf16.msra.mxu1 %v4513_v50  ;;  %v6381_v47 = vld [vmem:[#allocation11_spill] sm:$0xff]  ;;  %v4542_v50 = vld [vmem:[%s6326_s3 + $0x278] sm:$0xff] }
 0x204   :  { %v1094_v23 = vmax.f32 %v6377_v20, %v1092_v45  ;;  %3638 = vmatmul.msk.bf16.gmra.mxu3 %vm991_vm2, %v5713_v33  ;;  %3815 = vmatmul.msk.bf16.vlgmr.msrb.gmra.mxu2 %vm991_vm2, %v5482_v28  ;;  %v6378_v28 = vmax.f32 %v5355_v25, %v5369_v53  ;;  %v4511_v53 = vld [vmem:[%s6326_s3 + $0x180] sm:$0xff]  ;;  %v4553_v20 = vld [vmem:[%s6326_s3 + $0x2d0] sm:$0xff] }
 0x205   :  { %v833_v36 = vpop.f32.mrf.mxu3 }
 0x206   :  { %v1096_v11 = vadd.f32 %v1094_v23, %v5417_v52  ;;  %v834_v3 = vadd.f32 %v833_v36, %v764_v27 }
 0x207   :  { %v964_v37 = vpop.f32.mrf.mxu2  ;;  %1941 = vmatpush.bf16.msra.mxu1 %v4512_v15  ;;  %v4539_v15 = vld [vmem:[%s6326_s3 + $0x260] sm:$0xff] }
 0x208   :  { %v1098_v51 = vmax.f32 %v1096_v11, 0.0  ;;  %v1115_v0 = vmax.f32 %v832_v19, %v834_v3  ;;  %v897_v56 = vpop.f32.mrf.mxu0  ;;  %v965_v25 = vadd.f32 %v964_v37, %v895_v39  ;;  %v6382_v39 = vmax.f32 %v5367_v58, %v6381_v47  ;;  %v1326_v19 = vpop.f32.mrf.mxu1  ;;  %v4551_v3 = vld [vmem:[%s6326_s3 + $0x2c0] sm:$0xff]  ;;  %v4556_v47 = vld [vmem:[%s6326_s3 + $0x2e8] sm:$0xff] }
 0x20a   :  { %1100 = vst.msk [vmem:[#allocation2 + $0x98] sm:$0xff] %vm991_vm2, %v1098_v51  ;;  %v1117_v35 = vmax.f32 %v6378_v28, %v1115_v0  ;;  %v4546_v51 = vld [vmem:[%s6326_s3 + $0x298] sm:$0xff]  ;;  %v4549_v28 = vld [vmem:[%s6326_s3 + $0x2b0] sm:$0xff] }
 0x20b   :  { %1942 = vmatpush.bf16.msra.mxu1 %v4511_v53  ;;  %v4550_v0 = vld [vmem:[%s6326_s3 + $0x2b8] sm:$0xff]  ;;  %v4547_v53 = vld [vmem:[%s6326_s3 + $0x2a0] sm:$0xff] }
 0x20c   :  { %v1119_v57 = vadd.f32 %v1117_v35, %v5365_v29  ;;  %v6379_v29 = vld [vmem:[#allocation10_spill] sm:$0xff]  ;;  %v4540_v35 = vld [vmem:[%s6326_s3 + $0x268] sm:$0xff] }
 0x20d   :  { %v6380_v8 = vmax.f32 %v5344_v31, %v6379_v29 }
 0x20e   :  { %v1121_v46 = vmax.f32 %v1119_v57, 0.0 }
 0x20f   :  { %v966_v1 = vpop.f32.mrf.mxu2  ;;  %2297 = vmatpush.bf16.msrb.mxu1 %v4542_v50  ;;  %v4576_v50 = vld [vmem:[%s6326_s3 + $0x388] sm:$0xff] }
 0x210   :  { %1123 = vst [vmem:[#allocation2 + $0xb0] sm:$0xff] %v1121_v46  ;;  %v967_v34 = vadd.f32 %v966_v1, %v897_v56  ;;  %v900_v9 = vpop.f32.mrf.mxu0  ;;  %v5799_v37 = vpop.f32.mrf.mxu1  ;;  %v4538_v1 = vld [vmem:[%s6326_s3 + $0x258] sm:$0xff] }
 0x212   :  { %v1104_v12 = vmax.f32 %v965_v25, %v967_v34  ;;  %1632 = vmatmul.bf16.gmra.mxu1 %v5548_v21  ;;  %v4532_v21 = vld [vmem:[%s6326_s3 + $0x228] sm:$0xff]  ;;  %v4545_v34 = vld [vmem:[%s6326_s3 + $0x290] sm:$0xff] }
 0x213   :  { %1767 = vmatmul.bf16.gmra.mxu0 %v5586_v26  ;;  %2133 = vmatpush.bf16.msra.mxu2 %v4532_v21 }
 0x214   :  { %v1106_v55 = vmax.f32 %v6380_v8, %v1104_v12  ;;  %3763 = vmatmul.msk.bf16.vlgmr.msrb.gmra.mxu3 %vm991_vm2, %v5480_v63  ;;  %3816 = vmatmul.msk.bf16.gmra.mxu2 %vm991_vm2, %v5516_v60  ;;  %v4537_v12 = vld [vmem:[%s6326_s3 + $0x250] sm:$0xff] }
 0x215   :  { %2330 = vmatpush.bf16.msrb.mxu3 %v4546_v51 }
 0x216   :  { %v1108_v43 = vadd.f32 %v1106_v55, %v5417_v52 }
 0x217   :  { %v969_v31 = vpop.f32.mrf.mxu2  ;;  %2134 = vmatpush.bf16.msra.mxu2 %v4531_v24 }
 0x218   :  { %v1110_v32 = vmax.f32 %v1108_v43, 0.0  ;;  %v902_v4 = vpop.f32.mrf.mxu0  ;;  %v970_v63 = vadd.f32 %v969_v31, %v900_v9  ;;  %v4536_v43 = vld [vmem:[%s6326_s3 + $0x248] sm:$0xff] }
 0x219   :  { %2331 = vmatpush.bf16.msrb.mxu3 %v4545_v34  ;;  %v4570_v34 = vld [vmem:[%s6326_s3 + $0x358] sm:$0xff] }
 0x21a   :  { %1112 = vst.msk [vmem:[#allocation2 + $0xa8] sm:$0xff] %vm991_vm2, %v1110_v32 }
 0x21f   :  { %v971_v42 = vpop.f32.mrf.mxu2  ;;  %v1331_v13 = vpop.f32.mrf.mxu1 }
 0x220   :  { %v972_v54 = vadd.f32 %v971_v42, %v902_v4  ;;  %v1468_v49 = vpop.f32.mrf.mxu0  ;;  %v4535_v4 = vld [vmem:[%s6326_s3 + $0x240] sm:$0xff] }
 0x222   :  { %v1116_v59 = vmax.f32 %v970_v63, %v972_v54  ;;  %1637 = vmatmul.bf16.gmra.mxu1 %v5615_v10  ;;  %v4554_v10 = vld [vmem:[%s6326_s3 + $0x2d8] sm:$0xff] }
 0x223   :  { %2106 = vmatmul.bf16.vlgmr.msra.gmra.mxu0 %v5464_v14 }
 0x224   :  { %v1118_v6 = vmax.f32 %v6382_v39, %v1116_v59  ;;  %3764 = vmatmul.msk.bf16.gmra.mxu3 %vm991_vm2, %v5562_v44  ;;  %3817 = vmatmul.msk.bf16.gmra.mxu2 %vm991_vm2, %v5594_v40  ;;  %v4544_v59 = vld [vmem:[%s6326_s3 + $0x288] sm:$0xff] }
 0x225   :  { %2460 = vmatpush.bf16.msrb.mxu0 %v4554_v10  ;;  %2332 = vmatpush.bf16.msrb.mxu3 %v4544_v59  ;;  %v4555_v10 = vld [vmem:[%s6326_s3 + $0x2e0] sm:$0xff] }
 0x226   :  { %v1120_v45 = vadd.f32 %v1118_v6, %v5417_v52  ;;  %v4552_v52 = vld [vmem:[%s6326_s3 + $0x2c8] sm:$0xff] }
 0x227   :  { %v1355_v58 = vpop.f32.mrf.mxu3  ;;  %v1497_v27 = vpop.f32.mrf.mxu2 }
 0x228   :  { %v1122_v7 = vmax.f32 %v1120_v45, 0.0  ;;  %v1356_v48 = vadd.f32 %v1355_v58, %v1326_v19  ;;  %v5781_v44 = vpop.f32.mrf.mxu0  ;;  %v1333_v9 = vpop.f32.mrf.mxu1  ;;  %v2164_v19 = vld [vmem:[#allocation2 + $0x30] sm:$0xff] }
 0x229   :  { %2461 = vmatpush.bf16.msrb.mxu0 %v4553_v20  ;;  %v2180_v58 = vpack.c.bf16 %v5883_v2, %v2164_v19  ;;  %v4578_v20 = vld [vmem:[%s6326_s3 + $0x398] sm:$0xff]  ;;  %v4581_v19 = vld [vmem:[%s6326_s3 + $0x3b0] sm:$0xff] }
 0x22a   :  { %1124 = vst.msk [vmem:[#allocation2 + $0xb8] sm:$0xff] %vm991_vm2, %v1122_v7  ;;  %v1469_v23 = vadd.f32 %v1468_v49, %v1356_v48  ;;  %v4543_v48 = vld [vmem:[%s6326_s3 + $0x280] sm:$0xff] }
 0x22b   :  { %2333 = vmatpush.bf16.msrb.mxu3 %v4543_v48 }
 0x22c   :  { %v5787_v36 = vadd.f32 %v1497_v27, %v1469_v23 }
 0x22d   :  { %2462 = vmatpush.bf16.msrb.mxu0 %v4552_v52 }
 0x22f   :  { %v5830_v57 = vpop.f32.mrf.mxu3  ;;  %v5832_v46 = vpop.f32.mrf.mxu2 }
 0x230   :  { %v1473_v11 = vpop.f32.mrf.mxu0 }
 0x231   :  { %2463 = vmatpush.bf16.msrb.mxu0 %v4551_v3 }
 0x232   :  { %1943 = vmatmul.bf16.vlgmr.msra.gmra.mxu1 %v5464_v14  ;;  %v4558_v14 = vld [vmem:[%s6326_s3 + $0x2f8] sm:$0xff] }
 0x233   :  { %2111 = vmatmul.bf16.gmra.mxu0 %v5508_v22  ;;  %2493 = vmatpush.bf16.msrb.mxu2 %v4558_v14  ;;  %v5917_v14 = vld [vmem:[#allocation2 + $0x60] sm:$0xff] }
 0x234   :  { %3765 = vmatmul.msk.bf16.gmra.mxu3 %vm991_vm2, %v5626_v38  ;;  %3818 = vmatmul.msk.bf16.gmra.mxu2 %vm991_vm2, %v5663_v16  ;;  %v4541_v38 = vld [vmem:[%s6326_s3 + $0x270] sm:$0xff] }
 0x235   :  { %2464 = vmatpush.bf16.msrb.mxu0 %v4550_v0  ;;  %2298 = vmatpush.bf16.msrb.mxu1 %v4541_v38  ;;  %v5919_v38 = vld [vmem:[#allocation2 + $0x98] sm:$0xff] }
 0x237   :  { %v1502_v62 = vpop.f32.mrf.mxu2 }
 0x238   :  { %v1475_v56 = vpop.f32.mrf.mxu0 }
 0x239   :  { %2465 = vmatpush.bf16.msrb.mxu0 %v4549_v28  ;;  %2299 = vmatpush.bf16.msrb.mxu1 %v4540_v35 }
 0x23d   :  { %2466 = vmatpush.bf16.msrb.mxu0 %v4548_v18  ;;  %2300 = vmatpush.bf16.msrb.mxu1 %v4539_v15  ;;  %v4575_v15 = vld [vmem:[%s6326_s3 + $0x380] sm:$0xff] }
 0x23f   :  { %v1336_v32 = vpop.f32.mrf.mxu1  ;;  %v1504_v24 = vpop.f32.mrf.mxu2 }
 0x240   :  { %v5834_v25 = vpop.f32.mrf.mxu0 }
 0x241   :  { %2467 = vmatpush.bf16.msrb.mxu0 %v4547_v53  ;;  %2301 = vmatpush.bf16.msrb.mxu1 %v4538_v1  ;;  %v1825_v53 = vpack.c.bf16 %v5919_v38, %v5704_v5  ;;  %v4566_v1 = vld [vmem:[%s6326_s3 + $0x338] sm:$0xff] }
 0x242   :  { %1948 = vmatmul.bf16.gmra.mxu1 %v5508_v22  ;;  %v4557_v22 = vld [vmem:[%s6326_s3 + $0x2f0] sm:$0xff] }
 0x243   :  { %2116 = vmatmul.bf16.gmra.mxu0 %v5586_v26  ;;  %2494 = vmatpush.bf16.msrb.mxu2 %v4557_v22  ;;  %v4582_v22 = vld [vmem:[%s6326_s3 + $0x3b8] sm:$0xff] }
 0x244   :  { %3766 = vmatmul.msk.bf16.gmra.mxu3 %vm991_vm2, %v5713_v33  ;;  %3967 = vmatmul.msk.bf16.vlgmr.msra.gmra.mxu2 %vm991_vm2, %v5516_v60 }
 0x245   :  { %2302 = vmatpush.bf16.msrb.mxu1 %v4537_v12  ;;  %2822 = vmatpush.bf16.msra.mxu0 %v4578_v20 }
 0x247   :  { %v1360_v29 = vpop.f32.mrf.mxu3  ;;  %2495 = vmatpush.bf16.msrb.mxu2 %v4556_v47  ;;  %v4571_v47 = vld [vmem:[%s6326_s3 + $0x360] sm:$0xff] }
 0x248   :  { %v1361_v8 = vadd.f32 %v1360_v29, %v1331_v13  ;;  %v1480_v55 = vpop.f32.mrf.mxu0  ;;  %v5925_v13 = vld [vmem:[#allocation2 + $0x50] sm:$0xff] }
 0x249   :  { %2303 = vmatpush.bf16.msrb.mxu1 %v4536_v43  ;;  %v2182_v18 = vpack.c.bf16 %v5917_v14, %v5925_v13  ;;  %v4563_v43 = vld [vmem:[%s6326_s3 + $0x320] sm:$0xff] }
 0x24a   :  { %v1474_v21 = vadd.f32 %v1473_v11, %v1361_v8 }
 0x24b   :  { %2496 = vmatpush.bf16.msrb.mxu2 %v4555_v10  ;;  %v4562_v10 = vld [vmem:[%s6326_s3 + $0x318] sm:$0xff] }
 0x24c   :  { %v5860_v31 = vadd.f32 %v1502_v62, %v1474_v21  ;;  %v4564_v62 = vld [vmem:[%s6326_s3 + $0x328] sm:$0xff] }
 0x24d   :  { %2304 = vmatpush.bf16.msrb.mxu1 %v4535_v4  ;;  %v4572_v21 = vld [vmem:[%s6326_s3 + $0x368] sm:$0xff] }
 0x24e   :  { %v5970_v4 = vld [vmem:[#allocation2 + $0x48] sm:$0xff] }
 0x24f   :  { %v1362_v63 = vpop.f32.mrf.mxu3  ;;  %2855 = vmatpush.bf16.msra.mxu2 %v4582_v22 }
 0x250   :  { %v1363_v42 = vadd.f32 %v1362_v63, %v1333_v9  ;;  %v5865_v54 = vpop.f32.mrf.mxu0  ;;  %v4574_v9 = vld [vmem:[%s6326_s3 + $0x378] sm:$0xff] }
 0x251   :  { %2659 = vmatpush.bf16.msra.mxu1 %v4566_v1  ;;  %v4580_v1 = vld [vmem:[%s6326_s3 + $0x3a8] sm:$0xff] }
 0x252   :  { %v1476_v49 = vadd.f32 %v1475_v56, %v1363_v42  ;;  %1953 = vmatmul.bf16.gmra.mxu1 %v5586_v26  ;;  %v1338_v26 = vpop.f32.mrf.mxu1 }
 0x253   :  { %2121 = vmatmul.bf16.gmra.mxu0 %v5657_v41  ;;  %2856 = vmatpush.bf16.msra.mxu2 %v4581_v19 }
 0x254   :  { %3891 = vmatmul.msk.bf16.vlgmr.msra.gmra.mxu3 %vm991_vm2, %v5516_v60  ;;  %3968 = vmatmul.msk.bf16.gmra.mxu2 %vm991_vm2, %v5594_v40  ;;  %v5879_v39 = vadd.f32 %v1504_v24, %v1476_v49  ;;  %v5976_v49 = vld [vmem:[#allocation2 + $0x70] sm:$0xff]  ;;  %v2165_v24 = vld [vmem:[#allocation2 + $0x38] sm:$0xff] }
 0x255   :  { %2692 = vmatpush.bf16.msra.mxu3 %v4570_v34  ;;  %v2184_v59 = vpack.c.bf16 %v5611_v61, %v5976_v49  ;;  %v4569_v61 = vld [vmem:[%s6326_s3 + $0x350] sm:$0xff] }
 0x257   :  { %v1507_v7 = vpop.f32.mrf.mxu2  ;;  %2857 = vmatpush.bf16.msra.mxu2 %v4580_v1 }
 0x258   :  { %v5881_v6 = vpop.f32.mrf.mxu0 }
 0x259   :  { %2693 = vmatpush.bf16.msra.mxu3 %v4569_v61 }
 0x25f   :  { %v5885_v60 = vpop.f32.mrf.mxu1  ;;  %v1509_v51 = vpop.f32.mrf.mxu2 }
 0x260   :  { %v5890_v45 = vpop.f32.mrf.mxu0 }
 0x262   :  { %1958 = vmatmul.bf16.gmra.mxu1 %v5657_v41 }
 0x263   :  { %2468 = vmatmul.bf16.vlgmr.msrb.gmra.mxu0 %v2180_v58 }
 0x264   :  { %3892 = vmatmul.msk.bf16.gmra.mxu3 %vm991_vm2, %v5594_v40  ;;  %3969 = vmatmul.msk.bf16.gmra.mxu2 %vm991_vm2, %v5663_v16  ;;  %v4577_v40 = vld [vmem:[%s6326_s3 + $0x390] sm:$0xff] }
 0x265   :  { %2823 = vmatpush.bf16.msra.mxu0 %v4577_v40 }
 0x267   :  { %v1365_v23 = vpop.f32.mrf.mxu3  ;;  %v5904_v27 = vpop.f32.mrf.mxu1 }
 0x268   :  { %v1366_v41 = vadd.f32 %v1365_v23, %v1336_v32  ;;  %v5906_v52 = vpop.f32.mrf.mxu0 }
 0x269   :  { %2824 = vmatpush.bf16.msra.mxu0 %v4576_v50 }
 0x26a   :  { %v1479_v11 = vadd.f32 %v5834_v25, %v1366_v41 }
 0x26c   :  { %v5912_v3 = vadd.f32 %v1507_v7, %v1479_v11  ;;  %v4560_v11 = vld [vmem:[%s6326_s3 + $0x308] sm:$0xff] }
 0x26d   :  { %2825 = vmatpush.bf16.msra.mxu0 %v4575_v15 }
 0x26f   :  { %v1367_v0 = vpop.f32.mrf.mxu3  ;;  %v5921_v56 = vpop.f32.mrf.mxu1 }
 0x270   :  { %v1368_v28 = vadd.f32 %v1367_v0, %v1338_v26  ;;  %v5923_v35 = vpop.f32.mrf.mxu0  ;;  %v2181_v26 = vpack.c.bf16 %v5970_v4, %v2165_v24 }
 0x271   :  { %2826 = vmatpush.bf16.msra.mxu0 %v4574_v9 }
 0x272   :  { %v1481_v25 = vadd.f32 %v1480_v55, %v1368_v28  ;;  %2305 = vmatmul.bf16.vlgmr.msrb.gmra.mxu1 %v2180_v58  ;;  %v4573_v55 = vld [vmem:[%s6326_s3 + $0x370] sm:$0xff] }
 0x273   :  { %2473 = vmatmul.bf16.gmra.mxu0 %v2182_v18  ;;  %v4561_v58 = vld [vmem:[%s6326_s3 + $0x310] sm:$0xff] }
 0x274   :  { %3893 = vmatmul.msk.bf16.gmra.mxu3 %vm991_vm2, %v5663_v16  ;;  %3970 = vmatmul.msk.bf16.gmra.mxu2 %vm991_vm2, %v1825_v53  ;;  %v5946_v5 = vadd.f32 %v1509_v51, %v1481_v25  ;;  %v4565_v16 = vld [vmem:[%s6326_s3 + $0x330] sm:$0xff]  ;;  %v4559_v51 = vld [vmem:[%s6326_s3 + $0x300] sm:$0xff]  ;;  %v6013_v25 = vld [vmem:[#allocation2 + $0x58] sm:$0xff] }
 0x275   :  { %2660 = vmatpush.bf16.msra.mxu1 %v4565_v16  ;;  %2827 = vmatpush.bf16.msra.mxu0 %v4573_v55 }
 0x277   :  { %v1512_v12 = vpop.f32.mrf.mxu2  ;;  %v5954_v29 = vpop.f32.mrf.mxu1 }
 0x278   :  { %v5956_v8 = vpop.f32.mrf.mxu0 }
 0x279   :  { %2661 = vmatpush.bf16.msra.mxu1 %v4564_v62  ;;  %2828 = vmatpush.bf16.msra.mxu0 %v4572_v21 }
 0x27d   :  { %2662 = vmatpush.bf16.msra.mxu1 %v4563_v43  ;;  %2829 = vmatpush.bf16.msra.mxu0 %v4571_v47 }
 0x27f   :  { %v1514_v32 = vpop.f32.mrf.mxu2  ;;  %v5972_v63 = vpop.f32.mrf.mxu1 }
 0x280   :  { %v5974_v42 = vpop.f32.mrf.mxu0 }
 0x281   :  { %2663 = vmatpush.bf16.msra.mxu1 %v4562_v10 }
 0x282   :  { %2310 = vmatmul.bf16.gmra.mxu1 %v2182_v18 }
 0x283   :  { %2478 = vmatmul.bf16.gmra.mxu0 %v2184_v59 }
 0x284   :  { %3894 = vmatmul.msk.bf16.gmra.mxu3 %vm991_vm2, %v1825_v53  ;;  %4119 = vmatmul.msk.bf16.vlgmr.msrb.gmra.mxu2 %vm991_vm2, %v2181_v26  ;;  %v2183_v53 = vpack.c.bf16 %v5623_v17, %v6013_v25 }
 0x285   :  { %2664 = vmatpush.bf16.msra.mxu1 %v4561_v58 }
 0x287   :  { %v1370_v7 = vpop.f32.mrf.mxu3  ;;  %v1782_v48 = vpop.f32.mrf.mxu2 }
 0x288   :  { %v1371_v20 = vadd.f32 %v1370_v7, %v5885_v60  ;;  %v1630_v23 = vpop.f32.mrf.mxu1  ;;  %v5999_v41 = vpop.f32.mrf.mxu0  ;;  %v6057_v7 = vld [vmem:[#allocation2 + $0xa8] sm:$0xff] }
 0x289   :  { %2665 = vmatpush.bf16.msra.mxu1 %v4560_v11  ;;  %v2544_v11 = vpack.c.bf16 %v5976_v49, %v5917_v14  ;;  %v2536_v49 = vld [vmem:[#allocation2 + $0x90] sm:$0xff] }
 0x28a   :  { %v1484_v40 = vadd.f32 %v5865_v54, %v1371_v20 }
 0x28c   :  { %v6005_v50 = vadd.f32 %v1512_v12, %v1484_v40 }
 0x28d   :  { %2666 = vmatpush.bf16.msra.mxu1 %v4559_v51 }
 0x28f   :  { %v1372_v0 = vpop.f32.mrf.mxu3  ;;  %v1784_v28 = vpop.f32.mrf.mxu2 }
 0x290   :  { %v1373_v60 = vadd.f32 %v1372_v0, %v5904_v27  ;;  %v1633_v18 = vpop.f32.mrf.mxu1  ;;  %v6011_v15 = vpop.f32.mrf.mxu0  ;;  %v4568_v27 = vld [vmem:[%s6326_s3 + $0x348] sm:$0xff] }
 0x291   :  { %2694 = vmatpush.bf16.msra.mxu3 %v4568_v27 }
 0x292   :  { %v1486_v54 = vadd.f32 %v5881_v6, %v1373_v60  ;;  %2315 = vmatmul.bf16.gmra.mxu1 %v2184_v59  ;;  %v2542_v59 = vpack.c.bf16 %v5925_v13, %v5883_v2 }
 0x293   :  { %2483 = vmatmul.bf16.gmra.mxu0 %v5702_v30 }
 0x294   :  { %4043 = vmatmul.msk.bf16.vlgmr.msrb.gmra.mxu3 %vm991_vm2, %v2181_v26  ;;  %4120 = vmatmul.msk.bf16.gmra.mxu2 %vm991_vm2, %v2183_v53  ;;  %v6027_v34 = vadd.f32 %v1514_v32, %v1486_v54 }
 0x297   :  { %v1652_v17 = vpop.f32.mrf.mxu3  ;;  %v1787_v6 = vpop.f32.mrf.mxu2 }
 0x298   :  { %v1653_v22 = vadd.f32 %v1652_v17, %v5921_v56  ;;  %v1635_v9 = vpop.f32.mrf.mxu1  ;;  %v6030_v16 = vpop.f32.mrf.mxu0  ;;  %v4579_v56 = vld [vmem:[%s6326_s3 + $0x3a0] sm:$0xff] }
 0x299   :  { %2858 = vmatpush.bf16.msra.mxu2 %v4579_v56 }
 0x29a   :  { %v1754_v12 = vadd.f32 %v5890_v45, %v1653_v22  ;;  %v4567_v45 = vld [vmem:[%s6326_s3 + $0x340] sm:$0xff] }
 0x29b   :  { %2695 = vmatpush.bf16.msra.mxu3 %v4567_v45 }
 0x29c   :  { %v6033_v55 = vadd.f32 %v1782_v48, %v1754_v12 }
 0x29f   :  { %v1654_v62 = vpop.f32.mrf.mxu3  ;;  %v1789_v21 = vpop.f32.mrf.mxu2 }
 0x2a0   :  { %v1655_v43 = vadd.f32 %v1654_v62, %v5954_v29  ;;  %v1638_v24 = vpop.f32.mrf.mxu1  ;;  %v2107_v32 = vpop.f32.mrf.mxu0 }
 0x2a2   :  { %v1756_v47 = vadd.f32 %v5906_v52, %v1655_v43  ;;  %2320 = vmatmul.bf16.gmra.mxu1 %v5702_v30 }
 0x2a3   :  { %2830 = vmatmul.bf16.vlgmr.msra.gmra.mxu0 %v2542_v59 }
 0x2a4   :  { %4044 = vmatmul.msk.bf16.gmra.mxu3 %vm991_vm2, %v2183_v53  ;;  %4121 = vmatmul.msk.bf16.gmra.mxu2 %vm991_vm2, %v5713_v33  ;;  %v6049_v2 = vadd.f32 %v1784_v28, %v1756_v47 }
 0x2a7   :  { %v1657_v13 = vpop.f32.mrf.mxu3  ;;  %v1792_v29 = vpop.f32.mrf.mxu2 }
 0x2a8   :  { %v1658_v52 = vadd.f32 %v1657_v13, %v5972_v63  ;;  %v1640_v26 = vpop.f32.mrf.mxu1  ;;  %v6052_v30 = vpop.f32.mrf.mxu0  ;;  %v2187_v63 = vpack.c.bf16 %v6057_v7, %v5919_v38 }
 0x2aa   :  { %v1759_v10 = vadd.f32 %v5923_v35, %v1658_v52 }
 0x2ac   :  { %v6055_v61 = vadd.f32 %v1787_v6, %v1759_v10 }
 0x2af   :  { %v1659_v19 = vpop.f32.mrf.mxu3  ;;  %v1794_v58 = vpop.f32.mrf.mxu2 }
 0x2b0   :  { %v1660_v48 = vadd.f32 %v1659_v19, %v1630_v23  ;;  %v1944_v20 = vpop.f32.mrf.mxu1  ;;  %v2112_v40 = vpop.f32.mrf.mxu0  ;;  %v2538_v19 = vld [vmem:[#allocation2 + $0xa0] sm:$0xff] }
 0x2b2   :  { %v1761_v51 = vadd.f32 %v5956_v8, %v1660_v48  ;;  %2667 = vmatmul.bf16.vlgmr.msra.gmra.mxu1 %v2542_v59 }
 0x2b3   :  { %2835 = vmatmul.bf16.gmra.mxu0 %v2544_v11 }
 0x2b4   :  { %4045 = vmatmul.msk.bf16.gmra.mxu3 %vm991_vm2, %v5713_v33  ;;  %4122 = vmatmul.msk.bf16.gmra.mxu2 %vm991_vm2, %v2187_v63  ;;  %v1790_v35 = vadd.f32 %v1789_v21, %v1761_v51  ;;  %v2534_v33 = vld [vmem:[#allocation2 + $0x80] sm:$0xff] }
 0x2b5   :  { %v2546_v22 = vpack.c.bf16 %v2536_v49, %v2534_v33 }
 0x2b7   :  { %v1662_v0 = vpop.f32.mrf.mxu3  ;;  %v1797_v23 = vpop.f32.mrf.mxu2 }
 0x2b8   :  { %v1663_v28 = vadd.f32 %v1662_v0, %v1633_v18  ;;  %v6067_v60 = vpop.f32.mrf.mxu1  ;;  %v2114_v54 = vpop.f32.mrf.mxu0  ;;  %v2543_v18 = vpack.c.bf16 %v6013_v25, %v5970_v4  ;;  %v2540_v4 = vld [vmem:[#allocation2 + $0xb0] sm:$0xff] }
 0x2b9   :  { %v2548_v48 = vpack.c.bf16 %v2540_v4, %v2538_v19 }
 0x2ba   :  { %v1764_v14 = vadd.f32 %v5974_v42, %v1663_v28 }
 0x2bc   :  { %v6070_v8 = vadd.f32 %v1792_v29, %v1764_v14  ;;  %v2533_v29 = vld [vmem:[#allocation2 + $0x78] sm:$0xff] }
 0x2bf   :  { %v1664_v53 = vpop.f32.mrf.mxu3  ;;  %v1799_v27 = vpop.f32.mrf.mxu2 }
 0x2c0   :  { %v1665_v1 = vadd.f32 %v1664_v53, %v1635_v9  ;;  %v1949_v17 = vpop.f32.mrf.mxu1  ;;  %v2117_v6 = vpop.f32.mrf.mxu0 }
 0x2c2   :  { %v1766_v12 = vadd.f32 %v5999_v41, %v1665_v1  ;;  %2672 = vmatmul.bf16.gmra.mxu1 %v2544_v11  ;;  %v2535_v1 = vld [vmem:[#allocation2 + $0x88] sm:$0xff] }
 0x2c3   :  { %2840 = vmatmul.bf16.gmra.mxu0 %v2546_v22 }
 0x2c4   :  { %4046 = vmatmul.msk.bf16.gmra.mxu3 %vm991_vm2, %v2187_v63  ;;  %4271 = vmatmul.msk.bf16.vlgmr.msra.gmra.mxu2 %vm991_vm2, %v2543_v18  ;;  %v1795_v42 = vadd.f32 %v1794_v58, %v1766_v12  ;;  %v2531_v58 = vld [vmem:[#allocation2 + $0x68] sm:$0xff] }
 0x2c7   :  { %v1667_v62 = vpop.f32.mrf.mxu3  ;;  %v2136_v21 = vpop.f32.mrf.mxu2 }
 0x2c8   :  { %v1668_v43 = vadd.f32 %v1667_v62, %v1638_v24  ;;  %v2137_v9 = vadd.f32 %v2136_v21, %v2107_v32  ;;  %v1951_v59 = vpop.f32.mrf.mxu1  ;;  %v2119_v41 = vpop.f32.mrf.mxu0  ;;  %v2545_v32 = vpack.c.bf16 %v2533_v29, %v2531_v58 }
 0x2ca   :  { %v1769_v56 = vadd.f32 %v6011_v15, %v1668_v43  ;;  %v6079_v47 = vadd.f32 %v2137_v9, %v6033_v55  ;;  %v2541_v43 = vld [vmem:[#allocation2 + $0xb8] sm:$0xff] }
 0x2cc   :  { %v1798_v45 = vadd.f32 %v1797_v23, %v1769_v56 }
 0x2cf   :  { %v1669_v25 = vpop.f32.mrf.mxu3  ;;  %v6081_v13 = vpop.f32.mrf.mxu2 }
 0x2d0   :  { %v1670_v52 = vadd.f32 %v1669_v25, %v1640_v26  ;;  %v1954_v10 = vpop.f32.mrf.mxu1  ;;  %v2122_v15 = vpop.f32.mrf.mxu0 }
 0x2d2   :  { %v1771_v24 = vadd.f32 %v6030_v16, %v1670_v52  ;;  %2677 = vmatmul.bf16.gmra.mxu1 %v2546_v22 }
 0x2d3   :  { %2845 = vmatmul.bf16.gmra.mxu0 %v2548_v48 }
 0x2d4   :  { %4195 = vmatmul.msk.bf16.vlgmr.msra.gmra.mxu3 %vm991_vm2, %v2543_v18  ;;  %4272 = vmatmul.msk.bf16.gmra.mxu2 %vm991_vm2, %v2545_v32  ;;  %v1800_v55 = vadd.f32 %v1799_v27, %v1771_v24  ;;  %v2547_v27 = vpack.c.bf16 %v5919_v38, %v2535_v1 }
 0x2d7   :  { %v1973_v11 = vpop.f32.mrf.mxu3  ;;  %v2141_v51 = vpop.f32.mrf.mxu2 }
 0x2d8   :  { %v1974_v63 = vadd.f32 %v1973_v11, %v1944_v20  ;;  %v2142_v0 = vadd.f32 %v2141_v51, %v2112_v40  ;;  %v1956_v16 = vpop.f32.mrf.mxu1  ;;  %v2124_v28 = vpop.f32.mrf.mxu0 }
 0x2da   :  { %v6087_v26 = vadd.f32 %v1974_v63, %v5787_v36  ;;  %v6090_v23 = vadd.f32 %v2142_v0, %v6055_v61 }
 0x2df   :  { %v6092_v14 = vpop.f32.mrf.mxu3  ;;  %v2143_v49 = vpop.f32.mrf.mxu2 }
 0x2e0   :  { %v2144_v53 = vadd.f32 %v2143_v49, %v2114_v54  ;;  %v1959_v36 = vpop.f32.mrf.mxu1  ;;  %v2469_v40 = vpop.f32.mrf.mxu0 }
 0x2e2   :  { %v6094_v33 = vadd.f32 %v2144_v53, %v1790_v35  ;;  %2682 = vmatmul.bf16.gmra.mxu1 %v2548_v48 }
 0x2e4   :  { %4196 = vmatmul.msk.bf16.gmra.mxu3 %vm991_vm2, %v2545_v32  ;;  %4273 = vmatmul.msk.bf16.gmra.mxu2 %vm991_vm2, %v2547_v27 }
 0x2e7   :  { %v1978_v20 = vpop.f32.mrf.mxu3  ;;  %v2146_v61 = vpop.f32.mrf.mxu2 }
 0x2e8   :  { %v1979_v22 = vadd.f32 %v1978_v20, %v1949_v17  ;;  %v2147_v12 = vadd.f32 %v2146_v61, %v2117_v6  ;;  %v1961_v62 = vpop.f32.mrf.mxu1  ;;  %v6101_v56 = vpop.f32.mrf.mxu0  ;;  %v2549_v17 = vpack.c.bf16 %v2541_v43, %v6057_v7 }
 0x2ea   :  { %v1995_v18 = vadd.f32 %v1979_v22, %v5860_v31  ;;  %v2160_v54 = vadd.f32 %v2147_v12, %v6070_v8 }
 0x2ef   :  { %v1980_v35 = vpop.f32.mrf.mxu3  ;;  %v2148_v21 = vpop.f32.mrf.mxu2 }
 0x2f0   :  { %v1981_v38 = vadd.f32 %v1980_v35, %v1951_v59  ;;  %v2149_v9 = vadd.f32 %v2148_v21, %v2119_v41  ;;  %v2306_v6 = vpop.f32.mrf.mxu1  ;;  %v2474_v19 = vpop.f32.mrf.mxu0 }
 0x2f2   :  { %v6104_v4 = vadd.f32 %v1981_v38, %v5879_v39  ;;  %v6106_v25 = vadd.f32 %v2149_v9, %v1795_v42 }
 0x2f4   :  { %4197 = vmatmul.msk.bf16.gmra.mxu3 %vm991_vm2, %v2547_v27  ;;  %4274 = vmatmul.msk.bf16.gmra.mxu2 %vm991_vm2, %v2549_v17 }
 0x2f7   :  { %v1983_v31 = vpop.f32.mrf.mxu3  ;;  %v2151_v8 = vpop.f32.mrf.mxu2 }
 0x2f8   :  { %v1984_v29 = vadd.f32 %v1983_v31, %v1954_v10  ;;  %v2152_v52 = vadd.f32 %v2151_v8, %v2122_v15  ;;  %v6112_v24 = vpop.f32.mrf.mxu1  ;;  %v6120_v11 = vpop.f32.mrf.mxu0  ;;  %v4590_v8 = vld [vmem:[%s6330_s5 + $0x38] sm:$0xff] }
 0x2f9   :  { %3176 = vmatpush.bf16.msrb.mxu1 %v4590_v8 }
 0x2fa   :  { %v1997_v59 = vadd.f32 %v1984_v29, %v5912_v3  ;;  %v2162_v41 = vadd.f32 %v2152_v52, %v1798_v45  ;;  %v4588_v52 = vld [vmem:[%s6330_s5 + $0x28] sm:$0xff] }
 0x2ff   :  { %v1985_v58 = vpop.f32.mrf.mxu3  ;;  %v2153_v39 = vpop.f32.mrf.mxu2 }
 0x300   :  { %v1986_v48 = vadd.f32 %v1985_v58, %v1956_v16  ;;  %v2154_v42 = vadd.f32 %v2153_v39, %v2124_v28  ;;  %v2311_v0 = vpop.f32.mrf.mxu1 }
 0x302   :  { %v6115_v7 = vadd.f32 %v1986_v48, %v5946_v5  ;;  %v6117_v32 = vadd.f32 %v2154_v42, %v1800_v55  ;;  %v2479_v55 = vpop.f32.mrf.mxu0 }
 0x304   :  { %4198 = vmatmul.msk.bf16.gmra.mxu3 %vm991_vm2, %v2549_v17 }
 0x307   :  { %v1988_v10 = vpop.f32.mrf.mxu3  ;;  %v2498_v15 = vpop.f32.mrf.mxu2 }
 0x308   :  { %v1989_v3 = vadd.f32 %v1988_v10, %v1959_v36  ;;  %v2499_v45 = vadd.f32 %v2498_v15, %v2469_v40  ;;  %v6133_v53 = vpop.f32.mrf.mxu1  ;;  %v4587_v10 = vld [vmem:[%s6330_s5 + $0x20] sm:$0xff]  ;;  %v4598_v15 = vld [vmem:[%s6330_s5 + $0x78] sm:$0xff] }
 0x309   :  { %3189 = vmatpush.bf16.msrb.mxu3 %v4598_v15  ;;  %v4593_v15 = vld [vmem:[%s6330_s5 + $0x50] sm:$0xff] }
 0x30a   :  { %v6123_v51 = vadd.f32 %v1989_v3, %v6005_v50  ;;  %v6126_v63 = vadd.f32 %v2499_v45, %v6079_v47  ;;  %v6135_v50 = vpop.f32.mrf.mxu0  ;;  %v4614_v3 = vld [vmem:[%s6330_s5 + $0xf8] sm:$0xff] }
 0x30b   :  { %3215 = vmatpush.bf16.msrb.mxu2 %v4614_v3  ;;  %v1358_v3 = vadd.f32 %v5830_v57, %v5799_v37  ;;  %v1976_v37 = vadd.f32 %v6092_v14, %v6067_v60  ;;  %v4591_v57 = vld [vmem:[%s6330_s5 + $0x40] sm:$0xff] }
 0x30c   :  { %v4611_v60 = vld [vmem:[%s6330_s5 + $0xe0] sm:$0xff] }
 0x30f   :  { %v1990_v16 = vpop.f32.mrf.mxu3  ;;  %v6128_v5 = vpop.f32.mrf.mxu2 }
 0x310   :  { %v1991_v28 = vadd.f32 %v1990_v16, %v1961_v62  ;;  %v2501_v8 = vadd.f32 %v6128_v5, %v6101_v56  ;;  %v4605_v56 = vld [vmem:[%s6330_s5 + $0xb0] sm:$0xff]  ;;  %v4612_v5 = vld [vmem:[%s6330_s5 + $0xe8] sm:$0xff] }
 0x312   :  { %v6131_v49 = vadd.f32 %v1991_v28, %v6027_v34  ;;  %v2316_v34 = vpop.f32.mrf.mxu1  ;;  %v2484_v12 = vpop.f32.mrf.mxu0  ;;  %v4597_v28 = vld [vmem:[%s6330_s5 + $0x70] sm:$0xff] }
 0x313   :  { %3190 = vmatpush.bf16.msrb.mxu3 %v4597_v28 }
 0x317   :  { %v2335_v1 = vpop.f32.mrf.mxu3  ;;  %v2503_v27 = vpop.f32.mrf.mxu2 }
 0x318   :  { %v2336_v36 = vadd.f32 %v2335_v1, %v2306_v6  ;;  %v2504_v20 = vadd.f32 %v2503_v27, %v2474_v19  ;;  %v4589_v6 = vld [vmem:[%s6330_s5 + $0x30] sm:$0xff] }
 0x319   :  { %3177 = vmatpush.bf16.msrb.mxu1 %v4589_v6 }
 0x31a   :  { %v6138_v47 = vadd.f32 %v2336_v36, %v6087_v26  ;;  %v6141_v61 = vadd.f32 %v2504_v20, %v6090_v23  ;;  %v6147_v38 = vpop.f32.mrf.mxu1  ;;  %v6153_v26 = vpop.f32.mrf.mxu0  ;;  %v4584_v36 = vld [vmem:[%s6330_s5 + $0x8] sm:$0xff] }
 0x31b   :  { %v4596_v20 = vld [vmem:[%s6330_s5 + $0x68] sm:$0xff] }
 0x31c   :  { %3191 = vmatpush.bf16.msrb.mxu3 %v4596_v20 }
 0x31d   :  { %3178 = vmatpush.bf16.msrb.mxu1 %v4588_v52  ;;  %v4594_v52 = vld [vmem:[%s6330_s5 + $0x58] sm:$0xff] }
 0x31f   :  { %v6143_v40 = vpop.f32.mrf.mxu3  ;;  %v6145_v22 = vpop.f32.mrf.mxu2 }
 0x321   :  { %3179 = vmatpush.bf16.msrb.mxu1 %v4587_v10 }
 0x322   :  { %v2321_v29 = vpop.f32.mrf.mxu1  ;;  %v2831_v19 = vpop.f32.mrf.mxu0 }
 0x327   :  { %v2340_v62 = vpop.f32.mrf.mxu3  ;;  %v2508_v35 = vpop.f32.mrf.mxu2 }
 0x328   :  { %v2341_v21 = vadd.f32 %v2340_v62, %v2311_v0  ;;  %v2509_v43 = vadd.f32 %v2508_v35, %v2479_v55  ;;  %v4586_v0 = vld [vmem:[%s6330_s5 + $0x18] sm:$0xff]  ;;  %v4585_v55 = vld [vmem:[%s6330_s5 + $0x10] sm:$0xff]  ;;  %v2139_v62 = vadd.f32 %v6081_v13, %v6052_v30 }
 0x329   :  { %3180 = vmatpush.bf16.msrb.mxu1 %v4586_v0  ;;  %v4613_v30 = vld [vmem:[%s6330_s5 + $0xf0] sm:$0xff] }
 0x32a   :  { %v6149_v9 = vadd.f32 %v2341_v21, %v1995_v18  ;;  %v6151_v17 = vadd.f32 %v2509_v43, %v2160_v54  ;;  %v6181_v45 = vpop.f32.mrf.mxu1  ;;  %v2833_v16 = vpop.f32.mrf.mxu0  ;;  %v4583_v21 = vld [vmem:[%s6330_s5] sm:$0xff]  ;;  %v2157_v13 = vadd.f32 %v2139_v62, %v6049_v2  ;;  %3216 = vmatpush.bf16.msrb.mxu2 %v4613_v30 }
 0x32b   :  { %v4595_v43 = vld [vmem:[%s6330_s5 + $0x60] sm:$0xff] }
 0x32c   :  { %3192 = vmatpush.bf16.msrb.mxu3 %v4595_v43 }
 0x32d   :  { %3181 = vmatpush.bf16.msrb.mxu1 %v4585_v55 }
 0x32e   :  { %3217 = vmatpush.bf16.msrb.mxu2 %v4612_v5  ;;  %v4601_v5 = vld [vmem:[%s6330_s5 + $0x90] sm:$0xff] }
 0x32f   :  { %v6155_v23 = vpop.f32.mrf.mxu3  ;;  %v6157_v31 = vpop.f32.mrf.mxu2 }
 0x330   :  { %3193 = vmatpush.bf16.msrb.mxu3 %v4594_v52 }
 0x331   :  { %3182 = vmatpush.bf16.msrb.mxu1 %v4584_v36  ;;  %v4603_v36 = vld [vmem:[%s6330_s5 + $0xa0] sm:$0xff] }
 0x332   :  { %v2836_v6 = vpop.f32.mrf.mxu0  ;;  %3218 = vmatpush.bf16.msrb.mxu2 %v4611_v60 }
 0x334   :  { %3194 = vmatpush.bf16.msrb.mxu3 %v4593_v15 }
 0x335   :  { %3183 = vmatpush.bf16.msrb.mxu1 %v4583_v21 }
 0x337   :  { %v2345_v18 = vpop.f32.mrf.mxu3  ;;  %v2513_v54 = vpop.f32.mrf.mxu2 }
 0x338   :  { %v2346_v58 = vadd.f32 %v2345_v18, %v2316_v34  ;;  %v2514_v39 = vadd.f32 %v2513_v54, %v2484_v12  ;;  %v2668_v34 = vpop.f32.mrf.mxu1 }
 0x33a   :  { %v6168_v48 = vadd.f32 %v2346_v58, %v1997_v59  ;;  %v6170_v42 = vadd.f32 %v2514_v39, %v2162_v41  ;;  %v2519_v58 = vadd.f32 %v2501_v8, %v2157_v13  ;;  %v2838_v55 = vpop.f32.mrf.mxu0 }
 0x33f   :  { %v6183_v59 = vpop.f32.mrf.mxu3  ;;  %v6185_v41 = vpop.f32.mrf.mxu2 }
 0x347   :  { %v2350_v1 = vpop.f32.mrf.mxu3  ;;  %v2860_v27 = vpop.f32.mrf.mxu2 }
 0x348   :  { %v2351_v12 = vadd.f32 %v2350_v1, %v2321_v29  ;;  %v4606_v29 = vld [vmem:[%s6330_s5 + $0xb8] sm:$0xff] }
 0x349   :  { %3202 = vmatpush.bf16.msrb.mxu0 %v4606_v29  ;;  %v2841_v29 = vpop.f32.mrf.mxu0 }
 0x34a   :  { %v6205_v35 = vadd.f32 %v2351_v12, %v6123_v51  ;;  %v2861_v51 = vadd.f32 %v2860_v27, %v2831_v19  ;;  %v2670_v19 = vpop.f32.mrf.mxu1  ;;  %v1471_v27 = vadd.f32 %v5781_v44, %v1358_v3  ;;  %v2338_v12 = vadd.f32 %v6143_v40, %v6112_v24  ;;  %v4599_v3 = vld [vmem:[%s6330_s5 + $0x80] sm:$0xff] }
 0x34b   :  { %v2506_v44 = vadd.f32 %v6145_v22, %v6120_v11  ;;  %v4602_v11 = vld [vmem:[%s6330_s5 + $0x98] sm:$0xff] }
 0x34c   :  { %v2880_v39 = vadd.f32 %v2861_v51, %v6126_v63  ;;  %v4592_v63 = vld [vmem:[%s6330_s5 + $0x48] sm:$0xff]  ;;  %v1500_v20 = vadd.f32 %v5832_v46, %v1471_v27  ;;  %v4610_v46 = vld [vmem:[%s6330_s5 + $0xd8] sm:$0xff] }
 0x34d   :  { %3203 = vmatpush.bf16.msrb.mxu0 %v4605_v56  ;;  %3195 = vmatpush.bf16.msrb.mxu3 %v4592_v63  ;;  %v2521_v22 = vadd.f32 %v2506_v44, %v6094_v33  ;;  %v6277_v33 = vld [vmem:[%s6328_s4] ss:$0 sm:$0xff]  ;;  %v4608_v27 = vld [vmem:[%s6330_s5 + $0xc8] sm:$0xff] }
 0x34e   :  { %v1994_v14 = vadd.f32 %v1976_v37, %v1500_v20  ;;  %3219 = vmatpush.bf16.msrb.mxu2 %v4610_v46 }
 0x34f   :  { %v6228_v18 = vpop.f32.mrf.mxu3  ;;  %v2862_v54 = vpop.f32.mrf.mxu2 }
 0x350   :  { %v2863_v2 = vadd.f32 %v2862_v54, %v2833_v16  ;;  %v4604_v16 = vld [vmem:[%s6330_s5 + $0xa8] sm:$0xff]  ;;  %v2356_v40 = vadd.f32 %v2338_v12, %v1994_v14 }
 0x351   :  { %3204 = vmatpush.bf16.msrb.mxu0 %v4604_v16  ;;  %3196 = vmatpush.bf16.msrb.mxu3 %v4591_v57 }
 0x352   :  { %v2881_v10 = vadd.f32 %v2863_v2, %v2519_v58  ;;  %v2673_v62 = vpop.f32.mrf.mxu1 }
 0x354   :  { %v2890_v0 = vmax.f32 %v2880_v39, %v2881_v10  ;;  %v2843_v10 = vpop.f32.mrf.mxu0 }
 0x355   :  { %3205 = vmatpush.bf16.msrb.mxu0 %v4603_v36 }
 0x357   :  { %v2697_v28 = vpop.f32.mrf.mxu3  ;;  %v2865_v1 = vpop.f32.mrf.mxu2 }
 0x358   :  { %v2698_v21 = vadd.f32 %v2697_v28, %v2668_v34  ;;  %v2866_v43 = vadd.f32 %v2865_v1, %v2836_v6  ;;  %v4609_v1 = vld [vmem:[%s6330_s5 + $0xd0] sm:$0xff] }
 0x359   :  { %3206 = vmatpush.bf16.msrb.mxu0 %v4602_v11  ;;  %3220 = vmatpush.bf16.msrb.mxu2 %v4609_v1  ;;  %v4607_v11 = vld [vmem:[%s6330_s5 + $0xc0] sm:$0xff] }
 0x35a   :  { %v2717_v34 = vadd.f32 %v2698_v21, %v6138_v47  ;;  %v2882_v6 = vadd.f32 %v2866_v43, %v6141_v61  ;;  %v2675_v58 = vpop.f32.mrf.mxu1  ;;  %v4600_v61 = vld [vmem:[%s6330_s5 + $0x88] sm:$0xff] }
 0x35c   :  { %v2846_v60 = vpop.f32.mrf.mxu0 }
 0x35d   :  { %3207 = vmatpush.bf16.msrb.mxu0 %v4601_v5  ;;  %3221 = vmatpush.bf16.msrb.mxu2 %v4608_v27 }
 0x35f   :  { %v2699_v8 = vpop.f32.mrf.mxu3  ;;  %v2867_v24 = vpop.f32.mrf.mxu2 }
 0x360   :  { %v2700_v30 = vadd.f32 %v2699_v8, %v2670_v19  ;;  %v2868_v13 = vadd.f32 %v2867_v24, %v2838_v55  ;;  %v2343_v55 = vadd.f32 %v6155_v23, %v6133_v53 }
 0x361   :  { %3208 = vmatpush.bf16.msrb.mxu0 %v4600_v61  ;;  %3222 = vmatpush.bf16.msrb.mxu2 %v4607_v11 }
 0x362   :  { %v2718_v51 = vadd.f32 %v2700_v30, %v2356_v40  ;;  %v2883_v56 = vadd.f32 %v2868_v13, %v2521_v22  ;;  %v2358_v53 = vadd.f32 %v2343_v55, %v6104_v4  ;;  %v2678_v36 = vpop.f32.mrf.mxu1 }
 0x364   :  { %v2889_v54 = vmax.f32 %v2717_v34, %v2718_v51  ;;  %v2899_v52 = vmax.f32 %v2882_v6, %v2883_v56  ;;  %v2848_v22 = vpop.f32.mrf.mxu0 }
 0x365   :  { %3209 = vmatpush.bf16.msrb.mxu0 %v4599_v3 }
 0x366   :  { %v2891_v2 = vmax.f32 %v2889_v54, %v2890_v0  ;;  %v2511_v0 = vadd.f32 %v6157_v31, %v6135_v50 }
 0x367   :  { %v2702_v47 = vpop.f32.mrf.mxu3  ;;  %v2870_v19 = vpop.f32.mrf.mxu2 }
 0x368   :  { %v2895_v39 = vadd.f32 %v6277_v33, %v2891_v2  ;;  %v2703_v16 = vadd.f32 %v2702_v47, %v2673_v62  ;;  %v2871_v63 = vadd.f32 %v2870_v19, %v2841_v29  ;;  %v2523_v50 = vadd.f32 %v2511_v0, %v6106_v25 }
 0x36a   :  { %v2896_v15 = vmax.f32 %v2895_v39, 0.0  ;;  %v2719_v20 = vadd.f32 %v2703_v16, %v6149_v9  ;;  %v2884_v12 = vadd.f32 %v2871_v63, %v6151_v17  ;;  %v2680_v25 = vpop.f32.mrf.mxu1  ;;  %v2348_v9 = vadd.f32 %v6183_v59, %v6147_v38 }
 0x36b   :  { %v2516_v17 = vadd.f32 %v6185_v41, %v6153_v26 }
 0x36c   :  { %v2897_v28 = vpack.c.bf16 %v2896_v15, %v2896_v15  ;;  %v2360_v6 = vadd.f32 %v2348_v9, %v6115_v7  ;;  %v2353_v7 = vadd.f32 %v6228_v18, %v6181_v45 }
 0x36d   :  { %v2525_v51 = vadd.f32 %v2516_v17, %v6117_v32 }
 0x36e   :  { %3184 = vmatmul.bf16.vlgmr.msrb.gmra.mxu1 %v2897_v28 }
 0x36f   :  { %v2704_v37 = vpop.f32.mrf.mxu3  ;;  %v2872_v57 = vpop.f32.mrf.mxu2 }
 0x370   :  { %v2705_v23 = vadd.f32 %v2704_v37, %v2675_v58  ;;  %v2873_v31 = vadd.f32 %v2872_v57, %v2843_v10 }
 0x372   :  { %v2720_v44 = vadd.f32 %v2705_v23, %v2358_v53  ;;  %v2885_v62 = vadd.f32 %v2873_v31, %v2523_v50  ;;  %v2683_v58 = vpop.f32.mrf.mxu1 }
 0x374   :  { %v2898_v14 = vmax.f32 %v2719_v20, %v2720_v44  ;;  %v2905_v21 = vmax.f32 %v2884_v12, %v2885_v62 }
 0x376   :  { %v2900_v43 = vmax.f32 %v2898_v14, %v2899_v52 }
 0x377   :  { %v2707_v46 = vpop.f32.mrf.mxu3  ;;  %v2875_v8 = vpop.f32.mrf.mxu2 }
 0x378   :  { %v2901_v4 = vadd.f32 %v6277_v33, %v2900_v43  ;;  %v2708_v29 = vadd.f32 %v2707_v46, %v2678_v36  ;;  %v2876_v30 = vadd.f32 %v2875_v8, %v2846_v60 }
 0x37a   :  { %v2902_v24 = vmax.f32 %v2901_v4, 0.0  ;;  %v2721_v54 = vadd.f32 %v2708_v29, %v6168_v48  ;;  %v2886_v38 = vadd.f32 %v2876_v30, %v6170_v42  ;;  %v2685_v10 = vpop.f32.mrf.mxu1  ;;  %v2362_v42 = vadd.f32 %v2353_v7, %v6131_v49  ;;  %v4616_v49 = vld [vmem:[%s6329_s6] ss:$0 sm:$0xff] }
 0x37c   :  { %v2903_v40 = vpack.c.bf16 %v2902_v24, %v2902_v24 }
 0x37e   :  { %3197 = vmatmul.bf16.vlgmr.msrb.gmra.mxu3 %v2903_v40 }
 0x37f   :  { %v2709_v13 = vpop.f32.mrf.mxu3  ;;  %v2877_v34 = vpop.f32.mrf.mxu2 }
 0x380   :  { %v2710_v56 = vadd.f32 %v2709_v13, %v2680_v25  ;;  %v2878_v5 = vadd.f32 %v2877_v34, %v2848_v22 }
 0x382   :  { %v2722_v59 = vadd.f32 %v2710_v56, %v2360_v6  ;;  %v2887_v26 = vadd.f32 %v2878_v5, %v2525_v51 }
 0x384   :  { %v2904_v41 = vmax.f32 %v2721_v54, %v2722_v59  ;;  %v2911_v52 = vmax.f32 %v2886_v38, %v2887_v26 }
 0x386   :  { %v2906_v2 = vmax.f32 %v2904_v41, %v2905_v21 }
 0x387   :  { %v2712_v47 = vpop.f32.mrf.mxu3 }
 0x388   :  { %v2907_v19 = vadd.f32 %v6277_v33, %v2906_v2  ;;  %v2713_v39 = vadd.f32 %v2712_v47, %v2683_v58 }
 0x38a   :  { %v2908_v61 = vmax.f32 %v2907_v19, 0.0  ;;  %v2723_v3 = vadd.f32 %v2713_v39, %v6205_v35 }
 0x38c   :  { %v2909_v32 = vpack.c.bf16 %v2908_v61, %v2908_v61 }
 0x38e   :  { %3210 = vmatmul.bf16.vlgmr.msrb.gmra.mxu0 %v2909_v32 }
 0x38f   :  { %v2714_v48 = vpop.f32.mrf.mxu3 }
 0x390   :  { %v2715_v15 = vadd.f32 %v2714_v48, %v2685_v10 }
 0x392   :  { %v2724_v55 = vadd.f32 %v2715_v15, %v2362_v42 }
 0x394   :  { %v2910_v0 = vmax.f32 %v2723_v3, %v2724_v55 }
 0x396   :  { %v2912_v28 = vmax.f32 %v2910_v0, %v2911_v52 }
 0x398   :  { %v2913_v1 = vadd.f32 %v6277_v33, %v2912_v28 }
 0x39a   :  { %v2914_v16 = vmax.f32 %v2913_v1, 0.0 }
 0x39c   :  { %v2915_v63 = vpack.c.bf16 %v2914_v16, %v2914_v16 }
 0x39e   :  { %3223 = vmatmul.bf16.vlgmr.msrb.gmra.mxu2 %v2915_v63 }
 0x3eb   :  { %v3185_v27 = vpop.f32.mrf.mxu1 }
 0x3ec   :  { %v3186_v50 = vadd.f32 %v4616_v49, %v3185_v27 }
 0x3f3   :  { %v3187_v45 = vpop.f32.mrf.mxu1 }
 0x401   :  { %v3198_v18 = vpop.f32.mrf.mxu3 }
 0x402   :  { %v3199_v35 = vadd.f32 %v3198_v18, %v3186_v50 }
 0x409   :  { %v3200_v37 = vpop.f32.mrf.mxu3 }
 0x40b   :  { %v3211_v57 = vpop.f32.mrf.mxu0 }
 0x40c   :  { %v3212_v23 = vadd.f32 %v3211_v57, %v3199_v35 }
 0x413   :  { %v3213_v53 = vpop.f32.mrf.mxu0 }
 0x421   :  { %v3224_v31 = vpop.f32.mrf.mxu2 }
 0x422   :  { %v3225_v36 = vadd.f32 %v3224_v31, %v3212_v23 }
 0x424   :  { %3228 = vst [vmem:[%s6331_s7] sm:$0xff] %v3225_v36 }
 0x429   :  { %v3226_v33 = vpop.f32.mrf.mxu2 }

</bundles_post_ra>
